<compile_context>
chip_gen: v7x
topology: tpu7x:2x2x1
jax: 0.10.0
libtpu: 0.0.40
codegen_flags: <defaults>
</compile_context>

<pallas_src>
import functools

import jax
import jax.numpy as jnp
from jax import lax
from jax.experimental import pallas as pl
from jax.experimental.pallas import tpu as pltpu


def _round_up(x, m):
    return (x + m - 1) // m * m


def _pick_compute_dtype():
    """bf16 depthwise on bf16-native VALUs (v6e/v7x); f32 elsewhere."""
    try:
        kind = jax.devices()[0].device_kind.lower()
    except Exception:
        return jnp.float32
    if any(tag in kind for tag in ("v6", "v7", "tpu7", "trillium")):
        return jnp.bfloat16
    return jnp.float32


def middle_flow_kernel(x_ref, dw_ref, pw_ref, shift_ref, o_ref, hbuf0, hbuf1,
                       *, w_valid, h_chunk, compute_dtype):
    # x_ref block: (1, H, Wp, Cp)
    _, H, Wp, Cp = x_ref.shape
    cdt = compute_dtype

    # Hoisted once (reused by all 3 blocks / all chunks):
    # right-neighbour mask: garbage in padded W columns (>= w_valid) of the
    # inter-block activation must never leak back into valid columns.
    col = lax.broadcasted_iota(jnp.int32, (1, Wp, Cp), 1)
    rmask = col < (w_valid - 1)
    # all 27 depthwise taps (3 blocks x 3 x 3), per-channel vectors.
    taps = dw_ref[...].astype(cdt)                       # (3, 3, 3, Cp)

    zrow = jnp.zeros((1, Wp, Cp), cdt)
    bufs = (hbuf0, hbuf1)

    # Zero the H-halo rows of both ping-pong buffers; they are never written
    # afterwards, so padding=1 along H is free for every depthwise below.
    for b in bufs:
        b[pl.ds(0, 1)] = zrow
        b[pl.ds(H + 1, 1)] = zrow

    # Block 0 input: relu(x) into buffer 0, rows 1..H.
    bufs[0][pl.ds(1, H)] = jnp.maximum(x_ref[0], 0.0).astype(cdt)

    # Static H-chunk schedule (ragged tail allowed).  Chunking lets the MXU
    # matmul of chunk i overlap the VPU depthwise of chunk i+1.
    chunks = [(r0, min(h_chunk, H - r0)) for r0 in range(0, H, h_chunk)]

    for blk in range(3):
        src = bufs[blk % 2]          # holds relu(previous block output)
        dst = bufs[1 - (blk % 2)]    # receives relu(this block output)
        pw_blk = pw_ref[blk]         # (Cp, Cp) bf16, BN scale pre-folded
        shift_blk = shift_ref[blk]   # (Cp,)    f32, folded BN shift

        for (r0, rc) in chunks:
            # ---- depthwise 3x3, padding=1 (VPU), roll-after-sum form -----
            # First sum the 3 H-taps on un-shifted data, then shift each of
            # the 3 kw columns once (shift/mask commute with the per-channel
            # tap multiply and the H slice).
            rows = [src[pl.ds(r0 + dh, rc)] for dh in range(3)]   # (rc,Wp,Cp)
            p = []
            for dw in range(3):
                t = rows[0] * taps[blk, 0, dw]
                t = t + rows[1] * taps[blk, 1, dw]
                t = t + rows[2] * taps[blk, 2, dw]
                p.append(t)
            zc = jnp.zeros((rc, 1, Cp), cdt)
            # kw=0: left neighbour -> shift right by one column (zero-fills
            # column 0, so no extra mask needed).
            left = jnp.concatenate([zc, p[0][:, :Wp - 1, :]], axis=1)
            # kw=2: right neighbour -> shift left by one column; mask so the
            # padded/garbage columns >= w_valid never feed valid columns.
            right = jnp.concatenate([p[2][:, 1:, :], zc], axis=1)
            right = jnp.where(rmask, right, jnp.zeros_like(right))
            acc = p[1] + left + right                             # (rc,Wp,Cp)

            # ---- pointwise 1x1 == channel matmul (MXU, bf16 in / f32 acc) -
            # Wp % 8 == 0 and Cp % 128 == 0 => layout-preserving reshape.
            a2d = acc.reshape(rc * Wp, Cp).astype(jnp.bfloat16)
            y = jnp.dot(a2d, pw_blk, preferred_element_type=jnp.float32)
            y = y + shift_blk                                     # folded BN
            y3d = y.reshape(rc, Wp, Cp)

            if blk < 2:
                # Next block's input = relu(this block's output).
                dst[pl.ds(r0 + 1, rc)] = jnp.maximum(y3d, 0.0).astype(cdt)
            else:
                # Residual add straight to the output chunk (re-reads x
                # instead of keeping it live across the blocks).
                o_ref[0, pl.ds(r0, rc)] = (
                    x_ref[0, pl.ds(r0, rc)].astype(jnp.float32) + y3d
                ).astype(o_ref.dtype)


def prepare_params(dw_w, pw_w, bn_scale, bn_shift, Cp):
    """Fold BN scale into pointwise weights, pad channels, cast MXU weights."""
    C = dw_w.shape[-1]
    pw_folded = pw_w * bn_scale[:, None, :]
    dw_p = jnp.pad(dw_w, ((0, 0), (0, 0), (0, 0), (0, Cp - C))).astype(jnp.float32)
    pw_p = jnp.pad(pw_folded, ((0, 0), (0, Cp - C), (0, Cp - C))).astype(jnp.bfloat16)
    sh_p = jnp.pad(bn_shift, ((0, 0), (0, Cp - C))).astype(jnp.float32)
    return dw_p, pw_p, sh_p


def middle_flow_block_padded(xp, dw_p, pw_p, sh_p, *, w_valid,
                             compute_dtype=None, h_chunk=8):
    """Pre-padded entry point (NHWC, W padded to a multiple of 8, C to 128).

    Use this directly when stacking the 8 Xception middle-flow blocks so the
    pad/slice HBM round trips happen once outside the stack, not per block.
    """
    N, H, Wp, Cp = xp.shape
    if compute_dtype is None:
        compute_dtype = _pick_compute_dtype()
    h_chunk = max(1, min(h_chunk, H))

    kernel = functools.partial(middle_flow_kernel, w_valid=w_valid,
                               h_chunk=h_chunk, compute_dtype=compute_dtype)

    cdt_bytes = jnp.dtype(compute_dtype).itemsize
    # Right-sized VMEM request: double-buffered x/out blocks + weights, plus
    # the two ping-pong scratch buffers, with headroom; capped below v7x's
    # 64 MiB physical VMEM (previously a blanket 64 MiB was requested).
    est = (2 * (2 * H * Wp * Cp * 4
                + 27 * Cp * 4 + 3 * Cp * Cp * 2 + 3 * Cp * 4)
           + 2 * (H + 2) * Wp * Cp * cdt_bytes)
    vmem_limit = int(min(max(2 * est, 32 * 1024 * 1024), 56 * 1024 * 1024))

    def call(single_buffer_weights):
        wkw = {}
        if single_buffer_weights and hasattr(pl, "Buffered"):
            # Grid-invariant weights never change across grid steps; a single
            # buffer halves their VMEM footprint (~3.5 MB bf16 pw at C=728).
            wkw = dict(pipeline_mode=pl.Buffered(1))
        grid_spec = pltpu.PrefetchScalarGridSpec(
            num_scalar_prefetch=0,
            grid=(N,),
            in_specs=[
                pl.BlockSpec((1, H, Wp, Cp), lambda n: (n, 0, 0, 0)),
                pl.BlockSpec((3, 3, 3, Cp), lambda n: (0, 0, 0, 0), **wkw),
                pl.BlockSpec((3, Cp, Cp), lambda n: (0, 0, 0), **wkw),
                pl.BlockSpec((3, Cp), lambda n: (0, 0), **wkw),
            ],
            out_specs=pl.BlockSpec((1, H, Wp, Cp), lambda n: (n, 0, 0, 0)),
            scratch_shapes=[
                pltpu.VMEM((H + 2, Wp, Cp), compute_dtype),
                pltpu.VMEM((H + 2, Wp, Cp), compute_dtype),
            ],
        )
        return pl.pallas_call(
            kernel,
            out_shape=jax.ShapeDtypeStruct((N, H, Wp, Cp), xp.dtype),
            grid_spec=grid_spec,
            compiler_params=pltpu.CompilerParams(
                dimension_semantics=("parallel",),
                vmem_limit_bytes=vmem_limit,
            ),
        )(xp, dw_p, pw_p, sh_p)

    try:
        return call(True)
    except Exception:
        # pl.Buffered(1) single-buffering unsupported on this JAX / backend:
        # fall back to default (double-buffered) weight pipelining.
        return call(False)


def middle_flow_block(x, dw_w, pw_w, bn_scale, bn_shift, *, compute_dtype=None):
    """Xception MiddleFlowBlock forward (inference BN), NHWC.

    x: (N, H, W, C) f32.  dw_w: (3,3,3,C) depthwise taps (block, kh, kw, c).
    pw_w: (3, C, C) pointwise (c_in, c_out).  bn_scale/bn_shift: (3, C)
    folded BatchNorm (eval mode).
    """
    N, H, W, C = x.shape
    Wp = max(_round_up(W, 8), 8)        # sublane-aligned width
    Cp = max(_round_up(C, 128), 128)    # lane-aligned channels

    # Zero-pad: padded channels stay exactly zero through every block (zero
    # taps / zero matmul rows+cols / zero shift); padded width columns are
    # blocked from leaking into valid columns by the right-tap mask and are
    # sliced off at the end.
    xp = jnp.pad(x, ((0, 0), (0, 0), (0, Wp - W), (0, Cp - C)))
    dw_p, pw_p, sh_p = prepare_params(dw_w, pw_w, bn_scale, bn_shift, Cp)

    out = middle_flow_block_padded(xp, dw_p, pw_p, sh_p, w_valid=W,
                                   compute_dtype=compute_dtype)
    return out[:, :, :W, :C]


def reference_forward(x, dw_w, pw_w, bn_scale, bn_shift):
    """Pure-JAX f32 reference (NHWC) mirroring the PyTorch module (eval BN)."""
    N, H, W, C = x.shape
    h = x.astype(jnp.float32)
    for blk in range(3):
        h = jnp.maximum(h, 0.0)
        w_dw = dw_w[blk][:, :, None, :]                # (3,3,1,C) HWIO, groups=C
        h = lax.conv_general_dilated(
            h, w_dw, window_strides=(1, 1), padding=((1, 1), (1, 1)),
            dimension_numbers=('NHWC', 'HWIO', 'NHWC'),
            feature_group_count=C)
        h = jnp.einsum('nhwc,cd->nhwd', h, pw_w[blk])
        h = h * bn_scale[blk] + bn_shift[blk]
    return x + h


if __name__ == "__main__":
    # Small, module-consistent shapes (real Xception uses C=728, W=19; scaled).
    N, H, W, C = 2, 8, 8, 128

    key = jax.random.PRNGKey(0)
    k = jax.random.split(key, 8)

    x = jax.random.normal(k[0], (N, H, W, C), jnp.float32)
    # Depthwise weights: PyTorch (C,1,3,3) per block -> (3 blocks, 3, 3, C).
    dw_w = 0.1 * jax.random.normal(k[1], (3, 3, 3, C), jnp.float32)
    # Pointwise weights: PyTorch (Cout,Cin,1,1) per block -> (3, Cin, Cout).
    pw_w = (1.0 / jnp.sqrt(C)) * jax.random.normal(k[2], (3, C, C), jnp.float32)

    # BatchNorm (eval mode) folded to scale/shift.
    gamma = 1.0 + 0.1 * jax.random.normal(k[3], (3, C), jnp.float32)
    beta = 0.1 * jax.random.normal(k[4], (3, C), jnp.float32)
    run_mean = 0.1 * jax.random.normal(k[5], (3, C), jnp.float32)
    run_var = jnp.abs(jax.random.normal(k[6], (3, C), jnp.float32)) + 0.5
    eps = 1e-5
    bn_scale = gamma / jnp.sqrt(run_var + eps)
    bn_shift = beta - run_mean * bn_scale

    # Tolerance vs. the pure-f32 reference: MXU inputs are bf16 (f32 acc);
    # on bf16-VPU generations the depthwise also runs in bf16.
    tol = 3e-2 if _pick_compute_dtype() == jnp.bfloat16 else 2e-2

    out = jax.block_until_ready(middle_flow_block(x, dw_w, pw_w, bn_scale, bn_shift))
    ref = jax.block_until_ready(reference_forward(x, dw_w, pw_w, bn_scale, bn_shift))
    assert out.shape == (N, H, W, C)
    max_err = float(jnp.max(jnp.abs(out - ref)))
    assert jnp.allclose(out, ref, rtol=tol, atol=tol), max_err

    # Unaligned shapes (W % 8 != 0, C % 128 != 0) exercise the padding path
    # used for the real Xception size (W=19, C=728).
    N2, H2, W2, C2 = 1, 5, 6, 96
    x2 = jax.random.normal(k[7], (N2, H2, W2, C2), jnp.float32)
    dw2 = 0.1 * jax.random.normal(k[1], (3, 3, 3, C2), jnp.float32)
    pw2 = (1.0 / jnp.sqrt(C2)) * jax.random.normal(k[2], (3, C2, C2), jnp.float32)
    sc2 = 1.0 + 0.1 * jax.random.normal(k[3], (3, C2), jnp.float32)
    sh2 = 0.1 * jax.random.normal(k[4], (3, C2), jnp.float32)
    out2 = jax.block_until_ready(middle_flow_block(x2, dw2, pw2, sc2, sh2))
    ref2 = jax.block_until_ready(reference_forward(x2, dw2, pw2, sc2, sh2))
    assert out2.shape == (N2, H2, W2, C2)
    max_err2 = float(jnp.max(jnp.abs(out2 - ref2)))
    assert jnp.allclose(out2, ref2, rtol=tol, atol=tol), max_err2

    print("KERNEL_OK")
</pallas_src>

<mosaic_0001>
module attributes {stable_mosaic.version = 11 : i64} {
  func.func @middle_flow_kernel(%arg0: i32, %arg1: memref<1x8x8x128xf32, #tpu.memory_space<vmem>>, %arg2: memref<3x3x3x128xf32, #tpu.memory_space<vmem>>, %arg3: memref<3x128x128xbf16, #tpu.memory_space<vmem>>, %arg4: memref<3x128xf32, #tpu.memory_space<vmem>>, %arg5: memref<1x8x8x128xf32, #tpu.memory_space<vmem>>, %arg6: memref<10x8x128xf32, #tpu.memory_space<vmem>>, %arg7: memref<10x8x128xf32, #tpu.memory_space<vmem>>) attributes {dimension_semantics = [#tpu.dimension_semantics<parallel>], iteration_bounds = array<i64: 2>, scalar_prefetch = 0 : i64, scratch_operands = 2 : i64, tpu.core_type = #tpu.core_type<tc>, window_params = [{transform_indices = @transform_0, window_bounds = array<i64: 1, 8, 8, 128>}, {pipeline_mode = #tpu.pipeline_mode<synchronous>, transform_indices = @transform_1, window_bounds = array<i64: 3, 3, 3, 128>}, {pipeline_mode = #tpu.pipeline_mode<synchronous>, transform_indices = @transform_2, window_bounds = array<i64: 3, 128, 128>}, {pipeline_mode = #tpu.pipeline_mode<synchronous>, transform_indices = @transform_3, window_bounds = array<i64: 3, 128>}, {transform_indices = @transform_4, window_bounds = array<i64: 1, 8, 8, 128>}]} {
    %0 = tpu.iota {dimensions = array<i32: 1>} : vector<1x8x128xi32>
    %c7_i32 = arith.constant 7 : i32
    %1 = vector.broadcast %c7_i32 : i32 to vector<1x8x128xi32>
    %2 = arith.cmpi slt, %0, %1 : vector<1x8x128xi32>
    %c0 = arith.constant 0 : index
    %c0_0 = arith.constant 0 : index
    %c0_1 = arith.constant 0 : index
    %c0_2 = arith.constant 0 : index
    %3 = vector.load %arg2[%c0, %c0_0, %c0_1, %c0_2] : memref<3x3x3x128xf32, #tpu.memory_space<vmem>>, vector<3x3x3x128xf32>
    %cst = arith.constant 0.000000e+00 : f32
    %4 = vector.broadcast %cst : f32 to vector<1x8x128xf32>
    %c0_3 = arith.constant 0 : index
    %c0_4 = arith.constant 0 : index
    %c0_5 = arith.constant 0 : index
    %5 = vector.load %arg6[%c0_3, %c0_4, %c0_5] : memref<10x8x128xf32, #tpu.memory_space<vmem>>, vector<1x8x128xf32>
    tpu.vector_store %arg6[%c0_3, %c0_4, %c0_5], %4 {strides = array<i32>} : memref<10x8x128xf32, #tpu.memory_space<vmem>>, vector<1x8x128xf32>,
    %c9 = arith.constant 9 : index
    %c0_6 = arith.constant 0 : index
    %c0_7 = arith.constant 0 : index
    %6 = vector.load %arg6[%c9, %c0_6, %c0_7] : memref<10x8x128xf32, #tpu.memory_space<vmem>>, vector<1x8x128xf32>
    tpu.vector_store %arg6[%c9, %c0_6, %c0_7], %4 {strides = array<i32>} : memref<10x8x128xf32, #tpu.memory_space<vmem>>, vector<1x8x128xf32>,
    %c0_8 = arith.constant 0 : index
    %c0_9 = arith.constant 0 : index
    %c0_10 = arith.constant 0 : index
    %7 = vector.load %arg7[%c0_8, %c0_9, %c0_10] : memref<10x8x128xf32, #tpu.memory_space<vmem>>, vector<1x8x128xf32>
    tpu.vector_store %arg7[%c0_8, %c0_9, %c0_10], %4 {strides = array<i32>} : memref<10x8x128xf32, #tpu.memory_space<vmem>>, vector<1x8x128xf32>,
    %c9_11 = arith.constant 9 : index
    %c0_12 = arith.constant 0 : index
    %c0_13 = arith.constant 0 : index
    %8 = vector.load %arg7[%c9_11, %c0_12, %c0_13] : memref<10x8x128xf32, #tpu.memory_space<vmem>>, vector<1x8x128xf32>
    tpu.vector_store %arg7[%c9_11, %c0_12, %c0_13], %4 {strides = array<i32>} : memref<10x8x128xf32, #tpu.memory_space<vmem>>, vector<1x8x128xf32>,
    %c0_14 = arith.constant 0 : index
    %c0_15 = arith.constant 0 : index
    %c0_16 = arith.constant 0 : index
    %c0_17 = arith.constant 0 : index
    %9 = vector.load %arg1[%c0_14, %c0_15, %c0_16, %c0_17] : memref<1x8x8x128xf32, #tpu.memory_space<vmem>>, vector<1x8x8x128xf32>
    %10 = vector.shape_cast %9 : vector<1x8x8x128xf32> to vector<8x8x128xf32>
    %cst_18 = arith.constant 0.000000e+00 : f32
    %11 = vector.broadcast %cst_18 : f32 to vector<8x8x128xf32>
    %12 = arith.maximumf %10, %11 : vector<8x8x128xf32>
    %c1 = arith.constant 1 : index
    %c0_19 = arith.constant 0 : index
    %c0_20 = arith.constant 0 : index
    %13 = vector.load %arg6[%c1, %c0_19, %c0_20] : memref<10x8x128xf32, #tpu.memory_space<vmem>>, vector<8x8x128xf32>
    tpu.vector_store %arg6[%c1, %c0_19, %c0_20], %12 {strides = array<i32>} : memref<10x8x128xf32, #tpu.memory_space<vmem>>, vector<8x8x128xf32>,
    %c0_21 = arith.constant 0 : index
    %c0_22 = arith.constant 0 : index
    %c0_23 = arith.constant 0 : index
    %14 = vector.load %arg3[%c0_21, %c0_22, %c0_23] : memref<3x128x128xbf16, #tpu.memory_space<vmem>>, vector<1x128x128xbf16>
    %15 = vector.shape_cast %14 : vector<1x128x128xbf16> to vector<128x128xbf16>
    %c0_24 = arith.constant 0 : index
    %c0_25 = arith.constant 0 : index
    %16 = vector.load %arg4[%c0_24, %c0_25] : memref<3x128xf32, #tpu.memory_space<vmem>>, vector<1x128xf32>
    %17 = vector.shape_cast %16 : vector<1x128xf32> to vector<128xf32>
    %c0_26 = arith.constant 0 : index
    %c0_27 = arith.constant 0 : index
    %c0_28 = arith.constant 0 : index
    %18 = vector.load %arg6[%c0_26, %c0_27, %c0_28] : memref<10x8x128xf32, #tpu.memory_space<vmem>>, vector<8x8x128xf32>
    %c1_29 = arith.constant 1 : index
    %c0_30 = arith.constant 0 : index
    %c0_31 = arith.constant 0 : index
    %19 = vector.load %arg6[%c1_29, %c0_30, %c0_31] : memref<10x8x128xf32, #tpu.memory_space<vmem>>, vector<8x8x128xf32>
    %c2 = arith.constant 2 : index
    %c0_32 = arith.constant 0 : index
    %c0_33 = arith.constant 0 : index
    %20 = vector.load %arg6[%c2, %c0_32, %c0_33] : memref<10x8x128xf32, #tpu.memory_space<vmem>>, vector<8x8x128xf32>
    %21 = vector.extract_strided_slice %3 {offsets = [0, 0, 0, 0], sizes = [1, 1, 1, 128], strides = [1, 1, 1, 1]} : vector<3x3x3x128xf32> to vector<1x1x1x128xf32>
    %22 = vector.shape_cast %21 : vector<1x1x1x128xf32> to vector<128xf32>
    %23 = vector.shape_cast %22 : vector<128xf32> to vector<1x1x128xf32>
    %24 = vector.broadcast %23 : vector<1x1x128xf32> to vector<8x8x128xf32>
    %25 = arith.mulf %18, %24 : vector<8x8x128xf32>
    %26 = vector.extract_strided_slice %3 {offsets = [0, 1, 0, 0], sizes = [1, 1, 1, 128], strides = [1, 1, 1, 1]} : vector<3x3x3x128xf32> to vector<1x1x1x128xf32>
    %27 = vector.shape_cast %26 : vector<1x1x1x128xf32> to vector<128xf32>
    %28 = vector.shape_cast %27 : vector<128xf32> to vector<1x1x128xf32>
    %29 = vector.broadcast %28 : vector<1x1x128xf32> to vector<8x8x128xf32>
    %30 = arith.mulf %19, %29 : vector<8x8x128xf32>
    %31 = arith.addf %25, %30 : vector<8x8x128xf32>
    %32 = vector.extract_strided_slice %3 {offsets = [0, 2, 0, 0], sizes = [1, 1, 1, 128], strides = [1, 1, 1, 1]} : vector<3x3x3x128xf32> to vector<1x1x1x128xf32>
    %33 = vector.shape_cast %32 : vector<1x1x1x128xf32> to vector<128xf32>
    %34 = vector.shape_cast %33 : vector<128xf32> to vector<1x1x128xf32>
    %35 = vector.broadcast %34 : vector<1x1x128xf32> to vector<8x8x128xf32>
    %36 = arith.mulf %20, %35 : vector<8x8x128xf32>
    %37 = arith.addf %31, %36 : vector<8x8x128xf32>
    %38 = vector.extract_strided_slice %3 {offsets = [0, 0, 1, 0], sizes = [1, 1, 1, 128], strides = [1, 1, 1, 1]} : vector<3x3x3x128xf32> to vector<1x1x1x128xf32>
    %39 = vector.shape_cast %38 : vector<1x1x1x128xf32> to vector<128xf32>
    %40 = vector.shape_cast %39 : vector<128xf32> to vector<1x1x128xf32>
    %41 = vector.broadcast %40 : vector<1x1x128xf32> to vector<8x8x128xf32>
    %42 = arith.mulf %18, %41 : vector<8x8x128xf32>
    %43 = vector.extract_strided_slice %3 {offsets = [0, 1, 1, 0], sizes = [1, 1, 1, 128], strides = [1, 1, 1, 1]} : vector<3x3x3x128xf32> to vector<1x1x1x128xf32>
    %44 = vector.shape_cast %43 : vector<1x1x1x128xf32> to vector<128xf32>
    %45 = vector.shape_cast %44 : vector<128xf32> to vector<1x1x128xf32>
    %46 = vector.broadcast %45 : vector<1x1x128xf32> to vector<8x8x128xf32>
    %47 = arith.mulf %19, %46 : vector<8x8x128xf32>
    %48 = arith.addf %42, %47 : vector<8x8x128xf32>
    %49 = vector.extract_strided_slice %3 {offsets = [0, 2, 1, 0], sizes = [1, 1, 1, 128], strides = [1, 1, 1, 1]} : vector<3x3x3x128xf32> to vector<1x1x1x128xf32>
    %50 = vector.shape_cast %49 : vector<1x1x1x128xf32> to vector<128xf32>
    %51 = vector.shape_cast %50 : vector<128xf32> to vector<1x1x128xf32>
    %52 = vector.broadcast %51 : vector<1x1x128xf32> to vector<8x8x128xf32>
    %53 = arith.mulf %20, %52 : vector<8x8x128xf32>
    %54 = arith.addf %48, %53 : vector<8x8x128xf32>
    %55 = vector.extract_strided_slice %3 {offsets = [0, 0, 2, 0], sizes = [1, 1, 1, 128], strides = [1, 1, 1, 1]} : vector<3x3x3x128xf32> to vector<1x1x1x128xf32>
    %56 = vector.shape_cast %55 : vector<1x1x1x128xf32> to vector<128xf32>
    %57 = vector.shape_cast %56 : vector<128xf32> to vector<1x1x128xf32>
    %58 = vector.broadcast %57 : vector<1x1x128xf32> to vector<8x8x128xf32>
    %59 = arith.mulf %18, %58 : vector<8x8x128xf32>
    %60 = vector.extract_strided_slice %3 {offsets = [0, 1, 2, 0], sizes = [1, 1, 1, 128], strides = [1, 1, 1, 1]} : vector<3x3x3x128xf32> to vector<1x1x1x128xf32>
    %61 = vector.shape_cast %60 : vector<1x1x1x128xf32> to vector<128xf32>
    %62 = vector.shape_cast %61 : vector<128xf32> to vector<1x1x128xf32>
    %63 = vector.broadcast %62 : vector<1x1x128xf32> to vector<8x8x128xf32>
    %64 = arith.mulf %19, %63 : vector<8x8x128xf32>
    %65 = arith.addf %59, %64 : vector<8x8x128xf32>
    %66 = vector.extract_strided_slice %3 {offsets = [0, 2, 2, 0], sizes = [1, 1, 1, 128], strides = [1, 1, 1, 1]} : vector<3x3x3x128xf32> to vector<1x1x1x128xf32>
    %67 = vector.shape_cast %66 : vector<1x1x1x128xf32> to vector<128xf32>
    %68 = vector.shape_cast %67 : vector<128xf32> to vector<1x1x128xf32>
    %69 = vector.broadcast %68 : vector<1x1x128xf32> to vector<8x8x128xf32>
    %70 = arith.mulf %20, %69 : vector<8x8x128xf32>
    %71 = arith.addf %65, %70 : vector<8x8x128xf32>
    %cst_34 = arith.constant 0.000000e+00 : f32
    %72 = vector.broadcast %cst_34 : f32 to vector<8x1x128xf32>
    %73 = vector.extract_strided_slice %37 {offsets = [0, 0, 0], sizes = [8, 7, 128], strides = [1, 1, 1]} : vector<8x8x128xf32> to vector<8x7x128xf32>
    %74 = tpu.concatenate %72, %73 in 1 : vector<8x1x128xf32>, vector<8x7x128xf32> -> vector<8x8x128xf32>
    %75 = vector.extract_strided_slice %71 {offsets = [0, 1, 0], sizes = [8, 7, 128], strides = [1, 1, 1]} : vector<8x8x128xf32> to vector<8x7x128xf32>
    %76 = tpu.concatenate %75, %72 in 1 : vector<8x7x128xf32>, vector<8x1x128xf32> -> vector<8x8x128xf32>
    %cst_35 = arith.constant 0.000000e+00 : f32
    %77 = vector.broadcast %cst_35 : f32 to vector<8x8x128xf32>
    %78 = vector.shape_cast %2 : vector<1x8x128xi1> to vector<1x8x128xi1>
    %79 = vector.broadcast %78 : vector<1x8x128xi1> to vector<8x8x128xi1>
    %80 = arith.select %79, %76, %77 : vector<8x8x128xi1>, vector<8x8x128xf32>
    %81 = arith.addf %54, %74 : vector<8x8x128xf32>
    %82 = arith.addf %81, %80 : vector<8x8x128xf32>
    %83 = vector.shape_cast %82 : vector<8x8x128xf32> to vector<64x128xf32>
    %84 = arith.truncf %83 : vector<64x128xf32> to vector<64x128xbf16>
    %cst_36 = arith.constant dense<0.000000e+00> : vector<64x128xf32>
    %85 = tpu.matmul %84, %15, %cst_36 {dimension_numbers = #tpu.dot_dimension_numbers<[1], [0], [0], [1], [0, 0, 1, 1], [], []>} : vector<64x128xbf16>, vector<128x128xbf16>, vector<64x128xf32> -> vector<64x128xf32>
    %86 = vector.shape_cast %17 : vector<128xf32> to vector<1x128xf32>
    %87 = vector.broadcast %86 : vector<1x128xf32> to vector<64x128xf32>
    %88 = arith.addf %85, %87 : vector<64x128xf32>
    %89 = vector.shape_cast %88 : vector<64x128xf32> to vector<8x8x128xf32>
    %cst_37 = arith.constant 0.000000e+00 : f32
    %90 = vector.broadcast %cst_37 : f32 to vector<8x8x128xf32>
    %91 = arith.maximumf %89, %90 : vector<8x8x128xf32>
    %c1_38 = arith.constant 1 : index
    %c0_39 = arith.constant 0 : index
    %c0_40 = arith.constant 0 : index
    %92 = vector.load %arg7[%c1_38, %c0_39, %c0_40] : memref<10x8x128xf32, #tpu.memory_space<vmem>>, vector<8x8x128xf32>
    tpu.vector_store %arg7[%c1_38, %c0_39, %c0_40], %91 {strides = array<i32>} : memref<10x8x128xf32, #tpu.memory_space<vmem>>, vector<8x8x128xf32>,
    %c1_41 = arith.constant 1 : index
    %c0_42 = arith.constant 0 : index
    %c0_43 = arith.constant 0 : index
    %93 = vector.load %arg3[%c1_41, %c0_42, %c0_43] : memref<3x128x128xbf16, #tpu.memory_space<vmem>>, vector<1x128x128xbf16>
    %94 = vector.shape_cast %93 : vector<1x128x128xbf16> to vector<128x128xbf16>
    %c1_44 = arith.constant 1 : index
    %c0_45 = arith.constant 0 : index
    %95 = vector.load %arg4[%c1_44, %c0_45] : memref<3x128xf32, #tpu.memory_space<vmem>>, vector<1x128xf32>
    %96 = vector.shape_cast %95 : vector<1x128xf32> to vector<128xf32>
    %c0_46 = arith.constant 0 : index
    %c0_47 = arith.constant 0 : index
    %c0_48 = arith.constant 0 : index
    %97 = vector.load %arg7[%c0_46, %c0_47, %c0_48] : memref<10x8x128xf32, #tpu.memory_space<vmem>>, vector<8x8x128xf32>
    %c1_49 = arith.constant 1 : index
    %c0_50 = arith.constant 0 : index
    %c0_51 = arith.constant 0 : index
    %98 = vector.load %arg7[%c1_49, %c0_50, %c0_51] : memref<10x8x128xf32, #tpu.memory_space<vmem>>, vector<8x8x128xf32>
    %c2_52 = arith.constant 2 : index
    %c0_53 = arith.constant 0 : index
    %c0_54 = arith.constant 0 : index
    %99 = vector.load %arg7[%c2_52, %c0_53, %c0_54] : memref<10x8x128xf32, #tpu.memory_space<vmem>>, vector<8x8x128xf32>
    %100 = vector.extract_strided_slice %3 {offsets = [1, 0, 0, 0], sizes = [1, 1, 1, 128], strides = [1, 1, 1, 1]} : vector<3x3x3x128xf32> to vector<1x1x1x128xf32>
    %101 = vector.shape_cast %100 : vector<1x1x1x128xf32> to vector<128xf32>
    %102 = vector.shape_cast %101 : vector<128xf32> to vector<1x1x128xf32>
    %103 = vector.broadcast %102 : vector<1x1x128xf32> to vector<8x8x128xf32>
    %104 = arith.mulf %97, %103 : vector<8x8x128xf32>
    %105 = vector.extract_strided_slice %3 {offsets = [1, 1, 0, 0], sizes = [1, 1, 1, 128], strides = [1, 1, 1, 1]} : vector<3x3x3x128xf32> to vector<1x1x1x128xf32>
    %106 = vector.shape_cast %105 : vector<1x1x1x128xf32> to vector<128xf32>
    %107 = vector.shape_cast %106 : vector<128xf32> to vector<1x1x128xf32>
    %108 = vector.broadcast %107 : vector<1x1x128xf32> to vector<8x8x128xf32>
    %109 = arith.mulf %98, %108 : vector<8x8x128xf32>
    %110 = arith.addf %104, %109 : vector<8x8x128xf32>
    %111 = vector.extract_strided_slice %3 {offsets = [1, 2, 0, 0], sizes = [1, 1, 1, 128], strides = [1, 1, 1, 1]} : vector<3x3x3x128xf32> to vector<1x1x1x128xf32>
    %112 = vector.shape_cast %111 : vector<1x1x1x128xf32> to vector<128xf32>
    %113 = vector.shape_cast %112 : vector<128xf32> to vector<1x1x128xf32>
    %114 = vector.broadcast %113 : vector<1x1x128xf32> to vector<8x8x128xf32>
    %115 = arith.mulf %99, %114 : vector<8x8x128xf32>
    %116 = arith.addf %110, %115 : vector<8x8x128xf32>
    %117 = vector.extract_strided_slice %3 {offsets = [1, 0, 1, 0], sizes = [1, 1, 1, 128], strides = [1, 1, 1, 1]} : vector<3x3x3x128xf32> to vector<1x1x1x128xf32>
    %118 = vector.shape_cast %117 : vector<1x1x1x128xf32> to vector<128xf32>
    %119 = vector.shape_cast %118 : vector<128xf32> to vector<1x1x128xf32>
    %120 = vector.broadcast %119 : vector<1x1x128xf32> to vector<8x8x128xf32>
    %121 = arith.mulf %97, %120 : vector<8x8x128xf32>
    %122 = vector.extract_strided_slice %3 {offsets = [1, 1, 1, 0], sizes = [1, 1, 1, 128], strides = [1, 1, 1, 1]} : vector<3x3x3x128xf32> to vector<1x1x1x128xf32>
    %123 = vector.shape_cast %122 : vector<1x1x1x128xf32> to vector<128xf32>
    %124 = vector.shape_cast %123 : vector<128xf32> to vector<1x1x128xf32>
    %125 = vector.broadcast %124 : vector<1x1x128xf32> to vector<8x8x128xf32>
    %126 = arith.mulf %98, %125 : vector<8x8x128xf32>
    %127 = arith.addf %121, %126 : vector<8x8x128xf32>
    %128 = vector.extract_strided_slice %3 {offsets = [1, 2, 1, 0], sizes = [1, 1, 1, 128], strides = [1, 1, 1, 1]} : vector<3x3x3x128xf32> to vector<1x1x1x128xf32>
    %129 = vector.shape_cast %128 : vector<1x1x1x128xf32> to vector<128xf32>
    %130 = vector.shape_cast %129 : vector<128xf32> to vector<1x1x128xf32>
    %131 = vector.broadcast %130 : vector<1x1x128xf32> to vector<8x8x128xf32>
    %132 = arith.mulf %99, %131 : vector<8x8x128xf32>
    %133 = arith.addf %127, %132 : vector<8x8x128xf32>
    %134 = vector.extract_strided_slice %3 {offsets = [1, 0, 2, 0], sizes = [1, 1, 1, 128], strides = [1, 1, 1, 1]} : vector<3x3x3x128xf32> to vector<1x1x1x128xf32>
    %135 = vector.shape_cast %134 : vector<1x1x1x128xf32> to vector<128xf32>
    %136 = vector.shape_cast %135 : vector<128xf32> to vector<1x1x128xf32>
    %137 = vector.broadcast %136 : vector<1x1x128xf32> to vector<8x8x128xf32>
    %138 = arith.mulf %97, %137 : vector<8x8x128xf32>
    %139 = vector.extract_strided_slice %3 {offsets = [1, 1, 2, 0], sizes = [1, 1, 1, 128], strides = [1, 1, 1, 1]} : vector<3x3x3x128xf32> to vector<1x1x1x128xf32>
    %140 = vector.shape_cast %139 : vector<1x1x1x128xf32> to vector<128xf32>
    %141 = vector.shape_cast %140 : vector<128xf32> to vector<1x1x128xf32>
    %142 = vector.broadcast %141 : vector<1x1x128xf32> to vector<8x8x128xf32>
    %143 = arith.mulf %98, %142 : vector<8x8x128xf32>
    %144 = arith.addf %138, %143 : vector<8x8x128xf32>
    %145 = vector.extract_strided_slice %3 {offsets = [1, 2, 2, 0], sizes = [1, 1, 1, 128], strides = [1, 1, 1, 1]} : vector<3x3x3x128xf32> to vector<1x1x1x128xf32>
    %146 = vector.shape_cast %145 : vector<1x1x1x128xf32> to vector<128xf32>
    %147 = vector.shape_cast %146 : vector<128xf32> to vector<1x1x128xf32>
    %148 = vector.broadcast %147 : vector<1x1x128xf32> to vector<8x8x128xf32>
    %149 = arith.mulf %99, %148 : vector<8x8x128xf32>
    %150 = arith.addf %144, %149 : vector<8x8x128xf32>
    %cst_55 = arith.constant 0.000000e+00 : f32
    %151 = vector.broadcast %cst_55 : f32 to vector<8x1x128xf32>
    %152 = vector.extract_strided_slice %116 {offsets = [0, 0, 0], sizes = [8, 7, 128], strides = [1, 1, 1]} : vector<8x8x128xf32> to vector<8x7x128xf32>
    %153 = tpu.concatenate %151, %152 in 1 : vector<8x1x128xf32>, vector<8x7x128xf32> -> vector<8x8x128xf32>
    %154 = vector.extract_strided_slice %150 {offsets = [0, 1, 0], sizes = [8, 7, 128], strides = [1, 1, 1]} : vector<8x8x128xf32> to vector<8x7x128xf32>
    %155 = tpu.concatenate %154, %151 in 1 : vector<8x7x128xf32>, vector<8x1x128xf32> -> vector<8x8x128xf32>
    %cst_56 = arith.constant 0.000000e+00 : f32
    %156 = vector.broadcast %cst_56 : f32 to vector<8x8x128xf32>
    %157 = vector.shape_cast %2 : vector<1x8x128xi1> to vector<1x8x128xi1>
    %158 = vector.broadcast %157 : vector<1x8x128xi1> to vector<8x8x128xi1>
    %159 = arith.select %158, %155, %156 : vector<8x8x128xi1>, vector<8x8x128xf32>
    %160 = arith.addf %133, %153 : vector<8x8x128xf32>
    %161 = arith.addf %160, %159 : vector<8x8x128xf32>
    %162 = vector.shape_cast %161 : vector<8x8x128xf32> to vector<64x128xf32>
    %163 = arith.truncf %162 : vector<64x128xf32> to vector<64x128xbf16>
    %cst_57 = arith.constant dense<0.000000e+00> : vector<64x128xf32>
    %164 = tpu.matmul %163, %94, %cst_57 {dimension_numbers = #tpu.dot_dimension_numbers<[1], [0], [0], [1], [0, 0, 1, 1], [], []>} : vector<64x128xbf16>, vector<128x128xbf16>, vector<64x128xf32> -> vector<64x128xf32>
    %165 = vector.shape_cast %96 : vector<128xf32> to vector<1x128xf32>
    %166 = vector.broadcast %165 : vector<1x128xf32> to vector<64x128xf32>
    %167 = arith.addf %164, %166 : vector<64x128xf32>
    %168 = vector.shape_cast %167 : vector<64x128xf32> to vector<8x8x128xf32>
    %cst_58 = arith.constant 0.000000e+00 : f32
    %169 = vector.broadcast %cst_58 : f32 to vector<8x8x128xf32>
    %170 = arith.maximumf %168, %169 : vector<8x8x128xf32>
    %c1_59 = arith.constant 1 : index
    %c0_60 = arith.constant 0 : index
    %c0_61 = arith.constant 0 : index
    %171 = vector.load %arg6[%c1_59, %c0_60, %c0_61] : memref<10x8x128xf32, #tpu.memory_space<vmem>>, vector<8x8x128xf32>
    tpu.vector_store %arg6[%c1_59, %c0_60, %c0_61], %170 {strides = array<i32>} : memref<10x8x128xf32, #tpu.memory_space<vmem>>, vector<8x8x128xf32>,
    %c2_62 = arith.constant 2 : index
    %c0_63 = arith.constant 0 : index
    %c0_64 = arith.constant 0 : index
    %172 = vector.load %arg3[%c2_62, %c0_63, %c0_64] : memref<3x128x128xbf16, #tpu.memory_space<vmem>>, vector<1x128x128xbf16>
    %173 = vector.shape_cast %172 : vector<1x128x128xbf16> to vector<128x128xbf16>
    %c2_65 = arith.constant 2 : index
    %c0_66 = arith.constant 0 : index
    %174 = vector.load %arg4[%c2_65, %c0_66] : memref<3x128xf32, #tpu.memory_space<vmem>>, vector<1x128xf32>
    %175 = vector.shape_cast %174 : vector<1x128xf32> to vector<128xf32>
    %c0_67 = arith.constant 0 : index
    %c0_68 = arith.constant 0 : index
    %c0_69 = arith.constant 0 : index
    %176 = vector.load %arg6[%c0_67, %c0_68, %c0_69] : memref<10x8x128xf32, #tpu.memory_space<vmem>>, vector<8x8x128xf32>
    %c1_70 = arith.constant 1 : index
    %c0_71 = arith.constant 0 : index
    %c0_72 = arith.constant 0 : index
    %177 = vector.load %arg6[%c1_70, %c0_71, %c0_72] : memref<10x8x128xf32, #tpu.memory_space<vmem>>, vector<8x8x128xf32>
    %c2_73 = arith.constant 2 : index
    %c0_74 = arith.constant 0 : index
    %c0_75 = arith.constant 0 : index
    %178 = vector.load %arg6[%c2_73, %c0_74, %c0_75] : memref<10x8x128xf32, #tpu.memory_space<vmem>>, vector<8x8x128xf32>
    %179 = vector.extract_strided_slice %3 {offsets = [2, 0, 0, 0], sizes = [1, 1, 1, 128], strides = [1, 1, 1, 1]} : vector<3x3x3x128xf32> to vector<1x1x1x128xf32>
    %180 = vector.shape_cast %179 : vector<1x1x1x128xf32> to vector<128xf32>
    %181 = vector.shape_cast %180 : vector<128xf32> to vector<1x1x128xf32>
    %182 = vector.broadcast %181 : vector<1x1x128xf32> to vector<8x8x128xf32>
    %183 = arith.mulf %176, %182 : vector<8x8x128xf32>
    %184 = vector.extract_strided_slice %3 {offsets = [2, 1, 0, 0], sizes = [1, 1, 1, 128], strides = [1, 1, 1, 1]} : vector<3x3x3x128xf32> to vector<1x1x1x128xf32>
    %185 = vector.shape_cast %184 : vector<1x1x1x128xf32> to vector<128xf32>
    %186 = vector.shape_cast %185 : vector<128xf32> to vector<1x1x128xf32>
    %187 = vector.broadcast %186 : vector<1x1x128xf32> to vector<8x8x128xf32>
    %188 = arith.mulf %177, %187 : vector<8x8x128xf32>
    %189 = arith.addf %183, %188 : vector<8x8x128xf32>
    %190 = vector.extract_strided_slice %3 {offsets = [2, 2, 0, 0], sizes = [1, 1, 1, 128], strides = [1, 1, 1, 1]} : vector<3x3x3x128xf32> to vector<1x1x1x128xf32>
    %191 = vector.shape_cast %190 : vector<1x1x1x128xf32> to vector<128xf32>
    %192 = vector.shape_cast %191 : vector<128xf32> to vector<1x1x128xf32>
    %193 = vector.broadcast %192 : vector<1x1x128xf32> to vector<8x8x128xf32>
    %194 = arith.mulf %178, %193 : vector<8x8x128xf32>
    %195 = arith.addf %189, %194 : vector<8x8x128xf32>
    %196 = vector.extract_strided_slice %3 {offsets = [2, 0, 1, 0], sizes = [1, 1, 1, 128], strides = [1, 1, 1, 1]} : vector<3x3x3x128xf32> to vector<1x1x1x128xf32>
    %197 = vector.shape_cast %196 : vector<1x1x1x128xf32> to vector<128xf32>
    %198 = vector.shape_cast %197 : vector<128xf32> to vector<1x1x128xf32>
    %199 = vector.broadcast %198 : vector<1x1x128xf32> to vector<8x8x128xf32>
    %200 = arith.mulf %176, %199 : vector<8x8x128xf32>
    %201 = vector.extract_strided_slice %3 {offsets = [2, 1, 1, 0], sizes = [1, 1, 1, 128], strides = [1, 1, 1, 1]} : vector<3x3x3x128xf32> to vector<1x1x1x128xf32>
    %202 = vector.shape_cast %201 : vector<1x1x1x128xf32> to vector<128xf32>
    %203 = vector.shape_cast %202 : vector<128xf32> to vector<1x1x128xf32>
    %204 = vector.broadcast %203 : vector<1x1x128xf32> to vector<8x8x128xf32>
    %205 = arith.mulf %177, %204 : vector<8x8x128xf32>
    %206 = arith.addf %200, %205 : vector<8x8x128xf32>
    %207 = vector.extract_strided_slice %3 {offsets = [2, 2, 1, 0], sizes = [1, 1, 1, 128], strides = [1, 1, 1, 1]} : vector<3x3x3x128xf32> to vector<1x1x1x128xf32>
    %208 = vector.shape_cast %207 : vector<1x1x1x128xf32> to vector<128xf32>
    %209 = vector.shape_cast %208 : vector<128xf32> to vector<1x1x128xf32>
    %210 = vector.broadcast %209 : vector<1x1x128xf32> to vector<8x8x128xf32>
    %211 = arith.mulf %178, %210 : vector<8x8x128xf32>
    %212 = arith.addf %206, %211 : vector<8x8x128xf32>
    %213 = vector.extract_strided_slice %3 {offsets = [2, 0, 2, 0], sizes = [1, 1, 1, 128], strides = [1, 1, 1, 1]} : vector<3x3x3x128xf32> to vector<1x1x1x128xf32>
    %214 = vector.shape_cast %213 : vector<1x1x1x128xf32> to vector<128xf32>
    %215 = vector.shape_cast %214 : vector<128xf32> to vector<1x1x128xf32>
    %216 = vector.broadcast %215 : vector<1x1x128xf32> to vector<8x8x128xf32>
    %217 = arith.mulf %176, %216 : vector<8x8x128xf32>
    %218 = vector.extract_strided_slice %3 {offsets = [2, 1, 2, 0], sizes = [1, 1, 1, 128], strides = [1, 1, 1, 1]} : vector<3x3x3x128xf32> to vector<1x1x1x128xf32>
    %219 = vector.shape_cast %218 : vector<1x1x1x128xf32> to vector<128xf32>
    %220 = vector.shape_cast %219 : vector<128xf32> to vector<1x1x128xf32>
    %221 = vector.broadcast %220 : vector<1x1x128xf32> to vector<8x8x128xf32>
    %222 = arith.mulf %177, %221 : vector<8x8x128xf32>
    %223 = arith.addf %217, %222 : vector<8x8x128xf32>
    %224 = vector.extract_strided_slice %3 {offsets = [2, 2, 2, 0], sizes = [1, 1, 1, 128], strides = [1, 1, 1, 1]} : vector<3x3x3x128xf32> to vector<1x1x1x128xf32>
    %225 = vector.shape_cast %224 : vector<1x1x1x128xf32> to vector<128xf32>
    %226 = vector.shape_cast %225 : vector<128xf32> to vector<1x1x128xf32>
    %227 = vector.broadcast %226 : vector<1x1x128xf32> to vector<8x8x128xf32>
    %228 = arith.mulf %178, %227 : vector<8x8x128xf32>
    %229 = arith.addf %223, %228 : vector<8x8x128xf32>
    %cst_76 = arith.constant 0.000000e+00 : f32
    %230 = vector.broadcast %cst_76 : f32 to vector<8x1x128xf32>
    %231 = vector.extract_strided_slice %195 {offsets = [0, 0, 0], sizes = [8, 7, 128], strides = [1, 1, 1]} : vector<8x8x128xf32> to vector<8x7x128xf32>
    %232 = tpu.concatenate %230, %231 in 1 : vector<8x1x128xf32>, vector<8x7x128xf32> -> vector<8x8x128xf32>
    %233 = vector.extract_strided_slice %229 {offsets = [0, 1, 0], sizes = [8, 7, 128], strides = [1, 1, 1]} : vector<8x8x128xf32> to vector<8x7x128xf32>
    %234 = tpu.concatenate %233, %230 in 1 : vector<8x7x128xf32>, vector<8x1x128xf32> -> vector<8x8x128xf32>
    %cst_77 = arith.constant 0.000000e+00 : f32
    %235 = vector.broadcast %cst_77 : f32 to vector<8x8x128xf32>
    %236 = vector.shape_cast %2 : vector<1x8x128xi1> to vector<1x8x128xi1>
    %237 = vector.broadcast %236 : vector<1x8x128xi1> to vector<8x8x128xi1>
    %238 = arith.select %237, %234, %235 : vector<8x8x128xi1>, vector<8x8x128xf32>
    %239 = arith.addf %212, %232 : vector<8x8x128xf32>
    %240 = arith.addf %239, %238 : vector<8x8x128xf32>
    %241 = vector.shape_cast %240 : vector<8x8x128xf32> to vector<64x128xf32>
    %242 = arith.truncf %241 : vector<64x128xf32> to vector<64x128xbf16>
    %cst_78 = arith.constant dense<0.000000e+00> : vector<64x128xf32>
    %243 = tpu.matmul %242, %173, %cst_78 {dimension_numbers = #tpu.dot_dimension_numbers<[1], [0], [0], [1], [0, 0, 1, 1], [], []>} : vector<64x128xbf16>, vector<128x128xbf16>, vector<64x128xf32> -> vector<64x128xf32>
    %244 = vector.shape_cast %175 : vector<128xf32> to vector<1x128xf32>
    %245 = vector.broadcast %244 : vector<1x128xf32> to vector<64x128xf32>
    %246 = arith.addf %243, %245 : vector<64x128xf32>
    %247 = vector.shape_cast %246 : vector<64x128xf32> to vector<8x8x128xf32>
    %c0_79 = arith.constant 0 : index
    %c0_80 = arith.constant 0 : index
    %c0_81 = arith.constant 0 : index
    %c0_82 = arith.constant 0 : index
    %248 = vector.load %arg1[%c0_79, %c0_80, %c0_81, %c0_82] : memref<1x8x8x128xf32, #tpu.memory_space<vmem>>, vector<1x8x8x128xf32>
    %249 = vector.shape_cast %248 : vector<1x8x8x128xf32> to vector<8x8x128xf32>
    %250 = arith.addf %249, %247 : vector<8x8x128xf32>
    %c0_83 = arith.constant 0 : index
    %c0_84 = arith.constant 0 : index
    %c0_85 = arith.constant 0 : index
    %c0_86 = arith.constant 0 : index
    %251 = vector.load %arg5[%c0_83, %c0_84, %c0_85, %c0_86] : memref<1x8x8x128xf32, #tpu.memory_space<vmem>>, vector<1x8x8x128xf32>
    %252 = vector.shape_cast %251 : vector<1x8x8x128xf32> to vector<8x8x128xf32>
    %253 = vector.shape_cast %250 : vector<8x8x128xf32> to vector<1x8x8x128xf32>
    tpu.vector_store %arg5[%c0_83, %c0_84, %c0_85, %c0_86], %253 {strides = array<i32>} : memref<1x8x8x128xf32, #tpu.memory_space<vmem>>, vector<1x8x8x128xf32>,
    return
  }
  func.func @transform_0(%arg0: i32) -> (i32, i32, i32, i32) {
    %c0_i32 = arith.constant 0 : i32
    %c0_i32_0 = arith.constant 0 : i32
    %c0_i32_1 = arith.constant 0 : i32
    %c0_i32_2 = arith.constant 0 : i32
    return %arg0, %c0_i32, %c0_i32_0, %c0_i32_1 : i32, i32, i32, i32
  }
  func.func @transform_1(%arg0: i32) -> (i32, i32, i32, i32) {
    %c0_i32 = arith.constant 0 : i32
    %c0_i32_0 = arith.constant 0 : i32
    %c0_i32_1 = arith.constant 0 : i32
    %c0_i32_2 = arith.constant 0 : i32
    %c0_i32_3 = arith.constant 0 : i32
    return %c0_i32, %c0_i32_0, %c0_i32_1, %c0_i32_2 : i32, i32, i32, i32
  }
  func.func @transform_2(%arg0: i32) -> (i32, i32, i32) {
    %c0_i32 = arith.constant 0 : i32
    %c0_i32_0 = arith.constant 0 : i32
    %c0_i32_1 = arith.constant 0 : i32
    %c0_i32_2 = arith.constant 0 : i32
    return %c0_i32, %c0_i32_0, %c0_i32_1 : i32, i32, i32
  }
  func.func @transform_3(%arg0: i32) -> (i32, i32) {
    %c0_i32 = arith.constant 0 : i32
    %c0_i32_0 = arith.constant 0 : i32
    %c0_i32_1 = arith.constant 0 : i32
    return %c0_i32, %c0_i32_0 : i32, i32
  }
  func.func @transform_4(%arg0: i32) -> (i32, i32, i32, i32) {
    %c0_i32 = arith.constant 0 : i32
    %c0_i32_0 = arith.constant 0 : i32
    %c0_i32_1 = arith.constant 0 : i32
    %c0_i32_2 = arith.constant 0 : i32
    return %arg0, %c0_i32, %c0_i32_0, %c0_i32_1 : i32, i32, i32, i32
  }
}

module attributes {stable_mosaic.version = 11 : i64} {
  func.func @middle_flow_kernel(%arg0: i32, %arg1: memref<1x8x8x128xf32, #tpu.memory_space<vmem>>, %arg2: memref<3x3x3x128xf32, #tpu.memory_space<vmem>>, %arg3: memref<3x128x128xbf16, #tpu.memory_space<vmem>>, %arg4: memref<3x128xf32, #tpu.memory_space<vmem>>, %arg5: memref<1x8x8x128xf32, #tpu.memory_space<vmem>>, %arg6: memref<10x8x128xf32, #tpu.memory_space<vmem>>, %arg7: memref<10x8x128xf32, #tpu.memory_space<vmem>>) attributes {dimension_semantics = [#tpu.dimension_semantics<parallel>], iteration_bounds = array<i64: 2>, scalar_prefetch = 0 : i64, scratch_operands = 2 : i64, tpu.core_type = #tpu.core_type<tc>, window_params = [{transform_indices = @transform_0, window_bounds = array<i64: 1, 8, 8, 128>}, {pipeline_mode = #tpu.pipeline_mode<synchronous>, transform_indices = @transform_1, window_bounds = array<i64: 3, 3, 3, 128>}, {pipeline_mode = #tpu.pipeline_mode<synchronous>, transform_indices = @transform_2, window_bounds = array<i64: 3, 128, 128>}, {pipeline_mode = #tpu.pipeline_mode<synchronous>, transform_indices = @transform_3, window_bounds = array<i64: 3, 128>}, {transform_indices = @transform_4, window_bounds = array<i64: 1, 8, 8, 128>}]} {
    %0 = tpu.iota {dimensions = array<i32: 1>} : vector<1x8x128xi32>
    %c7_i32 = arith.constant 7 : i32
    %1 = vector.broadcast %c7_i32 : i32 to vector<1x8x128xi32>
    %2 = arith.cmpi slt, %0, %1 : vector<1x8x128xi32>
    %c0 = arith.constant 0 : index
    %c0_0 = arith.constant 0 : index
    %c0_1 = arith.constant 0 : index
    %c0_2 = arith.constant 0 : index
    %3 = vector.load %arg2[%c0, %c0_0, %c0_1, %c0_2] : memref<3x3x3x128xf32, #tpu.memory_space<vmem>>, vector<3x3x3x128xf32>
    %cst = arith.constant 0.000000e+00 : f32
    %4 = vector.broadcast %cst : f32 to vector<1x8x128xf32>
    %c0_3 = arith.constant 0 : index
    %c0_4 = arith.constant 0 : index
    %c0_5 = arith.constant 0 : index
    %5 = vector.load %arg6[%c0_3, %c0_4, %c0_5] : memref<10x8x128xf32, #tpu.memory_space<vmem>>, vector<1x8x128xf32>
    tpu.vector_store %arg6[%c0_3, %c0_4, %c0_5], %4 {strides = array<i32>} : memref<10x8x128xf32, #tpu.memory_space<vmem>>, vector<1x8x128xf32>,
    %c9 = arith.constant 9 : index
    %c0_6 = arith.constant 0 : index
    %c0_7 = arith.constant 0 : index
    %6 = vector.load %arg6[%c9, %c0_6, %c0_7] : memref<10x8x128xf32, #tpu.memory_space<vmem>>, vector<1x8x128xf32>
    tpu.vector_store %arg6[%c9, %c0_6, %c0_7], %4 {strides = array<i32>} : memref<10x8x128xf32, #tpu.memory_space<vmem>>, vector<1x8x128xf32>,
    %c0_8 = arith.constant 0 : index
    %c0_9 = arith.constant 0 : index
    %c0_10 = arith.constant 0 : index
    %7 = vector.load %arg7[%c0_8, %c0_9, %c0_10] : memref<10x8x128xf32, #tpu.memory_space<vmem>>, vector<1x8x128xf32>
    tpu.vector_store %arg7[%c0_8, %c0_9, %c0_10], %4 {strides = array<i32>} : memref<10x8x128xf32, #tpu.memory_space<vmem>>, vector<1x8x128xf32>,
    %c9_11 = arith.constant 9 : index
    %c0_12 = arith.constant 0 : index
    %c0_13 = arith.constant 0 : index
    %8 = vector.load %arg7[%c9_11, %c0_12, %c0_13] : memref<10x8x128xf32, #tpu.memory_space<vmem>>, vector<1x8x128xf32>
    tpu.vector_store %arg7[%c9_11, %c0_12, %c0_13], %4 {strides = array<i32>} : memref<10x8x128xf32, #tpu.memory_space<vmem>>, vector<1x8x128xf32>,
    %c0_14 = arith.constant 0 : index
    %c0_15 = arith.constant 0 : index
    %c0_16 = arith.constant 0 : index
    %c0_17 = arith.constant 0 : index
    %9 = vector.load %arg1[%c0_14, %c0_15, %c0_16, %c0_17] : memref<1x8x8x128xf32, #tpu.memory_space<vmem>>, vector<1x8x8x128xf32>
    %10 = vector.shape_cast %9 : vector<1x8x8x128xf32> to vector<8x8x128xf32>
    %cst_18 = arith.constant 0.000000e+00 : f32
    %11 = vector.broadcast %cst_18 : f32 to vector<8x8x128xf32>
    %12 = arith.maximumf %10, %11 : vector<8x8x128xf32>
    %c1 = arith.constant 1 : index
    %c0_19 = arith.constant 0 : index
    %c0_20 = arith.constant 0 : index
    %13 = vector.load %arg6[%c1, %c0_19, %c0_20] : memref<10x8x128xf32, #tpu.memory_space<vmem>>, vector<8x8x128xf32>
    tpu.vector_store %arg6[%c1, %c0_19, %c0_20], %12 {strides = array<i32>} : memref<10x8x128xf32, #tpu.memory_space<vmem>>, vector<8x8x128xf32>,
    %c0_21 = arith.constant 0 : index
    %c0_22 = arith.constant 0 : index
    %c0_23 = arith.constant 0 : index
    %14 = vector.load %arg3[%c0_21, %c0_22, %c0_23] : memref<3x128x128xbf16, #tpu.memory_space<vmem>>, vector<1x128x128xbf16>
    %15 = vector.shape_cast %14 : vector<1x128x128xbf16> to vector<128x128xbf16>
    %c0_24 = arith.constant 0 : index
    %c0_25 = arith.constant 0 : index
    %16 = vector.load %arg4[%c0_24, %c0_25] : memref<3x128xf32, #tpu.memory_space<vmem>>, vector<1x128xf32>
    %17 = vector.shape_cast %16 : vector<1x128xf32> to vector<128xf32>
    %c0_26 = arith.constant 0 : index
    %c0_27 = arith.constant 0 : index
    %c0_28 = arith.constant 0 : index
    %18 = vector.load %arg6[%c0_26, %c0_27, %c0_28] : memref<10x8x128xf32, #tpu.memory_space<vmem>>, vector<8x8x128xf32>
    %c1_29 = arith.constant 1 : index
    %c0_30 = arith.constant 0 : index
    %c0_31 = arith.constant 0 : index
    %19 = vector.load %arg6[%c1_29, %c0_30, %c0_31] : memref<10x8x128xf32, #tpu.memory_space<vmem>>, vector<8x8x128xf32>
    %c2 = arith.constant 2 : index
    %c0_32 = arith.constant 0 : index
    %c0_33 = arith.constant 0 : index
    %20 = vector.load %arg6[%c2, %c0_32, %c0_33] : memref<10x8x128xf32, #tpu.memory_space<vmem>>, vector<8x8x128xf32>
    %21 = vector.extract_strided_slice %3 {offsets = [0, 0, 0, 0], sizes = [1, 1, 1, 128], strides = [1, 1, 1, 1]} : vector<3x3x3x128xf32> to vector<1x1x1x128xf32>
    %22 = vector.shape_cast %21 : vector<1x1x1x128xf32> to vector<128xf32>
    %23 = vector.shape_cast %22 : vector<128xf32> to vector<1x1x128xf32>
    %24 = vector.broadcast %23 : vector<1x1x128xf32> to vector<8x8x128xf32>
    %25 = arith.mulf %18, %24 : vector<8x8x128xf32>
    %26 = vector.extract_strided_slice %3 {offsets = [0, 1, 0, 0], sizes = [1, 1, 1, 128], strides = [1, 1, 1, 1]} : vector<3x3x3x128xf32> to vector<1x1x1x128xf32>
    %27 = vector.shape_cast %26 : vector<1x1x1x128xf32> to vector<128xf32>
    %28 = vector.shape_cast %27 : vector<128xf32> to vector<1x1x128xf32>
    %29 = vector.broadcast %28 : vector<1x1x128xf32> to vector<8x8x128xf32>
    %30 = arith.mulf %19, %29 : vector<8x8x128xf32>
    %31 = arith.addf %25, %30 : vector<8x8x128xf32>
    %32 = vector.extract_strided_slice %3 {offsets = [0, 2, 0, 0], sizes = [1, 1, 1, 128], strides = [1, 1, 1, 1]} : vector<3x3x3x128xf32> to vector<1x1x1x128xf32>
    %33 = vector.shape_cast %32 : vector<1x1x1x128xf32> to vector<128xf32>
    %34 = vector.shape_cast %33 : vector<128xf32> to vector<1x1x128xf32>
    %35 = vector.broadcast %34 : vector<1x1x128xf32> to vector<8x8x128xf32>
    %36 = arith.mulf %20, %35 : vector<8x8x128xf32>
    %37 = arith.addf %31, %36 : vector<8x8x128xf32>
    %38 = vector.extract_strided_slice %3 {offsets = [0, 0, 1, 0], sizes = [1, 1, 1, 128], strides = [1, 1, 1, 1]} : vector<3x3x3x128xf32> to vector<1x1x1x128xf32>
    %39 = vector.shape_cast %38 : vector<1x1x1x128xf32> to vector<128xf32>
    %40 = vector.shape_cast %39 : vector<128xf32> to vector<1x1x128xf32>
    %41 = vector.broadcast %40 : vector<1x1x128xf32> to vector<8x8x128xf32>
    %42 = arith.mulf %18, %41 : vector<8x8x128xf32>
    %43 = vector.extract_strided_slice %3 {offsets = [0, 1, 1, 0], sizes = [1, 1, 1, 128], strides = [1, 1, 1, 1]} : vector<3x3x3x128xf32> to vector<1x1x1x128xf32>
    %44 = vector.shape_cast %43 : vector<1x1x1x128xf32> to vector<128xf32>
    %45 = vector.shape_cast %44 : vector<128xf32> to vector<1x1x128xf32>
    %46 = vector.broadcast %45 : vector<1x1x128xf32> to vector<8x8x128xf32>
    %47 = arith.mulf %19, %46 : vector<8x8x128xf32>
    %48 = arith.addf %42, %47 : vector<8x8x128xf32>
    %49 = vector.extract_strided_slice %3 {offsets = [0, 2, 1, 0], sizes = [1, 1, 1, 128], strides = [1, 1, 1, 1]} : vector<3x3x3x128xf32> to vector<1x1x1x128xf32>
    %50 = vector.shape_cast %49 : vector<1x1x1x128xf32> to vector<128xf32>
    %51 = vector.shape_cast %50 : vector<128xf32> to vector<1x1x128xf32>
    %52 = vector.broadcast %51 : vector<1x1x128xf32> to vector<8x8x128xf32>
    %53 = arith.mulf %20, %52 : vector<8x8x128xf32>
    %54 = arith.addf %48, %53 : vector<8x8x128xf32>
    %55 = vector.extract_strided_slice %3 {offsets = [0, 0, 2, 0], sizes = [1, 1, 1, 128], strides = [1, 1, 1, 1]} : vector<3x3x3x128xf32> to vector<1x1x1x128xf32>
    %56 = vector.shape_cast %55 : vector<1x1x1x128xf32> to vector<128xf32>
    %57 = vector.shape_cast %56 : vector<128xf32> to vector<1x1x128xf32>
    %58 = vector.broadcast %57 : vector<1x1x128xf32> to vector<8x8x128xf32>
    %59 = arith.mulf %18, %58 : vector<8x8x128xf32>
    %60 = vector.extract_strided_slice %3 {offsets = [0, 1, 2, 0], sizes = [1, 1, 1, 128], strides = [1, 1, 1, 1]} : vector<3x3x3x128xf32> to vector<1x1x1x128xf32>
    %61 = vector.shape_cast %60 : vector<1x1x1x128xf32> to vector<128xf32>
    %62 = vector.shape_cast %61 : vector<128xf32> to vector<1x1x128xf32>
    %63 = vector.broadcast %62 : vector<1x1x128xf32> to vector<8x8x128xf32>
    %64 = arith.mulf %19, %63 : vector<8x8x128xf32>
    %65 = arith.addf %59, %64 : vector<8x8x128xf32>
    %66 = vector.extract_strided_slice %3 {offsets = [0, 2, 2, 0], sizes = [1, 1, 1, 128], strides = [1, 1, 1, 1]} : vector<3x3x3x128xf32> to vector<1x1x1x128xf32>
    %67 = vector.shape_cast %66 : vector<1x1x1x128xf32> to vector<128xf32>
    %68 = vector.shape_cast %67 : vector<128xf32> to vector<1x1x128xf32>
    %69 = vector.broadcast %68 : vector<1x1x128xf32> to vector<8x8x128xf32>
    %70 = arith.mulf %20, %69 : vector<8x8x128xf32>
    %71 = arith.addf %65, %70 : vector<8x8x128xf32>
    %cst_34 = arith.constant 0.000000e+00 : f32
    %72 = vector.broadcast %cst_34 : f32 to vector<8x1x128xf32>
    %73 = vector.extract_strided_slice %37 {offsets = [0, 0, 0], sizes = [8, 7, 128], strides = [1, 1, 1]} : vector<8x8x128xf32> to vector<8x7x128xf32>
    %74 = tpu.concatenate %72, %73 in 1 : vector<8x1x128xf32>, vector<8x7x128xf32> -> vector<8x8x128xf32>
    %75 = vector.extract_strided_slice %71 {offsets = [0, 1, 0], sizes = [8, 7, 128], strides = [1, 1, 1]} : vector<8x8x128xf32> to vector<8x7x128xf32>
    %76 = tpu.concatenate %75, %72 in 1 : vector<8x7x128xf32>, vector<8x1x128xf32> -> vector<8x8x128xf32>
    %cst_35 = arith.constant 0.000000e+00 : f32
    %77 = vector.broadcast %cst_35 : f32 to vector<8x8x128xf32>
    %78 = vector.shape_cast %2 : vector<1x8x128xi1> to vector<1x8x128xi1>
    %79 = vector.broadcast %78 : vector<1x8x128xi1> to vector<8x8x128xi1>
    %80 = arith.select %79, %76, %77 : vector<8x8x128xi1>, vector<8x8x128xf32>
    %81 = arith.addf %54, %74 : vector<8x8x128xf32>
    %82 = arith.addf %81, %80 : vector<8x8x128xf32>
    %83 = vector.shape_cast %82 : vector<8x8x128xf32> to vector<64x128xf32>
    %84 = arith.truncf %83 : vector<64x128xf32> to vector<64x128xbf16>
    %cst_36 = arith.constant dense<0.000000e+00> : vector<64x128xf32>
    %85 = tpu.matmul %84, %15, %cst_36 {dimension_numbers = #tpu.dot_dimension_numbers<[1], [0], [0], [1], [0, 0, 1, 1], [], []>} : vector<64x128xbf16>, vector<128x128xbf16>, vector<64x128xf32> -> vector<64x128xf32>
    %86 = vector.shape_cast %17 : vector<128xf32> to vector<1x128xf32>
    %87 = vector.broadcast %86 : vector<1x128xf32> to vector<64x128xf32>
    %88 = arith.addf %85, %87 : vector<64x128xf32>
    %89 = vector.shape_cast %88 : vector<64x128xf32> to vector<8x8x128xf32>
    %cst_37 = arith.constant 0.000000e+00 : f32
    %90 = vector.broadcast %cst_37 : f32 to vector<8x8x128xf32>
    %91 = arith.maximumf %89, %90 : vector<8x8x128xf32>
    %c1_38 = arith.constant 1 : index
    %c0_39 = arith.constant 0 : index
    %c0_40 = arith.constant 0 : index
    %92 = vector.load %arg7[%c1_38, %c0_39, %c0_40] : memref<10x8x128xf32, #tpu.memory_space<vmem>>, vector<8x8x128xf32>
    tpu.vector_store %arg7[%c1_38, %c0_39, %c0_40], %91 {strides = array<i32>} : memref<10x8x128xf32, #tpu.memory_space<vmem>>, vector<8x8x128xf32>,
    %c1_41 = arith.constant 1 : index
    %c0_42 = arith.constant 0 : index
    %c0_43 = arith.constant 0 : index
    %93 = vector.load %arg3[%c1_41, %c0_42, %c0_43] : memref<3x128x128xbf16, #tpu.memory_space<vmem>>, vector<1x128x128xbf16>
    %94 = vector.shape_cast %93 : vector<1x128x128xbf16> to vector<128x128xbf16>
    %c1_44 = arith.constant 1 : index
    %c0_45 = arith.constant 0 : index
    %95 = vector.load %arg4[%c1_44, %c0_45] : memref<3x128xf32, #tpu.memory_space<vmem>>, vector<1x128xf32>
    %96 = vector.shape_cast %95 : vector<1x128xf32> to vector<128xf32>
    %c0_46 = arith.constant 0 : index
    %c0_47 = arith.constant 0 : index
    %c0_48 = arith.constant 0 : index
    %97 = vector.load %arg7[%c0_46, %c0_47, %c0_48] : memref<10x8x128xf32, #tpu.memory_space<vmem>>, vector<8x8x128xf32>
    %c1_49 = arith.constant 1 : index
    %c0_50 = arith.constant 0 : index
    %c0_51 = arith.constant 0 : index
    %98 = vector.load %arg7[%c1_49, %c0_50, %c0_51] : memref<10x8x128xf32, #tpu.memory_space<vmem>>, vector<8x8x128xf32>
    %c2_52 = arith.constant 2 : index
    %c0_53 = arith.constant 0 : index
    %c0_54 = arith.constant 0 : index
    %99 = vector.load %arg7[%c2_52, %c0_53, %c0_54] : memref<10x8x128xf32, #tpu.memory_space<vmem>>, vector<8x8x128xf32>
    %100 = vector.extract_strided_slice %3 {offsets = [1, 0, 0, 0], sizes = [1, 1, 1, 128], strides = [1, 1, 1, 1]} : vector<3x3x3x128xf32> to vector<1x1x1x128xf32>
    %101 = vector.shape_cast %100 : vector<1x1x1x128xf32> to vector<128xf32>
    %102 = vector.shape_cast %101 : vector<128xf32> to vector<1x1x128xf32>
    %103 = vector.broadcast %102 : vector<1x1x128xf32> to vector<8x8x128xf32>
    %104 = arith.mulf %97, %103 : vector<8x8x128xf32>
    %105 = vector.extract_strided_slice %3 {offsets = [1, 1, 0, 0], sizes = [1, 1, 1, 128], strides = [1, 1, 1, 1]} : vector<3x3x3x128xf32> to vector<1x1x1x128xf32>
    %106 = vector.shape_cast %105 : vector<1x1x1x128xf32> to vector<128xf32>
    %107 = vector.shape_cast %106 : vector<128xf32> to vector<1x1x128xf32>
    %108 = vector.broadcast %107 : vector<1x1x128xf32> to vector<8x8x128xf32>
    %109 = arith.mulf %98, %108 : vector<8x8x128xf32>
    %110 = arith.addf %104, %109 : vector<8x8x128xf32>
    %111 = vector.extract_strided_slice %3 {offsets = [1, 2, 0, 0], sizes = [1, 1, 1, 128], strides = [1, 1, 1, 1]} : vector<3x3x3x128xf32> to vector<1x1x1x128xf32>
    %112 = vector.shape_cast %111 : vector<1x1x1x128xf32> to vector<128xf32>
    %113 = vector.shape_cast %112 : vector<128xf32> to vector<1x1x128xf32>
    %114 = vector.broadcast %113 : vector<1x1x128xf32> to vector<8x8x128xf32>
    %115 = arith.mulf %99, %114 : vector<8x8x128xf32>
    %116 = arith.addf %110, %115 : vector<8x8x128xf32>
    %117 = vector.extract_strided_slice %3 {offsets = [1, 0, 1, 0], sizes = [1, 1, 1, 128], strides = [1, 1, 1, 1]} : vector<3x3x3x128xf32> to vector<1x1x1x128xf32>
    %118 = vector.shape_cast %117 : vector<1x1x1x128xf32> to vector<128xf32>
    %119 = vector.shape_cast %118 : vector<128xf32> to vector<1x1x128xf32>
    %120 = vector.broadcast %119 : vector<1x1x128xf32> to vector<8x8x128xf32>
    %121 = arith.mulf %97, %120 : vector<8x8x128xf32>
    %122 = vector.extract_strided_slice %3 {offsets = [1, 1, 1, 0], sizes = [1, 1, 1, 128], strides = [1, 1, 1, 1]} : vector<3x3x3x128xf32> to vector<1x1x1x128xf32>
    %123 = vector.shape_cast %122 : vector<1x1x1x128xf32> to vector<128xf32>
    %124 = vector.shape_cast %123 : vector<128xf32> to vector<1x1x128xf32>
    %125 = vector.broadcast %124 : vector<1x1x128xf32> to vector<8x8x128xf32>
    %126 = arith.mulf %98, %125 : vector<8x8x128xf32>
    %127 = arith.addf %121, %126 : vector<8x8x128xf32>
    %128 = vector.extract_strided_slice %3 {offsets = [1, 2, 1, 0], sizes = [1, 1, 1, 128], strides = [1, 1, 1, 1]} : vector<3x3x3x128xf32> to vector<1x1x1x128xf32>
    %129 = vector.shape_cast %128 : vector<1x1x1x128xf32> to vector<128xf32>
    %130 = vector.shape_cast %129 : vector<128xf32> to vector<1x1x128xf32>
    %131 = vector.broadcast %130 : vector<1x1x128xf32> to vector<8x8x128xf32>
    %132 = arith.mulf %99, %131 : vector<8x8x128xf32>
    %133 = arith.addf %127, %132 : vector<8x8x128xf32>
    %134 = vector.extract_strided_slice %3 {offsets = [1, 0, 2, 0], sizes = [1, 1, 1, 128], strides = [1, 1, 1, 1]} : vector<3x3x3x128xf32> to vector<1x1x1x128xf32>
    %135 = vector.shape_cast %134 : vector<1x1x1x128xf32> to vector<128xf32>
    %136 = vector.shape_cast %135 : vector<128xf32> to vector<1x1x128xf32>
    %137 = vector.broadcast %136 : vector<1x1x128xf32> to vector<8x8x128xf32>
    %138 = arith.mulf %97, %137 : vector<8x8x128xf32>
    %139 = vector.extract_strided_slice %3 {offsets = [1, 1, 2, 0], sizes = [1, 1, 1, 128], strides = [1, 1, 1, 1]} : vector<3x3x3x128xf32> to vector<1x1x1x128xf32>
    %140 = vector.shape_cast %139 : vector<1x1x1x128xf32> to vector<128xf32>
    %141 = vector.shape_cast %140 : vector<128xf32> to vector<1x1x128xf32>
    %142 = vector.broadcast %141 : vector<1x1x128xf32> to vector<8x8x128xf32>
    %143 = arith.mulf %98, %142 : vector<8x8x128xf32>
    %144 = arith.addf %138, %143 : vector<8x8x128xf32>
    %145 = vector.extract_strided_slice %3 {offsets = [1, 2, 2, 0], sizes = [1, 1, 1, 128], strides = [1, 1, 1, 1]} : vector<3x3x3x128xf32> to vector<1x1x1x128xf32>
    %146 = vector.shape_cast %145 : vector<1x1x1x128xf32> to vector<128xf32>
    %147 = vector.shape_cast %146 : vector<128xf32> to vector<1x1x128xf32>
    %148 = vector.broadcast %147 : vector<1x1x128xf32> to vector<8x8x128xf32>
    %149 = arith.mulf %99, %148 : vector<8x8x128xf32>
    %150 = arith.addf %144, %149 : vector<8x8x128xf32>
    %cst_55 = arith.constant 0.000000e+00 : f32
    %151 = vector.broadcast %cst_55 : f32 to vector<8x1x128xf32>
    %152 = vector.extract_strided_slice %116 {offsets = [0, 0, 0], sizes = [8, 7, 128], strides = [1, 1, 1]} : vector<8x8x128xf32> to vector<8x7x128xf32>
    %153 = tpu.concatenate %151, %152 in 1 : vector<8x1x128xf32>, vector<8x7x128xf32> -> vector<8x8x128xf32>
    %154 = vector.extract_strided_slice %150 {offsets = [0, 1, 0], sizes = [8, 7, 128], strides = [1, 1, 1]} : vector<8x8x128xf32> to vector<8x7x128xf32>
    %155 = tpu.concatenate %154, %151 in 1 : vector<8x7x128xf32>, vector<8x1x128xf32> -> vector<8x8x128xf32>
    %cst_56 = arith.constant 0.000000e+00 : f32
    %156 = vector.broadcast %cst_56 : f32 to vector<8x8x128xf32>
    %157 = vector.shape_cast %2 : vector<1x8x128xi1> to vector<1x8x128xi1>
    %158 = vector.broadcast %157 : vector<1x8x128xi1> to vector<8x8x128xi1>
    %159 = arith.select %158, %155, %156 : vector<8x8x128xi1>, vector<8x8x128xf32>
    %160 = arith.addf %133, %153 : vector<8x8x128xf32>
    %161 = arith.addf %160, %159 : vector<8x8x128xf32>
    %162 = vector.shape_cast %161 : vector<8x8x128xf32> to vector<64x128xf32>
    %163 = arith.truncf %162 : vector<64x128xf32> to vector<64x128xbf16>
    %cst_57 = arith.constant dense<0.000000e+00> : vector<64x128xf32>
    %164 = tpu.matmul %163, %94, %cst_57 {dimension_numbers = #tpu.dot_dimension_numbers<[1], [0], [0], [1], [0, 0, 1, 1], [], []>} : vector<64x128xbf16>, vector<128x128xbf16>, vector<64x128xf32> -> vector<64x128xf32>
    %165 = vector.shape_cast %96 : vector<128xf32> to vector<1x128xf32>
    %166 = vector.broadcast %165 : vector<1x128xf32> to vector<64x128xf32>
    %167 = arith.addf %164, %166 : vector<64x128xf32>
    %168 = vector.shape_cast %167 : vector<64x128xf32> to vector<8x8x128xf32>
    %cst_58 = arith.constant 0.000000e+00 : f32
    %169 = vector.broadcast %cst_58 : f32 to vector<8x8x128xf32>
    %170 = arith.maximumf %168, %169 : vector<8x8x128xf32>
    %c1_59 = arith.constant 1 : index
    %c0_60 = arith.constant 0 : index
    %c0_61 = arith.constant 0 : index
    %171 = vector.load %arg6[%c1_59, %c0_60, %c0_61] : memref<10x8x128xf32, #tpu.memory_space<vmem>>, vector<8x8x128xf32>
    tpu.vector_store %arg6[%c1_59, %c0_60, %c0_61], %170 {strides = array<i32>} : memref<10x8x128xf32, #tpu.memory_space<vmem>>, vector<8x8x128xf32>,
    %c2_62 = arith.constant 2 : index
    %c0_63 = arith.constant 0 : index
    %c0_64 = arith.constant 0 : index
    %172 = vector.load %arg3[%c2_62, %c0_63, %c0_64] : memref<3x128x128xbf16, #tpu.memory_space<vmem>>, vector<1x128x128xbf16>
    %173 = vector.shape_cast %172 : vector<1x128x128xbf16> to vector<128x128xbf16>
    %c2_65 = arith.constant 2 : index
    %c0_66 = arith.constant 0 : index
    %174 = vector.load %arg4[%c2_65, %c0_66] : memref<3x128xf32, #tpu.memory_space<vmem>>, vector<1x128xf32>
    %175 = vector.shape_cast %174 : vector<1x128xf32> to vector<128xf32>
    %c0_67 = arith.constant 0 : index
    %c0_68 = arith.constant 0 : index
    %c0_69 = arith.constant 0 : index
    %176 = vector.load %arg6[%c0_67, %c0_68, %c0_69] : memref<10x8x128xf32, #tpu.memory_space<vmem>>, vector<8x8x128xf32>
    %c1_70 = arith.constant 1 : index
    %c0_71 = arith.constant 0 : index
    %c0_72 = arith.constant 0 : index
    %177 = vector.load %arg6[%c1_70, %c0_71, %c0_72] : memref<10x8x128xf32, #tpu.memory_space<vmem>>, vector<8x8x128xf32>
    %c2_73 = arith.constant 2 : index
    %c0_74 = arith.constant 0 : index
    %c0_75 = arith.constant 0 : index
    %178 = vector.load %arg6[%c2_73, %c0_74, %c0_75] : memref<10x8x128xf32, #tpu.memory_space<vmem>>, vector<8x8x128xf32>
    %179 = vector.extract_strided_slice %3 {offsets = [2, 0, 0, 0], sizes = [1, 1, 1, 128], strides = [1, 1, 1, 1]} : vector<3x3x3x128xf32> to vector<1x1x1x128xf32>
    %180 = vector.shape_cast %179 : vector<1x1x1x128xf32> to vector<128xf32>
    %181 = vector.shape_cast %180 : vector<128xf32> to vector<1x1x128xf32>
    %182 = vector.broadcast %181 : vector<1x1x128xf32> to vector<8x8x128xf32>
    %183 = arith.mulf %176, %182 : vector<8x8x128xf32>
    %184 = vector.extract_strided_slice %3 {offsets = [2, 1, 0, 0], sizes = [1, 1, 1, 128], strides = [1, 1, 1, 1]} : vector<3x3x3x128xf32> to vector<1x1x1x128xf32>
    %185 = vector.shape_cast %184 : vector<1x1x1x128xf32> to vector<128xf32>
    %186 = vector.shape_cast %185 : vector<128xf32> to vector<1x1x128xf32>
    %187 = vector.broadcast %186 : vector<1x1x128xf32> to vector<8x8x128xf32>
    %188 = arith.mulf %177, %187 : vector<8x8x128xf32>
    %189 = arith.addf %183, %188 : vector<8x8x128xf32>
    %190 = vector.extract_strided_slice %3 {offsets = [2, 2, 0, 0], sizes = [1, 1, 1, 128], strides = [1, 1, 1, 1]} : vector<3x3x3x128xf32> to vector<1x1x1x128xf32>
    %191 = vector.shape_cast %190 : vector<1x1x1x128xf32> to vector<128xf32>
    %192 = vector.shape_cast %191 : vector<128xf32> to vector<1x1x128xf32>
    %193 = vector.broadcast %192 : vector<1x1x128xf32> to vector<8x8x128xf32>
    %194 = arith.mulf %178, %193 : vector<8x8x128xf32>
    %195 = arith.addf %189, %194 : vector<8x8x128xf32>
    %196 = vector.extract_strided_slice %3 {offsets = [2, 0, 1, 0], sizes = [1, 1, 1, 128], strides = [1, 1, 1, 1]} : vector<3x3x3x128xf32> to vector<1x1x1x128xf32>
    %197 = vector.shape_cast %196 : vector<1x1x1x128xf32> to vector<128xf32>
    %198 = vector.shape_cast %197 : vector<128xf32> to vector<1x1x128xf32>
    %199 = vector.broadcast %198 : vector<1x1x128xf32> to vector<8x8x128xf32>
    %200 = arith.mulf %176, %199 : vector<8x8x128xf32>
    %201 = vector.extract_strided_slice %3 {offsets = [2, 1, 1, 0], sizes = [1, 1, 1, 128], strides = [1, 1, 1, 1]} : vector<3x3x3x128xf32> to vector<1x1x1x128xf32>
    %202 = vector.shape_cast %201 : vector<1x1x1x128xf32> to vector<128xf32>
    %203 = vector.shape_cast %202 : vector<128xf32> to vector<1x1x128xf32>
    %204 = vector.broadcast %203 : vector<1x1x128xf32> to vector<8x8x128xf32>
    %205 = arith.mulf %177, %204 : vector<8x8x128xf32>
    %206 = arith.addf %200, %205 : vector<8x8x128xf32>
    %207 = vector.extract_strided_slice %3 {offsets = [2, 2, 1, 0], sizes = [1, 1, 1, 128], strides = [1, 1, 1, 1]} : vector<3x3x3x128xf32> to vector<1x1x1x128xf32>
    %208 = vector.shape_cast %207 : vector<1x1x1x128xf32> to vector<128xf32>
    %209 = vector.shape_cast %208 : vector<128xf32> to vector<1x1x128xf32>
    %210 = vector.broadcast %209 : vector<1x1x128xf32> to vector<8x8x128xf32>
    %211 = arith.mulf %178, %210 : vector<8x8x128xf32>
    %212 = arith.addf %206, %211 : vector<8x8x128xf32>
    %213 = vector.extract_strided_slice %3 {offsets = [2, 0, 2, 0], sizes = [1, 1, 1, 128], strides = [1, 1, 1, 1]} : vector<3x3x3x128xf32> to vector<1x1x1x128xf32>
    %214 = vector.shape_cast %213 : vector<1x1x1x128xf32> to vector<128xf32>
    %215 = vector.shape_cast %214 : vector<128xf32> to vector<1x1x128xf32>
    %216 = vector.broadcast %215 : vector<1x1x128xf32> to vector<8x8x128xf32>
    %217 = arith.mulf %176, %216 : vector<8x8x128xf32>
    %218 = vector.extract_strided_slice %3 {offsets = [2, 1, 2, 0], sizes = [1, 1, 1, 128], strides = [1, 1, 1, 1]} : vector<3x3x3x128xf32> to vector<1x1x1x128xf32>
    %219 = vector.shape_cast %218 : vector<1x1x1x128xf32> to vector<128xf32>
    %220 = vector.shape_cast %219 : vector<128xf32> to vector<1x1x128xf32>
    %221 = vector.broadcast %220 : vector<1x1x128xf32> to vector<8x8x128xf32>
    %222 = arith.mulf %177, %221 : vector<8x8x128xf32>
    %223 = arith.addf %217, %222 : vector<8x8x128xf32>
    %224 = vector.extract_strided_slice %3 {offsets = [2, 2, 2, 0], sizes = [1, 1, 1, 128], strides = [1, 1, 1, 1]} : vector<3x3x3x128xf32> to vector<1x1x1x128xf32>
    %225 = vector.shape_cast %224 : vector<1x1x1x128xf32> to vector<128xf32>
    %226 = vector.shape_cast %225 : vector<128xf32> to vector<1x1x128xf32>
    %227 = vector.broadcast %226 : vector<1x1x128xf32> to vector<8x8x128xf32>
    %228 = arith.mulf %178, %227 : vector<8x8x128xf32>
    %229 = arith.addf %223, %228 : vector<8x8x128xf32>
    %cst_76 = arith.constant 0.000000e+00 : f32
    %230 = vector.broadcast %cst_76 : f32 to vector<8x1x128xf32>
    %231 = vector.extract_strided_slice %195 {offsets = [0, 0, 0], sizes = [8, 7, 128], strides = [1, 1, 1]} : vector<8x8x128xf32> to vector<8x7x128xf32>
    %232 = tpu.concatenate %230, %231 in 1 : vector<8x1x128xf32>, vector<8x7x128xf32> -> vector<8x8x128xf32>
    %233 = vector.extract_strided_slice %229 {offsets = [0, 1, 0], sizes = [8, 7, 128], strides = [1, 1, 1]} : vector<8x8x128xf32> to vector<8x7x128xf32>
    %234 = tpu.concatenate %233, %230 in 1 : vector<8x7x128xf32>, vector<8x1x128xf32> -> vector<8x8x128xf32>
    %cst_77 = arith.constant 0.000000e+00 : f32
    %235 = vector.broadcast %cst_77 : f32 to vector<8x8x128xf32>
    %236 = vector.shape_cast %2 : vector<1x8x128xi1> to vector<1x8x128xi1>
    %237 = vector.broadcast %236 : vector<1x8x128xi1> to vector<8x8x128xi1>
    %238 = arith.select %237, %234, %235 : vector<8x8x128xi1>, vector<8x8x128xf32>
    %239 = arith.addf %212, %232 : vector<8x8x128xf32>
    %240 = arith.addf %239, %238 : vector<8x8x128xf32>
    %241 = vector.shape_cast %240 : vector<8x8x128xf32> to vector<64x128xf32>
    %242 = arith.truncf %241 : vector<64x128xf32> to vector<64x128xbf16>
    %cst_78 = arith.constant dense<0.000000e+00> : vector<64x128xf32>
    %243 = tpu.matmul %242, %173, %cst_78 {dimension_numbers = #tpu.dot_dimension_numbers<[1], [0], [0], [1], [0, 0, 1, 1], [], []>} : vector<64x128xbf16>, vector<128x128xbf16>, vector<64x128xf32> -> vector<64x128xf32>
    %244 = vector.shape_cast %175 : vector<128xf32> to vector<1x128xf32>
    %245 = vector.broadcast %244 : vector<1x128xf32> to vector<64x128xf32>
    %246 = arith.addf %243, %245 : vector<64x128xf32>
    %247 = vector.shape_cast %246 : vector<64x128xf32> to vector<8x8x128xf32>
    %c0_79 = arith.constant 0 : index
    %c0_80 = arith.constant 0 : index
    %c0_81 = arith.constant 0 : index
    %c0_82 = arith.constant 0 : index
    %248 = vector.load %arg1[%c0_79, %c0_80, %c0_81, %c0_82] : memref<1x8x8x128xf32, #tpu.memory_space<vmem>>, vector<1x8x8x128xf32>
    %249 = vector.shape_cast %248 : vector<1x8x8x128xf32> to vector<8x8x128xf32>
    %250 = arith.addf %249, %247 : vector<8x8x128xf32>
    %c0_83 = arith.constant 0 : index
    %c0_84 = arith.constant 0 : index
    %c0_85 = arith.constant 0 : index
    %c0_86 = arith.constant 0 : index
    %251 = vector.load %arg5[%c0_83, %c0_84, %c0_85, %c0_86] : memref<1x8x8x128xf32, #tpu.memory_space<vmem>>, vector<1x8x8x128xf32>
    %252 = vector.shape_cast %251 : vector<1x8x8x128xf32> to vector<8x8x128xf32>
    %253 = vector.shape_cast %250 : vector<8x8x128xf32> to vector<1x8x8x128xf32>
    tpu.vector_store %arg5[%c0_83, %c0_84, %c0_85, %c0_86], %253 {strides = array<i32>} : memref<1x8x8x128xf32, #tpu.memory_space<vmem>>, vector<1x8x8x128xf32>,
    return
  }
  func.func @transform_0(%arg0: i32) -> (i32, i32, i32, i32) {
    %c0_i32 = arith.constant 0 : i32
    %c0_i32_0 = arith.constant 0 : i32
    %c0_i32_1 = arith.constant 0 : i32
    %c0_i32_2 = arith.constant 0 : i32
    return %arg0, %c0_i32, %c0_i32_0, %c0_i32_1 : i32, i32, i32, i32
  }
  func.func @transform_1(%arg0: i32) -> (i32, i32, i32, i32) {
    %c0_i32 = arith.constant 0 : i32
    %c0_i32_0 = arith.constant 0 : i32
    %c0_i32_1 = arith.constant 0 : i32
    %c0_i32_2 = arith.constant 0 : i32
    %c0_i32_3 = arith.constant 0 : i32
    return %c0_i32, %c0_i32_0, %c0_i32_1, %c0_i32_2 : i32, i32, i32, i32
  }
  func.func @transform_2(%arg0: i32) -> (i32, i32, i32) {
    %c0_i32 = arith.constant 0 : i32
    %c0_i32_0 = arith.constant 0 : i32
    %c0_i32_1 = arith.constant 0 : i32
    %c0_i32_2 = arith.constant 0 : i32
    return %c0_i32, %c0_i32_0, %c0_i32_1 : i32, i32, i32
  }
  func.func @transform_3(%arg0: i32) -> (i32, i32) {
    %c0_i32 = arith.constant 0 : i32
    %c0_i32_0 = arith.constant 0 : i32
    %c0_i32_1 = arith.constant 0 : i32
    return %c0_i32, %c0_i32_0 : i32, i32
  }
  func.func @transform_4(%arg0: i32) -> (i32, i32, i32, i32) {
    %c0_i32 = arith.constant 0 : i32
    %c0_i32_0 = arith.constant 0 : i32
    %c0_i32_1 = arith.constant 0 : i32
    %c0_i32_2 = arith.constant 0 : i32
    return %arg0, %c0_i32, %c0_i32_0, %c0_i32_1 : i32, i32, i32, i32
  }
}

</mosaic_0001>

<bundles_post_ra>
// kernel: tpu_custom_call.1
= control target key start
LH: loop header
LB: loop body
LE: loop exit
PB: predicated region body
PF: predicated region fallthrough
CT: control target
= control target key end

     0   :  { %9 = vsyncpa [#allocation5], 0  ;;  %s3033_s0 = inlined_call_operand.hbm [shape: f32[2,8,8,128], index: 0, kind: input, shape index: {}]   ;;  %s3034_s1 = inlined_call_operand.hbm [shape: f32[3,3,3,128], index: 1, kind: input, shape index: {}]   ;;  %s3035_s2 = inlined_call_operand.hbm [shape: bf16[3,128,128], index: 2, kind: input, shape index: {}]   ;;  %s3036_s3 = inlined_call_operand.vmem [shape: f32[3,128], index: 3, kind: input, shape index: {}]   ;;  %s3037_s4 = inlined_call_operand.hbm [shape: f32[2,8,8,128], index: 4, kind: output, shape index: {}]  }
   0x1   :  { %11 = vsyncpa [#allocation5 + $0x1], 0 }
   0x2   :  { %12 = vsyncpa [#allocation8], 0 }
   0x3   :  { %13 = vsyncpa [#allocation6], 0 }
   0x4   :  { %15 = vsyncpa [#allocation6 + $0x1], 0  ;;  %s2139_s15 = smov 0   ;;  %s2141_s16 = smov 0  }
   0x5   :  { %s2143_s17 = smov 0   ;;  %s2145_s18 = smov 0  }
   0x6 LB: > { %s2160_s19 = sadd.s32 4294967295, %s2102_s18   ;;  %s1678_s20 = sadd.s32 4294967294, %s2102_s18   ;;  %s2102_s18 = sphi %s2145_s18, %s3057_s18   ;;  %s2098_s17 = sphi %s2143_s17, %s3056_s17   ;;  %s2094_s16 = sphi %s2141_s16, %s3055_s16   ;;  %s2090_s15 = sphi %s2139_s15, %s3054_s15  }
   0x7   : > { %p41_p0 = scmp.ne.s32.totalorder %s2094_s16, %s2090_s15  ;;  %p3038_p1 = scmp.eq.s32.totalorder %s2160_s19, 0 }
   0x8   : > { %p134_p3 = scmp.eq.s32.totalorder %s1678_s20, 1  ;;  %p1679_p5 = scmp.ge.s32.totalorder %s2102_s18, 1 }
   0x9   : > { %p2169_p4 = por %p3038_p1, %p41_p0  ;;  %p141_p7 = scmp.lt.s32.totalorder %s2102_s18, 3 }
   0xa   : > { %p2174_p6 = por %p134_p3, %p41_p0  ;;  %s2104_s24 = smov [#allocation7]  }
   0xb   : > { %s3041_s21 = scalar_select %p2169_p4, 1, 0 }
   0xc   : > { %s3042_s22 = scalar_select %p2174_p6, 1, 0 }
   0xd   : > { %p2179_p8 = pnand %p1679_p5, %p141_p7  ;;  %s153_s25 = sshll.u32 %s2104_s24, 4  ;;  %s2183_s25 = int_to_ptr.vmem [resolvable:$true] %s153_s25 }
   0xe   : > { %s2105_s27 = smov [#allocation9]   ;;  %s1946_s5 = scalar_lea.hbm %s3034_s1, 576 }
   0xf   : > { %p1861_p9 = pneg %p2179_p8  ;;  %s166_s28 = sshll.u32 %s2105_s27, 4  ;;  %s2194_s28 = int_to_ptr.vmem [resolvable:$true] %s166_s28 }
  0x10   : > { %p1947_p12 = scmp.ne.s32.totalorder %s3034_s1, %s1946_s5  ;;  %p1953_p5 = scmp.lt.u32.totalorder %s1946_s5, %s3034_s1 }
  0x11   : > { %p2190_p11 = pnand %p1861_p9, %p3038_p1 }
  0x13   : > { %p1948_p13 = pneg %p2190_p11 }
  0x15   : > { %p1949_p0 = pnand %p1948_p13, %p1947_p12 }
  0x17   : > { %p1950_p3 = pneg %p1949_p0 }
  0x19   : > { %p1955_p7 = pnand %p1953_p5, %p1950_p3 }
  0x1b   : > { %1958 = shalt.err (!%p1955_p7)
}
  0x1c   : > { %s1959_s10 = scalar_lea.vmem %s2183_s25, 576  ;;  %p1967_p2 = scmp.lt.s32.totalorder %s2183_s25, %s2183_s25 }
  0x1d   : > { %p1960_p9 = scmp.ne.s32.totalorder %s2183_s25, %s1959_s10  ;;  %p1968_p12 = scmp.lt.s32.totalorder %s1959_s10, %s1959_s10 }
  0x1f   : > { %p1962_p10 = pnand %p1960_p9, %p1948_p13  ;;  %p1969_p0 = por %p1968_p12, %p1967_p2 }
  0x21   : > { %p1963_p1 = pneg %p1962_p10 }
  0x23   : > { %p1970_p6 = pnand %p1969_p0, %p1963_p1 }
  0x25   : > { %1973 = shalt.err (!%p1970_p6)
}
  0x26   : > { %s2106_s11 = smov 64   ;;  %s2107_s12 = smov 4  }
  0x27   : > { %1864 = dma.hbm_to_vmem [thread:$0]  (!%p2190_p11), %s3034_s1, 576, %s2183_s25, [#allocation8], %s2106_s11, %s2106_s11, %s2107_s12  }
  0x28   : > { %s1974_s27 = scalar_lea.hbm %s3035_s2, 3072 }
  0x29   : > { %p1975_p2 = scmp.ne.s32.totalorder %s3035_s2, %s1974_s27  ;;  %p1981_p10 = scmp.lt.u32.totalorder %s1974_s27, %s3035_s2 }
  0x2b   : > { %p1977_p1 = pnand %p1975_p2, %p1948_p13 }
  0x2d   : > { %p1978_p6 = pneg %p1977_p1 }
  0x2f   : > { %p1983_p3 = pnand %p1981_p10, %p1978_p6 }
  0x31   : > { %1986 = shalt.err (!%p1983_p3)
}
  0x32   : > { %s1987_s25 = scalar_lea.vmem %s2194_s28, 3072  ;;  %p1995_p12 = scmp.lt.s32.totalorder %s2194_s28, %s2194_s28 }
  0x33   : > { %p1988_p5 = scmp.ne.s32.totalorder %s2194_s28, %s1987_s25  ;;  %p1996_p0 = scmp.lt.s32.totalorder %s1987_s25, %s1987_s25 }
  0x35   : > { %p1990_p7 = pnand %p1988_p5, %p1948_p13  ;;  %p1997_p2 = por %p1996_p0, %p1995_p12 }
  0x37   : > { %p1991_p9 = pneg %p1990_p7 }
  0x39   : > { %p1998_p1 = pnand %p1997_p2, %p1991_p9 }
  0x3b   : > { %2001 = shalt.err (!%p1998_p1)
}
  0x3c   : > { %1867 = dma.hbm_to_vmem [thread:$0]  (!%p2190_p11), %s3035_s2, 3072, %s2194_s28, [#allocation8], %s2106_s11, %s2106_s11, %s2107_s12  }
  0x3d   : > { %s2249_s9 = sadd.s32 1, %s2102_s18   ;;  %s28_s26 = sadd.s32 1, %s2098_s17 }
  0x3e   : > { %s25_s10 = ssub.s32 %s2102_s18, %s2249_s9  ;;  %p35_p13 = scmp.ne.s32.totalorder %s2098_s17, %s2094_s16 }
  0x3f   : > { %p26_p6 = scmp.eq.s32.totalorder %s25_s10, 0  ;;  %p36_p10 = scmp.eq.s32.totalorder %s2102_s18, 0 }
  0x40   : > { %p3045_p3 = scmp.eq.s32.totalorder %s2160_s19, 1  ;;  %p1878_p7 = scmp.lt.s32.totalorder %s2102_s18, 2 }
  0x41   : > { %s2265_s14 = scalar_select %p26_p6, %s2098_s17, %s28_s26  }
  0x42   : > { %p2259_p5 = por %p3045_p3, %p35_p13  ;;  %p37_p9 = por %p36_p10, %p35_p13 }
  0x43   : > { %s183_s20 = sand.u32 1, %s2098_s17   ;;  %s1723_s28 = sshll.u32 %s2102_s18, 10 }
  0x44   : > { %s3046_s13 = scalar_select %p2259_p5, 1, 0 }
  0x45   : > { %s1683_s24 = sshll.u32 %s183_s20, 6  ;;  %s2272_s27 = scalar_lea.hbm %s3033_s0, %s1723_s28 }
  0x46   : > { %s187_s29 = scalar_lea.vmem [#allocation4], %s1683_s24  ;;  %p2276_p11 = pnand %p1878_p7, %p37_p9 }
  0x47   : > { %s194_s30 = sshll.u32 %s187_s29, 4  ;;  %s2280_s6 = scalar_lea.sflag [#allocation5], %s183_s20  ;;  %s2274_s30 = int_to_ptr.vmem [resolvable:$true] %s194_s30 }
  0x48   : > { %s2002_s25 = scalar_lea.hbm %s2272_s27, 1024  ;;  %p2004_p0 = pneg %p2276_p11 }
  0x49   : > { %p2003_p12 = scmp.ne.s32.totalorder %s2272_s27, %s2002_s25  ;;  %s2007_s26 = scalar_lea.hbm %s3033_s0, 2048 }
  0x4a   : > { %p2008_p13 = scmp.lt.u32.totalorder %s2272_s27, %s3033_s0  ;;  %p2009_p6 = scmp.lt.u32.totalorder %s2007_s26, %s2002_s25 }
  0x4b   : > { %p2005_p2 = pnand %p2004_p0, %p2003_p12  ;;  %p2011_p3 = scmp.lt.u32.totalorder %s2002_s25, %s2272_s27 }
  0x4c   : > { %p2010_p10 = por %p2009_p6, %p2008_p13 }
  0x4d   : > { %p2006_p1 = pneg %p2005_p2 }
  0x4e   : > { %p2012_p7 = por %p2011_p3, %p2010_p10 }
  0x50   : > { %p2013_p9 = pnand %p2012_p7, %p2006_p1 }
  0x52   : > { %2016 = shalt.err (!%p2013_p9)
}
  0x53   : > { %s2017_s20 = scalar_lea.vmem %s2274_s30, 1024  ;;  %s2108_s28 = smov [#allocation4]  }
  0x54   : > { %p2018_p12 = scmp.ne.s32.totalorder %s2274_s30, %s2017_s20  ;;  %s2022_s11 = sshll.u32 %s2108_s28, 4  ;;  %s2023_s11 = int_to_ptr.vmem [resolvable:$false] %s2022_s11 }
  0x55   : > { %s2024_s12 = scalar_lea.vmem %s2023_s11, 2048  ;;  %p2025_p4 = scmp.lt.s32.totalorder %s2274_s30, %s2023_s11 }
  0x56   : > { %p2020_p2 = pnand %p2018_p12, %p2004_p0  ;;  %p2026_p13 = scmp.lt.s32.totalorder %s2024_s12, %s2017_s20 }
  0x58   : > { %p2021_p5 = pneg %p2020_p2  ;;  %p2027_p6 = por %p2026_p13, %p2025_p4 }
  0x5a   : > { %p2028_p10 = pnand %p2027_p6, %p2021_p5 }
  0x5c   : > { %2031 = shalt.err (!%p2028_p10)
}
  0x5d   : > { %s2109_s29 = smov 128   ;;  %s2110_s25 = smov 8  }
  0x5e   : > { %1871 = dma.hbm_to_vmem [thread:$0]  (!%p2276_p11), %s2272_s27, 1024, %s2274_s30, %s2280_s6, %s2109_s29, %s2109_s29, %s2110_s25  }
  0x5f   : > { %206 = sbr.rel (%p2179_p8) target bundleno = 901 (0x385), region = 36  ;;  %s2311_s7 = sand.u32 (!%p2179_p8), 1, %s2094_s16  }
  0x60   : > { %s1687_s8 = sshll.u32 (!%p2179_p8), %s2311_s7, 6  ;;  %s209_s26 = scalar_lea.sflag (!%p2179_p8), [#allocation5], %s2311_s7 }
  0x61   : > { %s2317_s10 = scalar_lea.vmem (!%p2179_p8), [#allocation4], %s1687_s8  ;;  %p3048_p4 = scmp.ne.s32.totalorder (!%p2179_p8), %s3041_s21, 0 }
  0x66   : > { %2077 = dma.done.wait (%p3048_p4), %s209_s26, 1024  }
  0x67   : > { %2079 = vsyncadd (%p3048_p4), %s209_s26, 4294966272  ;;  %p3049_p5 = scmp.eq.s32.totalorder %s2160_s19, 0 }
  0x69   : > { %2081 = dma.done.wait (%p3049_p5), [#allocation8], 3648   ;;  %p3050_p8 = pmov %p3049_p5 }
  0x6a   : > { %v246_v0 = vlaneseq  ;;  %v1922_v1 = vld [vmem:[#allocation9] sm:$0xff]   ;;  %v1923_v2 = vld [vmem:[#allocation9 + $0x8] sm:$0xff]   ;;  %v1924_v4 = vld [vmem:[#allocation9 + $0x10] sm:$0xff]   ;;  %vm511_vm0 = vcmask 1040384   ;;  %vm544_vm1 = vcmask 1046528   ;;  %s244_s24 = scalar_lea.vmem [#allocation10], %s1687_s8 }
  0x6b   : > { %2083 = vsyncadd (%p3050_p8), [#allocation8], 4294963648  ;;  %1761 = vmatprep.subr.bf16.mxu0 %v1922_v1  ;;  %v1925_v7 = vld [vmem:[#allocation9 + $0x18] sm:$0xff]   ;;  %v250_v10 = vld [vmem:[#allocation7 + $0x4] sm:$0x7]  ;;  %s1586_s20 = sshll.u32 %s244_s24, 4  ;;  %s2984_s20 = int_to_ptr.vmem [resolvable:$true] %s1586_s20 }
  0x6c   : > { %v2327_v3 = vshrl.u32 %v246_v0, 7  ;;  %1762 = vmatpush3.bf16.msra.mxu0 %v1922_v1  ;;  %v249_v9 = vld [vmem:[#allocation7] sm:$0x7]  ;;  %v251_v11 = vld [vmem:[#allocation7 + $0x8] sm:$0x7]  ;;  %v266_v14 = vld [vmem:[%s2317_s10 + $0x10] sm:$0xff] }
  0x6d   : > { %1763 = vmatprep.subr.bf16.mxu0 %v1923_v2  ;;  %v264_v12 = vld [vmem:[%s2317_s10] sm:$0xff]  ;;  %v265_v13 = vld [vmem:[%s2317_s10 + $0x8] sm:$0xff]  ;;  %v2355_v21 = vmax.f32 %v266_v14, 0.0  ;;  %v267_v32 = vld [vmem:[%s2317_s10 + $0x18] sm:$0xff]  ;;  %s1724_s28 = sshll.u32 %s2160_s19, 10  ;;  %s1573_s19 = scalar_lea.sflag [#allocation6], %s2311_s7 }
  0x6e   : > { %v2330_v5 = vsub.s32 0, %v2327_v3  ;;  %v2333_v6 = vsub.s32 1, %v2327_v3  ;;  %v2336_v8 = vsub.s32 2, %v2327_v3  ;;  %v272_v19 = vmax.f32 %v264_v12, 0.0  ;;  %v1926_v23 = vld [vmem:[#allocation9 + $0x20] sm:$0xff]   ;;  %v1931_v39 = vld [vmem:[#allocation9 + $0x48] sm:$0xff]   ;;  %s2989_s29 = scalar_lea.hbm %s3037_s4, %s1724_s28 }
  0x6f   : > { %v2353_v20 = vmax.f32 %v265_v13, 0.0  ;;  %v268_v33 = vld [vmem:[%s2317_s10 + $0x20] sm:$0xff]  ;;  %v1927_v44 = vld [vmem:[#allocation9 + $0x28] sm:$0xff]   ;;  %vm248_vm2 = vcmp.lt.s32.totalorder %v2327_v3, 7  ;;  %v2395_v55 = vmax.f32 %v267_v32, 0.0  ;;  %v1928_v57 = vld [vmem:[#allocation9 + $0x30] sm:$0xff]  }
  0x70   : > { %1764 = vmatpush3.bf16.msra.mxu0 %v1923_v2  ;;  %v2342_v15 = vrot.slane %v249_v9, %v2330_v5  ;;  %v2345_v16 = vrot.slane %v250_v10, %v2330_v5  ;;  %v2348_v17 = vrot.slane %v251_v11, %v2330_v5  ;;  %v2351_v18 = vrot.slane %v249_v9, %v2333_v6  ;;  %v1930_v34 = vld [vmem:[#allocation9 + $0x40] sm:$0xff]   ;;  %s2032_s25 = scalar_lea.vmem %s2984_s20, 1024  ;;  %p3051_p0 = scmp.ne.s32.totalorder %s3046_s13, 0 }
  0x71   : > { %1765 = vmatprep.subr.bf16.mxu0 %v1924_v4  ;;  %v2358_v22 = vrot.slane %v250_v10, %v2333_v6  ;;  %v2363_v26 = vrot.slane %v251_v11, %v2333_v6  ;;  %v2366_v27 = vrot.slane %v249_v9, %v2336_v8  ;;  %1785 = vmatprep.subr.bf16.mxu1 %v1930_v34  ;;  %v2397_v56 = vmax.f32 %v268_v33, 0.0  ;;  %p2033_p11 = scmp.ne.s32.totalorder %s2984_s20, %s2032_s25  ;;  %s2111_s8 = smov [#allocation10]  }
  0x72   : > { %v335_v24 = vmul.f32 0.0, %v2342_v15  ;;  %v387_v25 = vmul.f32 0.0, %v2351_v18  ;;  %v336_v28 = vmul.f32 %v2342_v15, %v272_v19  ;;  %v347_v29 = vmul.f32 %v2345_v16, %v272_v19  ;;  %1786 = vmatpush3.bf16.msra.mxu1 %v1930_v34  ;;  %s2036_s26 = sshll.u32 %s2111_s8, 4  ;;  %s2037_s26 = int_to_ptr.vmem [resolvable:$false] %s2036_s26 }
  0x73   : > { %v348_v30 = vmul.f32 %v2345_v16, %v2353_v20  ;;  %v367_v31 = vmul.f32 %v2348_v17, %v2353_v20  ;;  %v368_v35 = vmul.f32 %v2348_v17, %v2355_v21  ;;  %v388_v36 = vmul.f32 %v2351_v18, %v272_v19  ;;  %1787 = vmatprep.subr.bf16.mxu1 %v1931_v39  ;;  %p2034_p1 = pnand %p2033_p11, %p3051_p0  ;;  %p2039_p7 = scmp.lt.s32.totalorder %s2984_s20, %s2037_s26 }
  0x74   : > { %1766 = vmatpush3.bf16.msra.mxu0 %v1924_v4  ;;  %v399_v37 = vmul.f32 %v2358_v22, %v272_v19  ;;  %v400_v38 = vmul.f32 %v2358_v22, %v2353_v20  ;;  %v355_v40 = vadd.f32 %v347_v29, %v335_v24  ;;  %v419_v42 = vmul.f32 %v2363_v26, %v2353_v20 }
  0x75   : > { %1767 = vmatprep.subr.bf16.mxu0 %v1925_v7  ;;  %v356_v41 = vadd.f32 %v348_v30, %v336_v28  ;;  %v420_v43 = vmul.f32 %v2363_v26, %v2355_v21  ;;  %v439_v47 = vmul.f32 0.0, %v2366_v27  ;;  %v440_v48 = vmul.f32 %v2366_v27, %v272_v19  ;;  %p2035_p3 = pneg %p2034_p1 }
  0x76   : > { %v407_v45 = vadd.f32 %v399_v37, %v387_v25  ;;  %v408_v46 = vadd.f32 %v400_v38, %v388_v36  ;;  %v375_v49 = vadd.f32 %v367_v31, %v355_v40  ;;  %v2390_v51 = vrot.slane %v250_v10, %v2336_v8  ;;  %1788 = vmatpush3.bf16.msra.mxu1 %v1931_v39  ;;  %v1929_v31 = vld [vmem:[#allocation9 + $0x38] sm:$0xff]  }
  0x77   : > { %v376_v50 = vadd.f32 %v368_v35, %v356_v41  ;;  %v2393_v52 = vrot.slane %v251_v11, %v2336_v8  ;;  %v337_v0 = vmul.f32 %v2342_v15, %v2353_v20  ;;  %v338_v1 = vmul.f32 %v2342_v15, %v2355_v21 }
  0x78   : > { %1768 = vmatpush3.bf16.msra.mxu0 %v1925_v7  ;;  %v427_v53 = vadd.f32 %v419_v42, %v407_v45  ;;  %v428_v54 = vadd.f32 %v420_v43, %v408_v46  ;;  %v451_v58 = vmul.f32 %v2390_v51, %v272_v19  ;;  %v452_v59 = vmul.f32 %v2390_v51, %v2353_v20 }
  0x79   : > { %1769 = vmatprep.subr.bf16.mxu0 %v1926_v23  ;;  %v471_v60 = vmul.f32 %v2393_v52, %v2353_v20  ;;  %v472_v61 = vmul.f32 %v2393_v52, %v2355_v21  ;;  %v495_v62 = vrot.slane %v375_v49, 7  ;;  %v496_v63 = vrot.slane %v376_v50, 7 }
  0x7a   : > { %v459_v2 = vadd.f32 %v451_v58, %v439_v47  ;;  %v460_v4 = vadd.f32 %v452_v59, %v440_v48  ;;  %v349_v7 = vmul.f32 %v2345_v16, %v2355_v21  ;;  %v350_v9 = vmul.f32 %v2345_v16, %v2395_v55  ;;  %v269_v48 = vld [vmem:[%s2317_s10 + $0x28] sm:$0xff]  ;;  %v270_v58 = vld [vmem:[%s2317_s10 + $0x30] sm:$0xff] }
  0x7b   : > { %v512_v10 = vsel %vm511_vm0, 0.0, %v495_v62  ;;  %v513_v11 = vsel %vm511_vm0, 0.0, %v496_v63  ;;  %v369_v12 = vmul.f32 %v2348_v17, %v2395_v55  ;;  %v370_v13 = vmul.f32 %v2348_v17, %v2397_v56 }
  0x7c   : > { %1770 = vmatpush3.bf16.msra.mxu0 %v1926_v23  ;;  %v479_v14 = vadd.f32 %v471_v60, %v459_v2  ;;  %v480_v19 = vadd.f32 %v472_v61, %v460_v4  ;;  %v563_v23 = vadd.f32 %v512_v10, %v427_v53  ;;  %v564_v24 = vadd.f32 %v513_v11, %v428_v54 }
  0x7d   : > { %1771 = vmatprep.subr.bf16.mxu0 %v1927_v44  ;;  %v357_v25 = vadd.f32 %v349_v7, %v337_v0  ;;  %v358_v28 = vadd.f32 %v350_v9, %v338_v1  ;;  %v389_v29 = vmul.f32 %v2351_v18, %v2353_v20  ;;  %v390_v30 = vmul.f32 %v2351_v18, %v2355_v21 }
  0x7e   : > { %v528_v32 = vrot.slane %v479_v14, 1  ;;  %v529_v33 = vrot.slane %v480_v19, 1  ;;  %v401_v34 = vmul.f32 %v2358_v22, %v2355_v21  ;;  %v402_v35 = vmul.f32 %v2358_v22, %v2395_v55 }
  0x7f   : > { %v377_v36 = vadd.f32 %v369_v12, %v357_v25  ;;  %v378_v37 = vadd.f32 %v370_v13, %v358_v28  ;;  %v421_v38 = vmul.f32 %v2363_v26, %v2395_v55  ;;  %v422_v39 = vmul.f32 %v2363_v26, %v2397_v56 }
  0x80   : > { %1772 = vmatpush3.bf16.msra.mxu0 %v1927_v44  ;;  %v545_v40 = vsel %vm544_vm1, %v528_v32, 0.0  ;;  %v546_v41 = vsel %vm544_vm1, %v529_v33, 0.0  ;;  %v409_v42 = vadd.f32 %v401_v34, %v389_v29  ;;  %v410_v43 = vadd.f32 %v402_v35, %v390_v30 }
  0x81   : > { %1773 = vmatprep.subr.bf16.mxu0 %v1928_v57  ;;  %v555_v44 = vsel %vm248_vm2, %v545_v40, 0.0  ;;  %v556_v45 = vsel %vm248_vm2, %v546_v41, 0.0  ;;  %v441_v46 = vmul.f32 %v2366_v27, %v2353_v20  ;;  %v442_v47 = vmul.f32 %v2366_v27, %v2355_v21 }
  0x82   : > { %v571_v49 = vadd.f32 %v563_v23, %v555_v44  ;;  %v572_v50 = vadd.f32 %v564_v24, %v556_v45  ;;  %v429_v53 = vadd.f32 %v421_v38, %v409_v42  ;;  %v430_v54 = vadd.f32 %v422_v39, %v410_v43 }
  0x83   : > { %v454_v59 = vmul.f32 %v2390_v51, %v2395_v55  ;;  %v473_v60 = vmul.f32 %v2393_v52, %v2395_v55  ;;  %v474_v20 = vmul.f32 %v2393_v52, %v2397_v56  ;;  %v497_v62 = vrot.slane %v377_v36, 7 }
  0x84   : > { %1774 = vmatpush3.bf16.msra.mxu0 %v1928_v57  ;;  %v453_v57 = vmul.f32 %v2390_v51, %v2355_v21  ;;  %v579_v61 = vpack.c.bf16 %v572_v50, %v571_v49  ;;  %v498_v63 = vrot.slane %v378_v37, 7  ;;  %v2452_v0 = vmax.f32 %v269_v48, 0.0 }
  0x85   : > { %1775 = vmatprep.subr.bf16.mxu0 %v1929_v31  ;;  %v462_v2 = vadd.f32 %v454_v59, %v442_v47  ;;  %v2454_v4 = vmax.f32 %v270_v58, 0.0  ;;  %v339_v21 = vmul.f32 %v2342_v15, %v2395_v55  ;;  %v514_v7 = vsel %vm511_vm0, 0.0, %v497_v62  ;;  %v271_v58 = vld [vmem:[%s2317_s10 + $0x38] sm:$0xff] }
  0x86   : > { %v461_v1 = vadd.f32 %v453_v57, %v441_v46  ;;  %1777 = vmatprep.mubr.bf16.mxu0 %v579_v61  ;;  %v515_v9 = vsel %vm511_vm0, 0.0, %v498_v63  ;;  %v340_v10 = vmul.f32 %v2342_v15, %v2397_v56  ;;  %v351_v11 = vmul.f32 %v2345_v16, %v2397_v56 }
  0x87   : > { %v482_v13 = vadd.f32 %v474_v20, %v462_v2  ;;  %v565_v14 = vadd.f32 %v514_v7, %v429_v53  ;;  %v566_v19 = vadd.f32 %v515_v9, %v430_v54  ;;  %v352_v23 = vmul.f32 %v2345_v16, %v2452_v0 }
  0x88   : > { %1776 = vmatpush3.bf16.msra.mxu0 %v1929_v31  ;;  %v481_v12 = vadd.f32 %v473_v60, %v461_v1  ;;  %v359_v24 = vadd.f32 %v351_v11, %v339_v21  ;;  %v371_v25 = vmul.f32 %v2348_v17, %v2452_v0  ;;  %v372_v28 = vmul.f32 %v2348_v17, %v2454_v4 }
  0x89   : > { %v531_v30 = vrot.slane %v482_v13, 1  ;;  %v391_v31 = vmul.f32 %v2351_v18, %v2395_v55  ;;  %v392_v32 = vmul.f32 %v2351_v18, %v2397_v56  ;;  %v360_v33 = vadd.f32 %v352_v23, %v340_v10 }
  0x8a   : > { %v530_v29 = vrot.slane %v481_v12, 1  ;;  %v379_v34 = vadd.f32 %v371_v25, %v359_v24  ;;  %v403_v35 = vmul.f32 %v2358_v22, %v2397_v56  ;;  %v404_v36 = vmul.f32 %v2358_v22, %v2452_v0 }
  0x8b   : > { %v548_v38 = vsel %vm544_vm1, %v531_v30, 0.0  ;;  %v423_v39 = vmul.f32 %v2363_v26, %v2452_v0  ;;  %v424_v40 = vmul.f32 %v2363_v26, %v2454_v4  ;;  %v380_v43 = vadd.f32 %v372_v28, %v360_v33 }
  0x8c   : > { %v547_v37 = vsel %vm544_vm1, %v530_v29, 0.0  ;;  %v558_v42 = vsel %vm248_vm2, %v548_v38, 0.0  ;;  %v411_v44 = vadd.f32 %v403_v35, %v391_v31  ;;  %v412_v47 = vadd.f32 %v404_v36, %v392_v32 }
  0x8d   : > { %v557_v41 = vsel %vm248_vm2, %v547_v37, 0.0  ;;  %v574_v46 = vadd.f32 %v566_v19, %v558_v42  ;;  %v443_v48 = vmul.f32 %v2366_v27, %v2395_v55  ;;  %v444_v50 = vmul.f32 %v2366_v27, %v2397_v56 }
  0x8e   : > { %v573_v45 = vadd.f32 %v565_v14, %v557_v41  ;;  %v431_v49 = vadd.f32 %v423_v39, %v411_v44  ;;  %v455_v53 = vmul.f32 %v2390_v51, %v2397_v56  ;;  %v456_v54 = vmul.f32 %v2390_v51, %v2452_v0 }
  0x8f   : > { %v432_v59 = vadd.f32 %v424_v40, %v412_v47  ;;  %v475_v60 = vmul.f32 %v2393_v52, %v2452_v0  ;;  %v476_v20 = vmul.f32 %v2393_v52, %v2454_v4  ;;  %v499_v62 = vrot.slane %v379_v34, 7 }
  0x90   : > { %v580_v57 = vpack.c.bf16 %v574_v46, %v573_v45  ;;  %v463_v55 = vadd.f32 %v455_v53, %v443_v48  ;;  %v464_v61 = vadd.f32 %v456_v54, %v444_v50  ;;  %v500_v63 = vrot.slane %v380_v43, 7 }
  0x91   : > { %v279_v1 = vmax.f32 %v271_v58, 0.0  ;;  %v341_v56 = vmul.f32 %v2342_v15, %v2452_v0  ;;  %v342_v2 = vmul.f32 %v2342_v15, %v2454_v4  ;;  %v353_v21 = vmul.f32 %v2345_v16, %v2454_v4 }
  0x92   : > { %1778 = vmatmul.mubr.bf16.vlgmr.msra.gmra.mrb[0].mxu0 %v580_v57  ;;  %v483_v7 = vadd.f32 %v475_v60, %v463_v55  ;;  %v484_v9 = vadd.f32 %v476_v20, %v464_v61  ;;  %v516_v10 = vsel %vm511_vm0, 0.0, %v499_v62  ;;  %v517_v11 = vsel %vm511_vm0, 0.0, %v500_v63 }
  0x93   : > { %v567_v12 = vadd.f32 %v516_v10, %v431_v49  ;;  %v568_v13 = vadd.f32 %v517_v11, %v432_v59  ;;  %v354_v14 = vmul.f32 %v2345_v16, %v279_v1  ;;  %v361_v19 = vadd.f32 %v353_v21, %v341_v56  ;;  %v1932_v56 = vld [vmem:[#allocation9 + $0x50] sm:$0xff]   ;;  %v1934_v21 = vld [vmem:[#allocation9 + $0x60] sm:$0xff]   ;;  %v1937_v10 = vld [vmem:[#allocation9 + $0x78] sm:$0xff]  }
  0x94   : > { %v532_v23 = vrot.slane %v483_v7, 1  ;;  %v533_v24 = vrot.slane %v484_v9, 1  ;;  %v373_v25 = vmul.f32 %v2348_v17, %v279_v1  ;;  %v374_v15 = vmul.f32 0.0, %v2348_v17  ;;  %1789 = vmatprep.subr.bf16.mxu1 %v1932_v56  ;;  %v1935_v7 = vld [vmem:[#allocation9 + $0x68] sm:$0xff]   ;;  %v1936_v9 = vld [vmem:[#allocation9 + $0x70] sm:$0xff]   ;;  %v2544_v11 = vld [vmem:[#allocation9 + $0x80] sm:$0xff]  }
  0x95   : > { %v362_v28 = vadd.f32 %v354_v14, %v342_v2  ;;  %v393_v29 = vmul.f32 %v2351_v18, %v2452_v0  ;;  %v394_v30 = vmul.f32 %v2351_v18, %v2454_v4  ;;  %v405_v31 = vmul.f32 %v2358_v22, %v2454_v4  ;;  %v1933_v2 = vld [vmem:[#allocation9 + $0x58] sm:$0xff]   ;;  %1790 = vmatpush3.bf16.msra.mxu1 %v1932_v56 }
  0x96   : > { %v549_v32 = vsel %vm544_vm1, %v532_v23, 0.0  ;;  %v550_v16 = vsel %vm544_vm1, %v533_v24, 0.0  ;;  %v381_v33 = vadd.f32 %v373_v25, %v361_v19  ;;  %v406_v34 = vmul.f32 %v2358_v22, %v279_v1  ;;  %1791 = vmatprep.subr.bf16.mxu1 %v1933_v2  ;;  %1809 = vmatprep.subr.bf16.mxu0 %v2544_v11  ;;  %v2556_v14 = vld [vmem:[%s3036_s3] ss:$0 sm:$0xff]  ;;  %v254_v19 = vld [vmem:[#allocation7 + $0x14] sm:$0x7] }
  0x97   : > { %v559_v17 = vsel %vm248_vm2, %v549_v32, 0.0  ;;  %v560_v35 = vsel %vm248_vm2, %v550_v16, 0.0  ;;  %v382_v36 = vadd.f32 %v374_v15, %v362_v28  ;;  %v413_v37 = vadd.f32 %v405_v31, %v393_v29  ;;  %1810 = vmatpush3.bf16.msra.mxu0 %v2544_v11  ;;  %v253_v23 = vld [vmem:[#allocation7 + $0x10] sm:$0x7] }
  0x98   : > { %v575_v38 = vadd.f32 %v567_v12, %v559_v17  ;;  %v576_v18 = vadd.f32 %v568_v13, %v560_v35  ;;  %v414_v39 = vadd.f32 %v406_v34, %v394_v30  ;;  %v425_v40 = vmul.f32 %v2363_v26, %v279_v1  ;;  %v2546_v12 = vld [vmem:[#allocation9 + $0x88] sm:$0xff]  }
  0x99   : > { %v426_v41 = vmul.f32 0.0, %v2363_v26  ;;  %v445_v42 = vmul.f32 %v2366_v27, %v2452_v0  ;;  %v446_v22 = vmul.f32 %v2366_v27, %v2454_v4  ;;  %v457_v43 = vmul.f32 %v2390_v51, %v2454_v4  ;;  %1792 = vmatpush3.bf16.msra.mxu1 %v1933_v2  ;;  %1811 = vmatprep.subr.bf16.mxu0 %v2546_v12  ;;  %v252_v13 = vld [vmem:[#allocation7 + $0xc] sm:$0x7] }
  0x9a   : > { %v581_v44 = vpack.c.bf16 %v576_v18, %v575_v38  ;;  %v458_v45 = vmul.f32 %v2390_v51, %v279_v1  ;;  %v477_v46 = vmul.f32 %v2393_v52, %v279_v1  ;;  %v433_v47 = vadd.f32 %v425_v40, %v413_v37  ;;  %1793 = vmatprep.subr.bf16.mxu1 %v1934_v21 }
  0x9b   : > { %v465_v48 = vadd.f32 %v457_v43, %v445_v42  ;;  %v478_v49 = vmul.f32 0.0, %v2393_v52  ;;  %v501_v50 = vrot.slane %v381_v33, 7  ;;  %v434_v26 = vadd.f32 %v426_v41, %v414_v39  ;;  %1812 = vmatpush3.bf16.msra.mxu0 %v2546_v12 }
  0x9c   : > { %1781 = vmatprep.mubr.bf16.mxu0 %v581_v44  ;;  %v466_v53 = vadd.f32 %v458_v45, %v446_v22  ;;  %v502_v0 = vrot.slane %v382_v36, 7  ;;  %v2559_v24 = vrot.slane %v252_v13, %v2330_v5  ;;  %v2562_v15 = vrot.slane %v252_v13, %v2333_v6 }
  0x9d   : > { %v485_v54 = vadd.f32 %v477_v46, %v465_v48  ;;  %v518_v27 = vsel %vm511_vm0, 0.0, %v501_v50  ;;  %1794 = vmatpush3.bf16.msra.mxu1 %v1934_v21  ;;  %v2565_v28 = vrot.slane %v252_v13, %v2336_v8  ;;  %v2569_v31 = vrot.slane %v254_v19, %v2330_v5 }
  0x9e   : > { %v486_v58 = vadd.f32 %v478_v49, %v466_v53  ;;  %v519_v4 = vsel %vm511_vm0, 0.0, %v502_v0  ;;  %v569_v59 = vadd.f32 %v518_v27, %v433_v47  ;;  %1795 = vmatprep.subr.bf16.mxu1 %v1935_v7  ;;  %v2572_v32 = vrot.slane %v254_v19, %v2333_v6 }
  0x9f   : > { %v534_v57 = vrot.slane %v485_v54, 1  ;;  %v570_v60 = vadd.f32 %v519_v4, %v434_v26  ;;  %v2575_v16 = vrot.slane %v254_v19, %v2336_v8  ;;  %v2579_v17 = vrot.slane %v253_v23, %v2330_v5 }
  0xa0   : > { %v535_v51 = vrot.slane %v486_v58, 1  ;;  %v2582_v35 = vrot.slane %v253_v23, %v2333_v6  ;;  %v764_v18 = vmul.f32 0.0, %v2559_v24  ;;  %v2589_v39 = vrot.slane %v253_v23, %v2336_v8 }
  0xa1   : > { %v551_v20 = vsel %vm544_vm1, %v534_v57, 0.0  ;;  %1796 = vmatpush3.bf16.msra.mxu1 %v1935_v7  ;;  %v816_v42 = vmul.f32 0.0, %v2562_v15  ;;  %v868_v22 = vmul.f32 0.0, %v2565_v28 }
  0xa2   : > { %v552_v55 = vsel %vm544_vm1, %v535_v51, 0.0  ;;  %v561_v52 = vsel %vm248_vm2, %v551_v20, 0.0  ;;  %1797 = vmatprep.subr.bf16.mxu1 %v1936_v9 }
  0xa3   : > { %v562_v61 = vsel %vm248_vm2, %v552_v55, 0.0  ;;  %v577_v62 = vadd.f32 %v569_v59, %v561_v52 }
  0xa4   : > { %v578_v63 = vadd.f32 %v570_v60, %v562_v61 }
  0xa5   : > { %1798 = vmatpush3.bf16.msra.mxu1 %v1936_v9 }
  0xa6   : > { %v582_v1 = vpack.c.bf16 %v578_v63, %v577_v62  ;;  %1799 = vmatprep.subr.bf16.mxu1 %v1937_v10 }
  0xa8   : > { %1782 = vmatmul.mubr.bf16.gmra.mrb[4].mxu0 %v582_v1 }
  0xa9   : > { %1800 = vmatpush3.bf16.msra.mxu1 %v1937_v10 }
  0xaa   : > { %1833 = vmatprep.subr.bf16.mxu1 %v2544_v11 }
 0x165   : > { %v1779_v25 = vpop.f32.mrb[0].mxu0 }
 0x166   : > { %v678_v29 = vadd.f32 %v1779_v25, %v2556_v14  ;;  %v669_v30 = vpop.f32.mrb[1].mxu0 }
 0x167   : > { %v670_v33 = vadd.f32 %v2556_v14, %v669_v30  ;;  %v1780_v34 = vpop.f32.mrb[2].mxu0 }
 0x168   : > { %v2584_v36 = vmax.f32 %v678_v29, 0.0  ;;  %v681_v37 = vadd.f32 %v1780_v34, %v2556_v14  ;;  %v672_v38 = vpop.f32.mrb[3].mxu0 }
 0x169   : > { %v700_v40 = vmax.f32 %v670_v33, 0.0  ;;  %v673_v41 = vadd.f32 %v2556_v14, %v672_v38 }
 0x16a   : > { %v2594_v43 = vmax.f32 %v681_v37, 0.0  ;;  %v797_v44 = vmul.f32 %v2569_v31, %v2584_v36  ;;  %v849_v45 = vmul.f32 %v2572_v32, %v2584_v36  ;;  %v901_v46 = vmul.f32 %v2575_v16, %v2584_v36 }
 0x16b   : > { %v701_v47 = vmax.f32 %v673_v41, 0.0  ;;  %v765_v48 = vmul.f32 %v2559_v24, %v700_v40  ;;  %v776_v49 = vmul.f32 %v2579_v17, %v700_v40  ;;  %v817_v50 = vmul.f32 %v2562_v15, %v700_v40 }
 0x16c   : > { %v828_v26 = vmul.f32 %v2582_v35, %v700_v40  ;;  %v869_v53 = vmul.f32 %v2565_v28, %v700_v40  ;;  %v880_v0 = vmul.f32 %v2589_v39, %v700_v40  ;;  %v767_v54 = vmul.f32 %v2559_v24, %v2584_v36 }
 0x16d   : > { %v777_v27 = vmul.f32 %v2579_v17, %v701_v47  ;;  %v784_v58 = vadd.f32 %v776_v49, %v764_v18  ;;  %v796_v4 = vmul.f32 %v2569_v31, %v701_v47  ;;  %v829_v57 = vmul.f32 %v2582_v35, %v701_v47 }
 0x16e   : > { %v836_v59 = vadd.f32 %v828_v26, %v816_v42  ;;  %v848_v51 = vmul.f32 %v2572_v32, %v701_v47  ;;  %v881_v60 = vmul.f32 %v2589_v39, %v701_v47  ;;  %v888_v20 = vadd.f32 %v880_v0, %v868_v22 }
 0x16f   : > { %v785_v55 = vadd.f32 %v777_v27, %v765_v48  ;;  %v804_v52 = vadd.f32 %v796_v4, %v784_v58  ;;  %v837_v61 = vadd.f32 %v829_v57, %v817_v50  ;;  %v900_v62 = vmul.f32 %v2575_v16, %v701_v47 }
 0x170   : > { %v856_v63 = vadd.f32 %v848_v51, %v836_v59  ;;  %v889_v1 = vadd.f32 %v881_v60, %v869_v53  ;;  %v766_v56 = vmul.f32 %v2559_v24, %v701_v47  ;;  %v778_v2 = vmul.f32 %v2579_v17, %v2584_v36 }
 0x171   : > { %v805_v21 = vadd.f32 %v797_v44, %v785_v55  ;;  %v857_v7 = vadd.f32 %v849_v45, %v837_v61  ;;  %v908_v9 = vadd.f32 %v900_v62, %v888_v20  ;;  %v924_v10 = vrot.slane %v804_v52, 7 }
 0x172   : > { %v909_v13 = vadd.f32 %v901_v46, %v889_v1  ;;  %v779_v19 = vmul.f32 %v2579_v17, %v2594_v43  ;;  %v786_v23 = vadd.f32 %v778_v2, %v766_v56  ;;  %v798_v25 = vmul.f32 %v2569_v31, %v2594_v43 }
 0x173   : > { %v925_v29 = vrot.slane %v805_v21, 7  ;;  %v940_v30 = vsel %vm511_vm0, 0.0, %v924_v10  ;;  %v956_v33 = vrot.slane %v908_v9, 1  ;;  %v818_v34 = vmul.f32 %v2562_v15, %v701_v47 }
 0x174   : > { %v957_v37 = vrot.slane %v909_v13, 1  ;;  %v988_v38 = vadd.f32 %v940_v30, %v856_v63  ;;  %v787_v18 = vadd.f32 %v779_v19, %v767_v54  ;;  %v806_v40 = vadd.f32 %v798_v25, %v786_v23 }
 0x175   : > { %v941_v41 = vsel %vm511_vm0, 0.0, %v925_v29  ;;  %v972_v42 = vsel %vm544_vm1, %v956_v33, 0.0  ;;  %v819_v22 = vmul.f32 %v2562_v15, %v2584_v36  ;;  %v830_v44 = vmul.f32 %v2582_v35, %v2584_v36 }
 0x176   : > { %v973_v45 = vsel %vm544_vm1, %v957_v37, 0.0  ;;  %v980_v46 = vsel %vm248_vm2, %v972_v42, 0.0  ;;  %v989_v48 = vadd.f32 %v941_v41, %v857_v7  ;;  %v831_v49 = vmul.f32 %v2582_v35, %v2594_v43 }
 0x177   : > { %v981_v50 = vsel %vm248_vm2, %v973_v45, 0.0  ;;  %v996_v26 = vadd.f32 %v988_v38, %v980_v46  ;;  %v838_v53 = vadd.f32 %v830_v44, %v818_v34  ;;  %v850_v0 = vmul.f32 %v2572_v32, %v2594_v43 }
 0x178   : > { %v997_v54 = vadd.f32 %v989_v48, %v981_v50  ;;  %v839_v27 = vadd.f32 %v831_v49, %v819_v22  ;;  %v870_v58 = vmul.f32 %v2565_v28, %v701_v47  ;;  %v871_v57 = vmul.f32 %v2565_v28, %v2584_v36 }
 0x179   : > { %v858_v4 = vadd.f32 %v850_v0, %v838_v53  ;;  %v882_v59 = vmul.f32 %v2589_v39, %v2584_v36  ;;  %v883_v51 = vmul.f32 %v2589_v39, %v2594_v43  ;;  %v926_v20 = vrot.slane %v806_v40, 7 }
 0x17a   : > { %v1004_v60 = vpack.c.bf16 %v997_v54, %v996_v26  ;;  %v902_v61 = vmul.f32 %v2575_v16, %v2594_v43  ;;  %v2653_v7 = vmul.f32 0.0, %v2569_v31  ;;  %v2656_v9 = vmul.f32 0.0, %v2572_v32 }
 0x17b   : > { %v890_v55 = vadd.f32 %v882_v59, %v870_v58  ;;  %v891_v52 = vadd.f32 %v883_v51, %v871_v57  ;;  %v1783_v62 = vpop.f32.mrb[4].mxu0  ;;  %v942_v47 = vsel %vm511_vm0, 0.0, %v926_v20  ;;  %v768_v25 = vmul.f32 %v2559_v24, %v2594_v43 }
 0x17c   : > { %1801 = vmatprep.mubr.bf16.mxu1 %v1004_v60  ;;  %v694_v63 = vadd.f32 %v1783_v62, %v2556_v14  ;;  %v685_v1 = vpop.f32.mrb[5].mxu0  ;;  %v990_v2 = vadd.f32 %v942_v47, %v858_v4  ;;  %v820_v33 = vmul.f32 %v2562_v15, %v2594_v43  ;;  %v872_v34 = vmul.f32 %v2565_v28, %v2594_v43 }
 0x17d   : > { %v910_v56 = vadd.f32 %v902_v61, %v890_v55  ;;  %v686_v36 = vadd.f32 %v2556_v14, %v685_v1  ;;  %v1784_v21 = vpop.f32.mrb[6].mxu0 }
 0x17e   : > { %v2658_v10 = vmax.f32 %v694_v63, 0.0  ;;  %v697_v13 = vadd.f32 %v1784_v21, %v2556_v14  ;;  %v688_v19 = vpop.f32.mrb[7].mxu0 }
 0x17f   : > { %v958_v23 = vrot.slane %v910_v56, 1  ;;  %v704_v29 = vmax.f32 %v686_v36, 0.0  ;;  %v689_v30 = vadd.f32 %v2556_v14, %v688_v19 }
 0x180   : > { %v2668_v37 = vmax.f32 %v697_v13, 0.0  ;;  %v801_v40 = vmul.f32 %v2569_v31, %v2658_v10  ;;  %v853_v41 = vmul.f32 %v2572_v32, %v2658_v10 }
 0x181   : > { %v974_v38 = vsel %vm544_vm1, %v958_v23, 0.0  ;;  %v2675_v42 = vmax.f32 %v689_v30, 0.0  ;;  %v799_v14 = vmul.f32 %v2569_v31, %v704_v29  ;;  %v851_v22 = vmul.f32 %v2572_v32, %v704_v29 }
 0x182   : > { %v903_v44 = vmul.f32 %v2575_v16, %v704_v29  ;;  %v982_v43 = vsel %vm248_vm2, %v974_v38, 0.0  ;;  %v769_v45 = vmul.f32 %v2559_v24, %v704_v29  ;;  %v780_v46 = vmul.f32 %v2579_v17, %v704_v29 }
 0x183   : > { %v821_v48 = vmul.f32 %v2562_v15, %v704_v29  ;;  %v807_v49 = vadd.f32 %v799_v14, %v787_v18  ;;  %v859_v50 = vadd.f32 %v851_v22, %v839_v27  ;;  %v998_v53 = vadd.f32 %v990_v2, %v982_v43 }
 0x184   : > { %v911_v26 = vadd.f32 %v903_v44, %v891_v52  ;;  %v781_v0 = vmul.f32 %v2579_v17, %v2675_v42  ;;  %v788_v54 = vadd.f32 %v780_v46, %v768_v25  ;;  %v800_v58 = vmul.f32 %v2569_v31, %v2675_v42 }
 0x185   : > { %v832_v4 = vmul.f32 %v2582_v35, %v704_v29  ;;  %v927_v57 = vrot.slane %v807_v49, 7  ;;  %v833_v51 = vmul.f32 %v2582_v35, %v2675_v42  ;;  %v852_v18 = vmul.f32 %v2572_v32, %v2675_v42 }
 0x186   : > { %v959_v59 = vrot.slane %v911_v26, 1  ;;  %v789_v27 = vadd.f32 %v781_v0, %v769_v45  ;;  %v808_v60 = vadd.f32 %v800_v58, %v788_v54  ;;  %v873_v55 = vmul.f32 %v2565_v28, %v704_v29 }
 0x187   : > { %v840_v20 = vadd.f32 %v832_v4, %v820_v33  ;;  %v943_v52 = vsel %vm511_vm0, 0.0, %v927_v57  ;;  %v841_v62 = vadd.f32 %v833_v51, %v821_v48  ;;  %v884_v47 = vmul.f32 %v2589_v39, %v704_v29 }
 0x188   : > { %v975_v61 = vsel %vm544_vm1, %v959_v59, 0.0  ;;  %v991_v1 = vadd.f32 %v943_v52, %v859_v50  ;;  %v809_v56 = vadd.f32 %v801_v40, %v789_v27  ;;  %v885_v21 = vmul.f32 %v2589_v39, %v2675_v42 }
 0x189   : > { %v983_v63 = vsel %vm248_vm2, %v975_v61, 0.0  ;;  %v860_v2 = vadd.f32 %v852_v18, %v840_v20  ;;  %v861_v36 = vadd.f32 %v853_v41, %v841_v62  ;;  %v892_v13 = vadd.f32 %v884_v47, %v872_v34 }
 0x18a   : > { %v904_v19 = vmul.f32 %v2575_v16, %v2675_v42  ;;  %v999_v23 = vadd.f32 %v991_v1, %v983_v63  ;;  %v905_v25 = vmul.f32 %v2575_v16, %v2658_v10  ;;  %v928_v30 = vrot.slane %v808_v60, 7 }
 0x18b   : > { %v929_v29 = vrot.slane %v809_v56, 7  ;;  %v893_v33 = vadd.f32 %v885_v21, %v873_v55  ;;  %v770_v40 = vmul.f32 %v2559_v24, %v2675_v42  ;;  %v771_v41 = vmul.f32 %v2559_v24, %v2658_v10 }
 0x18c   : > { %v912_v38 = vadd.f32 %v904_v19, %v892_v13  ;;  %v1005_v14 = vpack.c.bf16 %v999_v23, %v998_v53  ;;  %v944_v34 = vsel %vm511_vm0, 0.0, %v928_v30  ;;  %v782_v44 = vmul.f32 %v2579_v17, %v2658_v10 }
 0x18d   : > { %v945_v22 = vsel %vm511_vm0, 0.0, %v929_v29  ;;  %v913_v43 = vadd.f32 %v905_v25, %v893_v33  ;;  %v992_v46 = vadd.f32 %v944_v34, %v860_v2  ;;  %v783_v49 = vmul.f32 %v2579_v17, %v2668_v37  ;;  %v1940_v33 = vld [vmem:[#allocation9 + $0x90] sm:$0xff]   ;;  %v1945_v34 = vld [vmem:[#allocation9 + $0xb8] sm:$0xff]  }
 0x18e   : > { %v960_v45 = vrot.slane %v912_v38, 1  ;;  %v993_v48 = vadd.f32 %v945_v22, %v861_v36  ;;  %1802 = vmatmul.mubr.bf16.vlgmr.msra.gmra.mrb[0].mxu1 %v1005_v14  ;;  %v790_v50 = vadd.f32 %v782_v44, %v770_v40  ;;  %v802_v24 = vmul.f32 %v2569_v31, %v2668_v37  ;;  %v1941_v38 = vld [vmem:[#allocation9 + $0x98] sm:$0xff]   ;;  %1813 = vmatprep.subr.bf16.mxu0 %v1940_v33  ;;  %v1942_v40 = vld [vmem:[#allocation9 + $0xa0] sm:$0xff]   ;;  %v1944_v14 = vld [vmem:[#allocation9 + $0xb0] sm:$0xff]  }
 0x18f   : > { %v822_v26 = vmul.f32 %v2562_v15, %v2675_v42  ;;  %v961_v53 = vrot.slane %v913_v43, 1  ;;  %v823_v54 = vmul.f32 %v2562_v15, %v2658_v10  ;;  %v834_v58 = vmul.f32 %v2582_v35, %v2658_v10  ;;  %1841 = vmatpush3.bf16.msra.mxu1 %v2544_v11  ;;  %1814 = vmatpush3.bf16.msra.mxu0 %v1940_v33  ;;  %v255_v22 = vld [vmem:[#allocation7 + $0x18] sm:$0x7]  ;;  %v256_v44 = vld [vmem:[#allocation7 + $0x1c] sm:$0x7] }
 0x190   : > { %v976_v0 = vsel %vm544_vm1, %v960_v45, 0.0  ;;  %v791_v4 = vadd.f32 %v783_v49, %v771_v41  ;;  %v810_v57 = vadd.f32 %v802_v24, %v790_v50  ;;  %v835_v31 = vmul.f32 %v2582_v35, %v2668_v37  ;;  %1834 = vmatprep.subr.bf16.mxu1 %v2546_v12  ;;  %1815 = vmatprep.subr.bf16.mxu0 %v1941_v38  ;;  %v1943_v41 = vld [vmem:[#allocation9 + $0xa8] sm:$0xff]   ;;  %v257_v43 = vld [vmem:[#allocation7 + $0x20] sm:$0x7] }
 0x191   : > { %v984_v17 = vsel %vm248_vm2, %v976_v0, 0.0  ;;  %v977_v59 = vsel %vm544_vm1, %v961_v53, 0.0  ;;  %v842_v18 = vadd.f32 %v834_v58, %v822_v26  ;;  %v854_v15 = vmul.f32 %v2572_v32, %v2668_v37  ;;  %v2761_v45 = vld [vmem:[%s3036_s3 + $0x1] ss:$0 sm:$0xff] }
 0x192   : > { %v1000_v51 = vadd.f32 %v992_v46, %v984_v17  ;;  %v985_v11 = vsel %vm248_vm2, %v977_v59, 0.0  ;;  %v811_v27 = vadd.f32 %v2653_v7, %v791_v4  ;;  %v843_v60 = vadd.f32 %v835_v31, %v823_v54 }
 0x193   : > { %v874_v20 = vmul.f32 %v2565_v28, %v2675_v42  ;;  %v1001_v55 = vadd.f32 %v993_v48, %v985_v11  ;;  %v862_v35 = vadd.f32 %v854_v15, %v842_v18  ;;  %v886_v52 = vmul.f32 %v2589_v39, %v2658_v10  ;;  %1842 = vmatpush3.bf16.msra.mxu1 %v2546_v12 }
 0x194   : > { %v875_v61 = vmul.f32 %v2565_v28, %v2658_v10  ;;  %v887_v32 = vmul.f32 %v2589_v39, %v2668_v37  ;;  %v907_v62 = vmul.f32 0.0, %v2575_v16  ;;  %v930_v7 = vrot.slane %v810_v57, 7  ;;  %1835 = vmatprep.subr.bf16.mxu1 %v1940_v33  ;;  %1816 = vmatpush3.bf16.msra.mxu0 %v1941_v38 }
 0x195   : > { %v1006_v47 = vpack.c.bf16 %v1001_v55, %v1000_v51  ;;  %v894_v63 = vadd.f32 %v886_v52, %v874_v20  ;;  %v906_v42 = vmul.f32 %v2575_v16, %v2668_v37  ;;  %v931_v1 = vrot.slane %v811_v27, 7  ;;  %1817 = vmatprep.subr.bf16.mxu0 %v1942_v40 }
 0x196   : > { %v863_v56 = vadd.f32 %v2656_v9, %v843_v60  ;;  %v895_v2 = vadd.f32 %v887_v32, %v875_v61  ;;  %v946_v12 = vsel %vm511_vm0, 0.0, %v930_v7  ;;  %v2764_v46 = vrot.slane %v255_v22, %v2330_v5 }
 0x197   : > { %1805 = vmatprep.mubr.bf16.mxu1 %v1006_v47  ;;  %v914_v36 = vadd.f32 %v906_v42, %v894_v63  ;;  %v947_v28 = vsel %vm511_vm0, 0.0, %v931_v1  ;;  %v994_v10 = vadd.f32 %v946_v12, %v862_v35  ;;  %1843 = vmatpush3.bf16.msra.mxu1 %v1940_v33  ;;  %v2767_v48 = vrot.slane %v255_v22, %v2333_v6 }
 0x198   : > { %v915_v39 = vadd.f32 %v907_v62, %v895_v2  ;;  %v995_v21 = vadd.f32 %v947_v28, %v863_v56  ;;  %1836 = vmatprep.subr.bf16.mxu1 %v1941_v38  ;;  %1818 = vmatpush3.bf16.msra.mxu0 %v1942_v40  ;;  %v2770_v49 = vrot.slane %v255_v22, %v2336_v8 }
 0x199   : > { %v962_v13 = vrot.slane %v914_v36, 1  ;;  %1819 = vmatprep.subr.bf16.mxu0 %v1943_v41  ;;  %v2773_v24 = vrot.slane %v256_v44, %v2330_v5  ;;  %v2776_v26 = vrot.slane %v257_v43, %v2330_v5  ;;  %v2780_v54 = vrot.slane %v256_v44, %v2333_v6 }
 0x19a   : > { %v963_v19 = vrot.slane %v915_v39, 1  ;;  %v2783_v58 = vrot.slane %v257_v43, %v2333_v6  ;;  %v2786_v17 = vrot.slane %v257_v43, %v2336_v8  ;;  %v2790_v31 = vrot.slane %v256_v44, %v2336_v8 }
 0x19b   : > { %v978_v23 = vsel %vm544_vm1, %v962_v13, 0.0  ;;  %1844 = vmatpush3.bf16.msra.mxu1 %v1941_v38  ;;  %v1187_v5 = vmul.f32 0.0, %v2764_v46  ;;  %v1239_v59 = vmul.f32 0.0, %v2767_v48  ;;  %v1291_v6 = vmul.f32 0.0, %v2770_v49 }
 0x19c   : > { %v979_v25 = vsel %vm544_vm1, %v963_v19, 0.0  ;;  %v986_v16 = vsel %vm248_vm2, %v978_v23, 0.0  ;;  %1837 = vmatprep.subr.bf16.mxu1 %v1942_v40  ;;  %1820 = vmatpush3.bf16.msra.mxu0 %v1943_v41  ;;  %v2799_v11 = vmul.f32 0.0, %v2776_v26  ;;  %v2803_v8 = vmul.f32 0.0, %v2783_v58 }
 0x19d   : > { %v987_v9 = vsel %vm248_vm2, %v979_v25, 0.0  ;;  %v1002_v37 = vadd.f32 %v994_v10, %v986_v16  ;;  %1821 = vmatprep.subr.bf16.mxu0 %v1944_v14  ;;  %v2806_v20 = vmul.f32 0.0, %v2786_v17 }
 0x19e   : > { %v1003_v30 = vadd.f32 %v995_v21, %v987_v9 }
 0x19f   : > { %1845 = vmatpush3.bf16.msra.mxu1 %v1942_v40 }
 0x1a0   : > { %v1007_v29 = vpack.c.bf16 %v1003_v30, %v1002_v37  ;;  %1838 = vmatprep.subr.bf16.mxu1 %v1943_v41  ;;  %1822 = vmatpush3.bf16.msra.mxu0 %v1944_v14 }
 0x1a1   : > { %1823 = vmatprep.subr.bf16.mxu0 %v1945_v34 }
 0x1a2   : > { %1806 = vmatmul.mubr.bf16.gmra.mrb[4].mxu1 %v1007_v29 }
 0x1a3   : > { %1846 = vmatpush3.bf16.msra.mxu1 %v1943_v41 }
 0x1a4   : > { %1839 = vmatprep.subr.bf16.mxu1 %v1944_v14  ;;  %1824 = vmatpush3.bf16.msra.mxu0 %v1945_v34 }
 0x1a7   : > { %1847 = vmatpush3.bf16.msra.mxu1 %v1944_v14 }
 0x1a8   : > { %1840 = vmatprep.subr.bf16.mxu1 %v1945_v34 }
 0x1ab   : > { %1848 = vmatpush3.bf16.msra.mxu1 %v1945_v34 }
 0x261   : > { %v1803_v50 = vpop.f32.mrb[0].mxu1 }
 0x262   : > { %v1103_v53 = vadd.f32 %v1803_v50, %v2761_v45  ;;  %v1094_v0 = vpop.f32.mrb[1].mxu1 }
 0x263   : > { %v1095_v4 = vadd.f32 %v2761_v45, %v1094_v0  ;;  %v1804_v57 = vpop.f32.mrb[2].mxu1 }
 0x264   : > { %v2794_v51 = vmax.f32 %v1103_v53, 0.0  ;;  %v1106_v18 = vadd.f32 %v1804_v57, %v2761_v45  ;;  %v1097_v15 = vpop.f32.mrb[3].mxu1 }
 0x265   : > { %v1125_v27 = vmax.f32 %v1095_v4, 0.0  ;;  %v1098_v60 = vadd.f32 %v2761_v45, %v1097_v15 }
 0x266   : > { %v2808_v55 = vmax.f32 %v1106_v18, 0.0  ;;  %v1220_v35 = vmul.f32 %v2776_v26, %v2794_v51  ;;  %v1272_v52 = vmul.f32 %v2783_v58, %v2794_v51  ;;  %v1324_v61 = vmul.f32 %v2786_v17, %v2794_v51 }
 0x267   : > { %v1126_v32 = vmax.f32 %v1098_v60, 0.0  ;;  %v1188_v62 = vmul.f32 %v2764_v46, %v1125_v27  ;;  %v1199_v7 = vmul.f32 %v2773_v24, %v1125_v27  ;;  %v1240_v47 = vmul.f32 %v2767_v48, %v1125_v27 }
 0x268   : > { %v1251_v63 = vmul.f32 %v2780_v54, %v1125_v27  ;;  %v1292_v42 = vmul.f32 %v2770_v49, %v1125_v27  ;;  %v1303_v1 = vmul.f32 %v2790_v31, %v1125_v27  ;;  %v1190_v56 = vmul.f32 %v2764_v46, %v2794_v51 }
 0x269   : > { %v1200_v2 = vmul.f32 %v2773_v24, %v1126_v32  ;;  %v1207_v12 = vadd.f32 %v1199_v7, %v1187_v5  ;;  %v1219_v36 = vmul.f32 %v2776_v26, %v1126_v32  ;;  %v1252_v28 = vmul.f32 %v2780_v54, %v1126_v32 }
 0x26a   : > { %v1259_v10 = vadd.f32 %v1251_v63, %v1239_v59  ;;  %v1271_v39 = vmul.f32 %v2783_v58, %v1126_v32  ;;  %v1304_v21 = vmul.f32 %v2790_v31, %v1126_v32  ;;  %v1311_v13 = vadd.f32 %v1303_v1, %v1291_v6 }
 0x26b   : > { %v1208_v19 = vadd.f32 %v1200_v2, %v1188_v62  ;;  %v1227_v23 = vadd.f32 %v1219_v36, %v1207_v12  ;;  %v1260_v25 = vadd.f32 %v1252_v28, %v1240_v47  ;;  %v1323_v16 = vmul.f32 %v2786_v17, %v1126_v32 }
 0x26c   : > { %v1279_v9 = vadd.f32 %v1271_v39, %v1259_v10  ;;  %v1312_v37 = vadd.f32 %v1304_v21, %v1292_v42  ;;  %v1189_v30 = vmul.f32 %v2764_v46, %v1126_v32  ;;  %v1201_v29 = vmul.f32 %v2773_v24, %v2794_v51 }
 0x26d   : > { %v1228_v33 = vadd.f32 %v1220_v35, %v1208_v19  ;;  %v1280_v38 = vadd.f32 %v1272_v52, %v1260_v25  ;;  %v1331_v40 = vadd.f32 %v1323_v16, %v1311_v13  ;;  %v1347_v41 = vrot.slane %v1227_v23, 7 }
 0x26e   : > { %v1332_v14 = vadd.f32 %v1324_v61, %v1312_v37  ;;  %v1202_v34 = vmul.f32 %v2773_v24, %v2808_v55  ;;  %v1209_v22 = vadd.f32 %v1201_v29, %v1189_v30  ;;  %v1221_v44 = vmul.f32 %v2776_v26, %v2808_v55 }
 0x26f   : > { %v1348_v43 = vrot.slane %v1228_v33, 7  ;;  %v1363_v50 = vsel %vm511_vm0, 0.0, %v1347_v41  ;;  %v1379_v53 = vrot.slane %v1331_v40, 1  ;;  %v1241_v0 = vmul.f32 %v2767_v48, %v1126_v32 }
 0x270   : > { %v1380_v4 = vrot.slane %v1332_v14, 1  ;;  %v1411_v57 = vadd.f32 %v1363_v50, %v1279_v9  ;;  %v1210_v5 = vadd.f32 %v1202_v34, %v1190_v56  ;;  %v1229_v59 = vadd.f32 %v1221_v44, %v1209_v22 }
 0x271   : > { %v1364_v18 = vsel %vm511_vm0, 0.0, %v1348_v43  ;;  %v1395_v15 = vsel %vm544_vm1, %v1379_v53, 0.0  ;;  %v1242_v6 = vmul.f32 %v2767_v48, %v2794_v51  ;;  %v1253_v27 = vmul.f32 %v2780_v54, %v2794_v51 }
 0x272   : > { %v1396_v60 = vsel %vm544_vm1, %v1380_v4, 0.0  ;;  %v1403_v35 = vsel %vm248_vm2, %v1395_v15, 0.0  ;;  %v1412_v52 = vadd.f32 %v1364_v18, %v1280_v38  ;;  %v1254_v61 = vmul.f32 %v2780_v54, %v2808_v55 }
 0x273   : > { %v1404_v62 = vsel %vm248_vm2, %v1396_v60, 0.0  ;;  %v1419_v7 = vadd.f32 %v1411_v57, %v1403_v35  ;;  %v1261_v47 = vadd.f32 %v1253_v27, %v1241_v0  ;;  %v1273_v63 = vmul.f32 %v2783_v58, %v2808_v55 }
 0x274   : > { %v1420_v42 = vadd.f32 %v1412_v52, %v1404_v62  ;;  %v1262_v1 = vadd.f32 %v1254_v61, %v1242_v6  ;;  %v1293_v56 = vmul.f32 %v2770_v49, %v1126_v32  ;;  %v1294_v2 = vmul.f32 %v2770_v49, %v2794_v51 }
 0x275   : > { %v1807_v12 = vpop.f32.mrb[4].mxu1  ;;  %v1281_v36 = vadd.f32 %v1273_v63, %v1261_v47  ;;  %v1305_v28 = vmul.f32 %v2790_v31, %v2794_v51  ;;  %v1306_v10 = vmul.f32 %v2790_v31, %v2808_v55  ;;  %v1325_v39 = vmul.f32 %v2786_v17, %v2808_v55 }
 0x276   : > { %v1119_v21 = vadd.f32 %v1807_v12, %v2761_v45  ;;  %v1110_v13 = vpop.f32.mrb[5].mxu1  ;;  %v1427_v19 = vpack.c.bf16 %v1420_v42, %v1419_v7  ;;  %v1349_v23 = vrot.slane %v1229_v59, 7  ;;  %v1191_v32 = vmul.f32 %v2764_v46, %v2808_v55 }
 0x277   : > { %v1111_v25 = vadd.f32 %v2761_v45, %v1110_v13  ;;  %v1808_v16 = vpop.f32.mrb[6].mxu1  ;;  %v1313_v9 = vadd.f32 %v1305_v28, %v1293_v56  ;;  %v1314_v37 = vadd.f32 %v1306_v10, %v1294_v2  ;;  %v1243_v51 = vmul.f32 %v2767_v48, %v2808_v55 }
 0x278   : > { %v2869_v30 = vmax.f32 %v1119_v21, 0.0  ;;  %v1122_v29 = vadd.f32 %v1808_v16, %v2761_v45  ;;  %v1113_v33 = vpop.f32.mrb[7].mxu1  ;;  %1825 = vmatprep.mubr.bf16.mxu0 %v1427_v19  ;;  %v1365_v38 = vsel %vm511_vm0, 0.0, %v1349_v23  ;;  %v1295_v40 = vmul.f32 %v2770_v49, %v2808_v55 }
 0x279   : > { %v1129_v41 = vmax.f32 %v1111_v25, 0.0  ;;  %v1114_v14 = vadd.f32 %v2761_v45, %v1113_v33  ;;  %v1333_v34 = vadd.f32 %v1325_v39, %v1313_v9  ;;  %v1413_v22 = vadd.f32 %v1365_v38, %v1281_v36 }
 0x27a   : > { %v1132_v44 = vmax.f32 %v1122_v29, 0.0  ;;  %v1194_v43 = vmul.f32 %v2764_v46, %v2869_v30  ;;  %v1224_v50 = vmul.f32 %v2776_v26, %v2869_v30  ;;  %v1276_v53 = vmul.f32 %v2783_v58, %v2869_v30 }
 0x27b   : > { %v2882_v0 = vmax.f32 %v1114_v14, 0.0  ;;  %v1222_v4 = vmul.f32 %v2776_v26, %v1129_v41  ;;  %v1274_v55 = vmul.f32 %v2783_v58, %v1129_v41  ;;  %v1326_v45 = vmul.f32 %v2786_v17, %v1129_v41 }
 0x27c   : > { %v1206_v57 = vmul.f32 %v2773_v24, %v1132_v44  ;;  %v2889_v59 = vmul.f32 %v2776_v26, %v1132_v44  ;;  %v2892_v18 = vmul.f32 %v2780_v54, %v1132_v44  ;;  %v2895_v15 = vmul.f32 %v2783_v58, %v1132_v44 }
 0x27d   : > { %v2898_v6 = vmul.f32 %v2790_v31, %v1132_v44  ;;  %v2901_v27 = vmul.f32 %v2786_v17, %v1132_v44  ;;  %v1230_v60 = vadd.f32 %v1222_v4, %v1210_v5  ;;  %v1282_v35 = vadd.f32 %v1274_v55, %v1262_v1 }
 0x27e   : > { %v1214_v52 = vadd.f32 %v1206_v57, %v1194_v43  ;;  %v1334_v61 = vadd.f32 %v1326_v45, %v1314_v37  ;;  %v1381_v62 = vrot.slane %v1333_v34, 1  ;;  %v1192_v7 = vmul.f32 %v2764_v46, %v1129_v41 }
 0x27f   : > { %v1350_v47 = vrot.slane %v1230_v60, 7  ;;  %v1203_v63 = vmul.f32 %v2773_v24, %v1129_v41  ;;  %v1204_v42 = vmul.f32 %v2773_v24, %v2882_v0  ;;  %v1223_v56 = vmul.f32 %v2776_v26, %v2882_v0 }
 0x280   : > { %v1382_v2 = vrot.slane %v1334_v61, 1  ;;  %v1397_v12 = vsel %vm544_vm1, %v1381_v62, 0.0  ;;  %v1244_v5 = vmul.f32 %v2767_v48, %v1129_v41  ;;  %v1255_v1 = vmul.f32 %v2780_v54, %v1129_v41 }
 0x281   : > { %v1366_v36 = vsel %vm511_vm0, 0.0, %v1350_v47  ;;  %v1405_v28 = vsel %vm248_vm2, %v1397_v12, 0.0  ;;  %v1211_v10 = vadd.f32 %v1203_v63, %v1191_v32  ;;  %v1212_v39 = vadd.f32 %v1204_v42, %v1192_v7 }
 0x282   : > { %v1398_v21 = vsel %vm544_vm1, %v1382_v2, 0.0  ;;  %v1414_v13 = vadd.f32 %v1366_v36, %v1282_v35  ;;  %v1421_v19 = vadd.f32 %v1413_v22, %v1405_v28  ;;  %v1256_v26 = vmul.f32 %v2780_v54, %v2882_v0 }
 0x283   : > { %v1406_v23 = vsel %vm248_vm2, %v1398_v21, 0.0  ;;  %v1231_v25 = vadd.f32 %v1223_v56, %v1211_v10  ;;  %v1232_v16 = vadd.f32 %v1224_v50, %v1212_v39  ;;  %v1263_v9 = vadd.f32 %v1255_v1, %v1243_v51 }
 0x284   : > { %v1422_v37 = vadd.f32 %v1414_v13, %v1406_v23  ;;  %v1264_v29 = vadd.f32 %v1256_v26, %v1244_v5  ;;  %v1275_v33 = vmul.f32 %v2783_v58, %v2882_v0  ;;  %v1296_v32 = vmul.f32 %v2770_v49, %v1129_v41 }
 0x285   : > { %v1307_v38 = vmul.f32 %v2790_v31, %v1129_v41  ;;  %v1308_v14 = vmul.f32 %v2790_v31, %v2882_v0  ;;  %v1327_v34 = vmul.f32 %v2786_v17, %v2882_v0  ;;  %v1328_v22 = vmul.f32 %v2786_v17, %v2869_v30 }
 0x286   : > { %v1428_v44 = vpack.c.bf16 %v1422_v37, %v1421_v19  ;;  %v1283_v51 = vadd.f32 %v1275_v33, %v1263_v9  ;;  %v1284_v43 = vadd.f32 %v1276_v53, %v1264_v29  ;;  %v1351_v50 = vrot.slane %v1231_v25, 7  ;;  %v1709_v29 = vld [vmem:[%s3036_s3 + $0x2] ss:$0 sm:$0xff] }
 0x287   : > { %v1315_v4 = vadd.f32 %v1307_v38, %v1295_v40  ;;  %v1316_v55 = vadd.f32 %v1308_v14, %v1296_v32  ;;  %v1352_v58 = vrot.slane %v1232_v16, 7  ;;  %v1193_v45 = vmul.f32 %v2764_v46, %v2882_v0  ;;  %v1550_v32 = vld [vmem:[%s2317_s10 + $0x10] sm:$0xff] }
 0x288   : > { %1826 = vmatmul.mubr.bf16.vlgmr.msra.gmra.mrb[8].mxu0 %v1428_v44  ;;  %v1367_v41 = vsel %vm511_vm0, 0.0, %v1351_v50  ;;  %v1205_v57 = vmul.f32 %v2773_v24, %v2869_v30  ;;  %v1234_v60 = vadd.f32 %v2799_v11, %v1214_v52  ;;  %v1245_v17 = vmul.f32 %v2767_v48, %v2882_v0 }
 0x289   : > { %v1335_v35 = vadd.f32 %v1327_v34, %v1315_v4  ;;  %v1336_v53 = vadd.f32 %v1328_v22, %v1316_v55  ;;  %v1368_v40 = vsel %vm511_vm0, 0.0, %v1352_v58  ;;  %v1415_v61 = vadd.f32 %v1367_v41, %v1283_v51  ;;  %v1548_v34 = vld [vmem:[%s2317_s10] sm:$0xff]  ;;  %v1551_v51 = vld [vmem:[%s2317_s10 + $0x18] sm:$0xff]  ;;  %v1549_v4 = vld [vmem:[%s2317_s10 + $0x8] sm:$0xff] }
 0x28a   : > { %v1416_v62 = vadd.f32 %v1368_v40, %v1284_v43  ;;  %v1213_v7 = vadd.f32 %v1205_v57, %v1193_v45  ;;  %v1246_v46 = vmul.f32 %v2767_v48, %v2869_v30  ;;  %v1257_v47 = vmul.f32 %v2780_v54, %v2869_v30 }
 0x28b   : > { %v1383_v63 = vrot.slane %v1335_v35, 1  ;;  %v1384_v24 = vrot.slane %v1336_v53, 1  ;;  %v1297_v11 = vmul.f32 %v2770_v49, %v2882_v0  ;;  %v1298_v52 = vmul.f32 %v2770_v49, %v2869_v30  ;;  %v1552_v53 = vld [vmem:[%s2317_s10 + $0x20] sm:$0xff] }
 0x28c   : > { %v1233_v42 = vadd.f32 %v2889_v59, %v1213_v7  ;;  %v1265_v56 = vadd.f32 %v1257_v47, %v1245_v17  ;;  %v1266_v2 = vadd.f32 %v2892_v18, %v1246_v46  ;;  %v1309_v12 = vmul.f32 %v2790_v31, %v2869_v30 }
 0x28d   : > { %v1399_v48 = vsel %vm544_vm1, %v1383_v63, 0.0  ;;  %v1400_v54 = vsel %vm544_vm1, %v1384_v24, 0.0  ;;  %v1318_v5 = vadd.f32 %v2898_v6, %v1298_v52  ;;  %v1354_v1 = vrot.slane %v1234_v60, 7  ;;  %v1554_v60 = vld [vmem:[%s2317_s10 + $0x30] sm:$0xff]  ;;  %v1553_v63 = vld [vmem:[%s2317_s10 + $0x28] sm:$0xff] }
 0x28e   : > { %v1407_v0 = vsel %vm248_vm2, %v1399_v48, 0.0  ;;  %v1408_v49 = vsel %vm248_vm2, %v1400_v54, 0.0  ;;  %v1285_v59 = vadd.f32 %v2895_v15, %v1265_v56  ;;  %v1286_v18 = vadd.f32 %v2803_v8, %v1266_v2 }
 0x28f   : > { %v1423_v36 = vadd.f32 %v1415_v61, %v1407_v0  ;;  %v1424_v28 = vadd.f32 %v1416_v62, %v1408_v49  ;;  %v1317_v31 = vadd.f32 %v1309_v12, %v1297_v11  ;;  %v1338_v30 = vadd.f32 %v2806_v20, %v1318_v5  ;;  %v1555_v62 = vld [vmem:[%s2317_s10 + $0x38] sm:$0xff]  ;;  %s2038_s10 = scalar_lea.vmem %s2037_s26, 2048 }
 0x290   : > { %v1353_v10 = vrot.slane %v1233_v42, 7  ;;  %v1370_v39 = vsel %vm511_vm0, 0.0, %v1354_v1  ;;  %p2040_p9 = scmp.lt.s32.totalorder %s2038_s10, %s2032_s25 }
 0x291   : > { %v1429_v6 = vpack.c.bf16 %v1424_v28, %v1423_v36  ;;  %v1337_v21 = vadd.f32 %v2901_v27, %v1317_v31  ;;  %v1386_v13 = vrot.slane %v1338_v30, 1  ;;  %v1418_v19 = vadd.f32 %v1370_v39, %v1286_v18 }
 0x292   : > { %v1369_v26 = vsel %vm511_vm0, 0.0, %v1353_v10  ;;  %p2041_p12 = por %p2040_p9, %p2039_p7 }
 0x293   : > { %1829 = vmatprep.mubr.bf16.mxu1 %v1429_v6  ;;  %v1385_v15 = vrot.slane %v1337_v21, 1  ;;  %v1402_v8 = vsel %vm544_vm1, %v1386_v13, 0.0  ;;  %v1417_v23 = vadd.f32 %v1369_v26, %v1285_v59 }
 0x294   : > { %v1410_v20 = vsel %vm248_vm2, %v1402_v8, 0.0  ;;  %p2042_p2 = pnand %p2041_p12, %p2035_p3 }
 0x295   : > { %v1401_v25 = vsel %vm544_vm1, %v1385_v15, 0.0  ;;  %v1426_v16 = vadd.f32 %v1418_v19, %v1410_v20 }
 0x296   : > { %v1409_v27 = vsel %vm248_vm2, %v1401_v25, 0.0 }
 0x297   : > { %v1425_v9 = vadd.f32 %v1417_v23, %v1409_v27 }
 0x299   : > { %v1430_v37 = vpack.c.bf16 %v1426_v16, %v1425_v9 }
 0x29b   : > { %1830 = vmatmul.mubr.bf16.vlgmr.msra.gmra.mrb[8].mxu1 %v1430_v37 }
 0x35b   : > { %v1827_v33 = vpop.f32.mrb[8].mxu0 }
 0x35c   : > { %v1526_v38 = vadd.f32 %v1827_v33, %v1709_v29  ;;  %v1517_v14 = vpop.f32.mrb[9].mxu0 }
 0x35d   : > { %v1518_v22 = vadd.f32 %v1709_v29, %v1517_v14  ;;  %v1828_v44 = vpop.f32.mrb[10].mxu0 }
 0x35e   : > { %v1558_v3 = vadd.f32 %v1550_v32, %v1526_v38  ;;  %v1529_v43 = vadd.f32 %v1828_v44, %v1709_v29  ;;  %v1520_v50 = vpop.f32.mrb[11].mxu0 }
 0x35f   : > { %v1556_v55 = vadd.f32 %v1548_v34, %v1518_v22  ;;  %v1521_v58 = vadd.f32 %v1709_v29, %v1520_v50 }
 0x360   : > { %1566 = vst [vmem:[%s244_s24 + $0x10] sm:$0xff] %v1558_v3  ;;  %v1559_v45 = vadd.f32 %v1551_v51, %v1529_v43 }
 0x361   : > { %1564 = vst [vmem:[%s244_s24] sm:$0xff] %v1556_v55  ;;  %v1557_v41 = vadd.f32 %v1549_v4, %v1521_v58 }
 0x362   : > { %1567 = vst [vmem:[%s244_s24 + $0x18] sm:$0xff] %v1559_v45 }
 0x363   : > { %1565 = vst [vmem:[%s244_s24 + $0x8] sm:$0xff] %v1557_v41 }
 0x36e   : > { %v1831_v57 = vpop.f32.mrb[8].mxu1 }
 0x36f   : > { %v1542_v17 = vadd.f32 %v1831_v57, %v1709_v29  ;;  %v1533_v35 = vpop.f32.mrb[9].mxu1 }
 0x370   : > { %v1534_v40 = vadd.f32 %v1709_v29, %v1533_v35  ;;  %v1832_v61 = vpop.f32.mrb[10].mxu1 }
 0x371   : > { %v1562_v7 = vadd.f32 %v1554_v60, %v1542_v17  ;;  %v1545_v46 = vadd.f32 %v1832_v61, %v1709_v29  ;;  %v1536_v47 = vpop.f32.mrb[11].mxu1 }
 0x372   : > { %v1560_v24 = vadd.f32 %v1552_v53, %v1534_v40  ;;  %v1537_v11 = vadd.f32 %v1709_v29, %v1536_v47 }
 0x373   : > { %1570 = vst [vmem:[%s244_s24 + $0x30] sm:$0xff] %v1562_v7  ;;  %v1563_v52 = vadd.f32 %v1555_v62, %v1545_v46 }
 0x374   : > { %1568 = vst [vmem:[%s244_s24 + $0x20] sm:$0xff] %v1560_v24  ;;  %v1561_v42 = vadd.f32 %v1553_v63, %v1537_v11 }
 0x375   : > { %1571 = vst [vmem:[%s244_s24 + $0x38] sm:$0xff] %v1563_v52 }
 0x376   : > { %1569 = vst [vmem:[%s244_s24 + $0x28] sm:$0xff] %v1561_v42 }
 0x377   : > { %2045 = shalt.err (!%p2042_p2)
}
 0x378   : > { %s2046_s21 = scalar_lea.hbm %s2989_s29, 1024  ;;  %s2050_s30 = scalar_lea.hbm %s3037_s4, 2048 }
 0x379   : > { %p2047_p13 = scmp.ne.s32.totalorder %s2989_s29, %s2046_s21  ;;  %p2051_p4 = scmp.lt.u32.totalorder %s2989_s29, %s3037_s4 }
 0x37a   : > { %p2052_p5 = scmp.lt.u32.totalorder %s2050_s30, %s2046_s21  ;;  %p2054_p11 = scmp.lt.u32.totalorder %s2046_s21, %s2989_s29 }
 0x37b   : > { %p2048_p6 = pnand %p2047_p13, %p3051_p0 }
 0x37c   : > { %p2053_p8 = por %p2052_p5, %p2051_p4 }
 0x37d   : > { %p2049_p10 = pneg %p2048_p6 }
 0x37e   : > { %p2055_p1 = por %p2054_p11, %p2053_p8 }
 0x380   : > { %p2056_p3 = pnand %p2055_p1, %p2049_p10 }
 0x382   : > { %2059 = shalt.err (!%p2056_p3)
}
 0x383   : > { %s2112_s24 = smov 128   ;;  %s2113_s28 = smov 8  }
 0x384   : > { %1859 = dma.vmem_to_hbm [thread:$0]  (%p3051_p0), %s2984_s20, 1024, %s2989_s29, %s1573_s19, %s2112_s24, %s2112_s24, %s2113_s28  }
 0x385 PF: > { %s1601_s11 = sand.u32 1, %s2090_s15   ;;  %p3052_p7 = scmp.ne.s32.totalorder %s3042_s22, 0 }
 0x386   : > { %p3053_p9 = scmp.ge.s32.totalorder %s2102_s18, 2  ;;  %s1602_s12 = scalar_lea.sflag [#allocation6], %s1601_s11 }
 0x388   : > { %p1873_p12 = pnand %p3053_p9, %p3052_p7 }
 0x38a   : > { %2085 = dma.done.wait (!%p1873_p12), %s1602_s12, 1024  }
 0x38b   : > { %2087 = vsyncadd (!%p1873_p12), %s1602_s12, 4294966272  ;;  %p18_p2 = scmp.ge.s32.totalorder %s2249_s9, 4   ;;  %s3054_s15 = smov %s2094_s16 }
 0x38c   : > { %s3055_s16 = smov %s2098_s17  ;;  %s3056_s17 = smov %s2265_s14 }
 0x38d   : > { %s3057_s18 = smov %s2249_s9  ;;  %20 = sbr.rel (!%p18_p2) target bundleno = 6 (0x6), region = 97 }
 0x394   :  { %1607 = vsyncpa [#allocation5], 1 }
 0x395   :  { %1609 = vsyncpa [#allocation5 + $0x1], 1 }
 0x396   :  { %1610 = vsyncpa [#allocation8], 1 }
 0x397   :  { %1611 = vsyncpa [#allocation6], 1 }
 0x398   :  { %1613 = vsyncpa [#allocation6 + $0x1], 1 }

// kernel: tpu_custom_call.1
= control target key start
LH: loop header
LB: loop body
LE: loop exit
PB: predicated region body
PF: predicated region fallthrough
CT: control target
= control target key end

     0   :  { %9 = vsyncpa [#allocation5], 0  ;;  %s3033_s0 = inlined_call_operand.hbm [shape: f32[2,8,8,128], index: 0, kind: input, shape index: {}]   ;;  %s3034_s1 = inlined_call_operand.hbm [shape: f32[3,3,3,128], index: 1, kind: input, shape index: {}]   ;;  %s3035_s2 = inlined_call_operand.hbm [shape: bf16[3,128,128], index: 2, kind: input, shape index: {}]   ;;  %s3036_s3 = inlined_call_operand.vmem [shape: f32[3,128], index: 3, kind: input, shape index: {}]   ;;  %s3037_s4 = inlined_call_operand.hbm [shape: f32[2,8,8,128], index: 4, kind: output, shape index: {}]  }
   0x1   :  { %11 = vsyncpa [#allocation5 + $0x1], 0 }
   0x2   :  { %12 = vsyncpa [#allocation8], 0 }
   0x3   :  { %13 = vsyncpa [#allocation6], 0 }
   0x4   :  { %15 = vsyncpa [#allocation6 + $0x1], 0  ;;  %s2139_s15 = smov 0   ;;  %s2141_s16 = smov 0  }
   0x5   :  { %s2143_s17 = smov 0   ;;  %s2145_s18 = smov 0  }
   0x6 LB: > { %s2160_s19 = sadd.s32 4294967295, %s2102_s18   ;;  %s1678_s20 = sadd.s32 4294967294, %s2102_s18   ;;  %s2102_s18 = sphi %s2145_s18, %s3057_s18   ;;  %s2098_s17 = sphi %s2143_s17, %s3056_s17   ;;  %s2094_s16 = sphi %s2141_s16, %s3055_s16   ;;  %s2090_s15 = sphi %s2139_s15, %s3054_s15  }
   0x7   : > { %p41_p0 = scmp.ne.s32.totalorder %s2094_s16, %s2090_s15  ;;  %p3038_p1 = scmp.eq.s32.totalorder %s2160_s19, 0 }
   0x8   : > { %p134_p3 = scmp.eq.s32.totalorder %s1678_s20, 1  ;;  %p1679_p5 = scmp.ge.s32.totalorder %s2102_s18, 1 }
   0x9   : > { %p2169_p4 = por %p3038_p1, %p41_p0  ;;  %p141_p7 = scmp.lt.s32.totalorder %s2102_s18, 3 }
   0xa   : > { %p2174_p6 = por %p134_p3, %p41_p0  ;;  %s2104_s24 = smov [#allocation7]  }
   0xb   : > { %s3041_s21 = scalar_select %p2169_p4, 1, 0 }
   0xc   : > { %s3042_s22 = scalar_select %p2174_p6, 1, 0 }
   0xd   : > { %p2179_p8 = pnand %p1679_p5, %p141_p7  ;;  %s153_s25 = sshll.u32 %s2104_s24, 4  ;;  %s2183_s25 = int_to_ptr.vmem [resolvable:$true] %s153_s25 }
   0xe   : > { %s2105_s27 = smov [#allocation9]   ;;  %s1946_s5 = scalar_lea.hbm %s3034_s1, 576 }
   0xf   : > { %p1861_p9 = pneg %p2179_p8  ;;  %s166_s28 = sshll.u32 %s2105_s27, 4  ;;  %s2194_s28 = int_to_ptr.vmem [resolvable:$true] %s166_s28 }
  0x10   : > { %p1947_p12 = scmp.ne.s32.totalorder %s3034_s1, %s1946_s5  ;;  %p1953_p5 = scmp.lt.u32.totalorder %s1946_s5, %s3034_s1 }
  0x11   : > { %p2190_p11 = pnand %p1861_p9, %p3038_p1 }
  0x13   : > { %p1948_p13 = pneg %p2190_p11 }
  0x15   : > { %p1949_p0 = pnand %p1948_p13, %p1947_p12 }
  0x17   : > { %p1950_p3 = pneg %p1949_p0 }
  0x19   : > { %p1955_p7 = pnand %p1953_p5, %p1950_p3 }
  0x1b   : > { %1958 = shalt.err (!%p1955_p7)
}
  0x1c   : > { %s1959_s10 = scalar_lea.vmem %s2183_s25, 576  ;;  %p1967_p2 = scmp.lt.s32.totalorder %s2183_s25, %s2183_s25 }
  0x1d   : > { %p1960_p9 = scmp.ne.s32.totalorder %s2183_s25, %s1959_s10  ;;  %p1968_p12 = scmp.lt.s32.totalorder %s1959_s10, %s1959_s10 }
  0x1f   : > { %p1962_p10 = pnand %p1960_p9, %p1948_p13  ;;  %p1969_p0 = por %p1968_p12, %p1967_p2 }
  0x21   : > { %p1963_p1 = pneg %p1962_p10 }
  0x23   : > { %p1970_p6 = pnand %p1969_p0, %p1963_p1 }
  0x25   : > { %1973 = shalt.err (!%p1970_p6)
}
  0x26   : > { %s2106_s11 = smov 64   ;;  %s2107_s12 = smov 4  }
  0x27   : > { %1864 = dma.hbm_to_vmem [thread:$0]  (!%p2190_p11), %s3034_s1, 576, %s2183_s25, [#allocation8], %s2106_s11, %s2106_s11, %s2107_s12  }
  0x28   : > { %s1974_s27 = scalar_lea.hbm %s3035_s2, 3072 }
  0x29   : > { %p1975_p2 = scmp.ne.s32.totalorder %s3035_s2, %s1974_s27  ;;  %p1981_p10 = scmp.lt.u32.totalorder %s1974_s27, %s3035_s2 }
  0x2b   : > { %p1977_p1 = pnand %p1975_p2, %p1948_p13 }
  0x2d   : > { %p1978_p6 = pneg %p1977_p1 }
  0x2f   : > { %p1983_p3 = pnand %p1981_p10, %p1978_p6 }
  0x31   : > { %1986 = shalt.err (!%p1983_p3)
}
  0x32   : > { %s1987_s25 = scalar_lea.vmem %s2194_s28, 3072  ;;  %p1995_p12 = scmp.lt.s32.totalorder %s2194_s28, %s2194_s28 }
  0x33   : > { %p1988_p5 = scmp.ne.s32.totalorder %s2194_s28, %s1987_s25  ;;  %p1996_p0 = scmp.lt.s32.totalorder %s1987_s25, %s1987_s25 }
  0x35   : > { %p1990_p7 = pnand %p1988_p5, %p1948_p13  ;;  %p1997_p2 = por %p1996_p0, %p1995_p12 }
  0x37   : > { %p1991_p9 = pneg %p1990_p7 }
  0x39   : > { %p1998_p1 = pnand %p1997_p2, %p1991_p9 }
  0x3b   : > { %2001 = shalt.err (!%p1998_p1)
}
  0x3c   : > { %1867 = dma.hbm_to_vmem [thread:$0]  (!%p2190_p11), %s3035_s2, 3072, %s2194_s28, [#allocation8], %s2106_s11, %s2106_s11, %s2107_s12  }
  0x3d   : > { %s2249_s9 = sadd.s32 1, %s2102_s18   ;;  %s28_s26 = sadd.s32 1, %s2098_s17 }
  0x3e   : > { %s25_s10 = ssub.s32 %s2102_s18, %s2249_s9  ;;  %p35_p13 = scmp.ne.s32.totalorder %s2098_s17, %s2094_s16 }
  0x3f   : > { %p26_p6 = scmp.eq.s32.totalorder %s25_s10, 0  ;;  %p36_p10 = scmp.eq.s32.totalorder %s2102_s18, 0 }
  0x40   : > { %p3045_p3 = scmp.eq.s32.totalorder %s2160_s19, 1  ;;  %p1878_p7 = scmp.lt.s32.totalorder %s2102_s18, 2 }
  0x41   : > { %s2265_s14 = scalar_select %p26_p6, %s2098_s17, %s28_s26  }
  0x42   : > { %p2259_p5 = por %p3045_p3, %p35_p13  ;;  %p37_p9 = por %p36_p10, %p35_p13 }
  0x43   : > { %s183_s20 = sand.u32 1, %s2098_s17   ;;  %s1723_s28 = sshll.u32 %s2102_s18, 10 }
  0x44   : > { %s3046_s13 = scalar_select %p2259_p5, 1, 0 }
  0x45   : > { %s1683_s24 = sshll.u32 %s183_s20, 6  ;;  %s2272_s27 = scalar_lea.hbm %s3033_s0, %s1723_s28 }
  0x46   : > { %s187_s29 = scalar_lea.vmem [#allocation4], %s1683_s24  ;;  %p2276_p11 = pnand %p1878_p7, %p37_p9 }
  0x47   : > { %s194_s30 = sshll.u32 %s187_s29, 4  ;;  %s2280_s6 = scalar_lea.sflag [#allocation5], %s183_s20  ;;  %s2274_s30 = int_to_ptr.vmem [resolvable:$true] %s194_s30 }
  0x48   : > { %s2002_s25 = scalar_lea.hbm %s2272_s27, 1024  ;;  %p2004_p0 = pneg %p2276_p11 }
  0x49   : > { %p2003_p12 = scmp.ne.s32.totalorder %s2272_s27, %s2002_s25  ;;  %s2007_s26 = scalar_lea.hbm %s3033_s0, 2048 }
  0x4a   : > { %p2008_p13 = scmp.lt.u32.totalorder %s2272_s27, %s3033_s0  ;;  %p2009_p6 = scmp.lt.u32.totalorder %s2007_s26, %s2002_s25 }
  0x4b   : > { %p2005_p2 = pnand %p2004_p0, %p2003_p12  ;;  %p2011_p3 = scmp.lt.u32.totalorder %s2002_s25, %s2272_s27 }
  0x4c   : > { %p2010_p10 = por %p2009_p6, %p2008_p13 }
  0x4d   : > { %p2006_p1 = pneg %p2005_p2 }
  0x4e   : > { %p2012_p7 = por %p2011_p3, %p2010_p10 }
  0x50   : > { %p2013_p9 = pnand %p2012_p7, %p2006_p1 }
  0x52   : > { %2016 = shalt.err (!%p2013_p9)
}
  0x53   : > { %s2017_s20 = scalar_lea.vmem %s2274_s30, 1024  ;;  %s2108_s28 = smov [#allocation4]  }
  0x54   : > { %p2018_p12 = scmp.ne.s32.totalorder %s2274_s30, %s2017_s20  ;;  %s2022_s11 = sshll.u32 %s2108_s28, 4  ;;  %s2023_s11 = int_to_ptr.vmem [resolvable:$false] %s2022_s11 }
  0x55   : > { %s2024_s12 = scalar_lea.vmem %s2023_s11, 2048  ;;  %p2025_p4 = scmp.lt.s32.totalorder %s2274_s30, %s2023_s11 }
  0x56   : > { %p2020_p2 = pnand %p2018_p12, %p2004_p0  ;;  %p2026_p13 = scmp.lt.s32.totalorder %s2024_s12, %s2017_s20 }
  0x58   : > { %p2021_p5 = pneg %p2020_p2  ;;  %p2027_p6 = por %p2026_p13, %p2025_p4 }
  0x5a   : > { %p2028_p10 = pnand %p2027_p6, %p2021_p5 }
  0x5c   : > { %2031 = shalt.err (!%p2028_p10)
}
  0x5d   : > { %s2109_s29 = smov 128   ;;  %s2110_s25 = smov 8  }
  0x5e   : > { %1871 = dma.hbm_to_vmem [thread:$0]  (!%p2276_p11), %s2272_s27, 1024, %s2274_s30, %s2280_s6, %s2109_s29, %s2109_s29, %s2110_s25  }
  0x5f   : > { %206 = sbr.rel (%p2179_p8) target bundleno = 901 (0x385), region = 36  ;;  %s2311_s7 = sand.u32 (!%p2179_p8), 1, %s2094_s16  }
  0x60   : > { %s1687_s8 = sshll.u32 (!%p2179_p8), %s2311_s7, 6  ;;  %s209_s26 = scalar_lea.sflag (!%p2179_p8), [#allocation5], %s2311_s7 }
  0x61   : > { %s2317_s10 = scalar_lea.vmem (!%p2179_p8), [#allocation4], %s1687_s8  ;;  %p3048_p4 = scmp.ne.s32.totalorder (!%p2179_p8), %s3041_s21, 0 }
  0x66   : > { %2077 = dma.done.wait (%p3048_p4), %s209_s26, 1024  }
  0x67   : > { %2079 = vsyncadd (%p3048_p4), %s209_s26, 4294966272  ;;  %p3049_p5 = scmp.eq.s32.totalorder %s2160_s19, 0 }
  0x69   : > { %2081 = dma.done.wait (%p3049_p5), [#allocation8], 3648   ;;  %p3050_p8 = pmov %p3049_p5 }
  0x6a   : > { %v246_v0 = vlaneseq  ;;  %v1922_v1 = vld [vmem:[#allocation9] sm:$0xff]   ;;  %v1923_v2 = vld [vmem:[#allocation9 + $0x8] sm:$0xff]   ;;  %v1924_v4 = vld [vmem:[#allocation9 + $0x10] sm:$0xff]   ;;  %vm511_vm0 = vcmask 1040384   ;;  %vm544_vm1 = vcmask 1046528   ;;  %s244_s24 = scalar_lea.vmem [#allocation10], %s1687_s8 }
  0x6b   : > { %2083 = vsyncadd (%p3050_p8), [#allocation8], 4294963648  ;;  %1761 = vmatprep.subr.bf16.mxu0 %v1922_v1  ;;  %v1925_v7 = vld [vmem:[#allocation9 + $0x18] sm:$0xff]   ;;  %v250_v10 = vld [vmem:[#allocation7 + $0x4] sm:$0x7]  ;;  %s1586_s20 = sshll.u32 %s244_s24, 4  ;;  %s2984_s20 = int_to_ptr.vmem [resolvable:$true] %s1586_s20 }
  0x6c   : > { %v2327_v3 = vshrl.u32 %v246_v0, 7  ;;  %1762 = vmatpush3.bf16.msra.mxu0 %v1922_v1  ;;  %v249_v9 = vld [vmem:[#allocation7] sm:$0x7]  ;;  %v251_v11 = vld [vmem:[#allocation7 + $0x8] sm:$0x7]  ;;  %v266_v14 = vld [vmem:[%s2317_s10 + $0x10] sm:$0xff] }
  0x6d   : > { %1763 = vmatprep.subr.bf16.mxu0 %v1923_v2  ;;  %v264_v12 = vld [vmem:[%s2317_s10] sm:$0xff]  ;;  %v265_v13 = vld [vmem:[%s2317_s10 + $0x8] sm:$0xff]  ;;  %v2355_v21 = vmax.f32 %v266_v14, 0.0  ;;  %v267_v32 = vld [vmem:[%s2317_s10 + $0x18] sm:$0xff]  ;;  %s1724_s28 = sshll.u32 %s2160_s19, 10  ;;  %s1573_s19 = scalar_lea.sflag [#allocation6], %s2311_s7 }
  0x6e   : > { %v2330_v5 = vsub.s32 0, %v2327_v3  ;;  %v2333_v6 = vsub.s32 1, %v2327_v3  ;;  %v2336_v8 = vsub.s32 2, %v2327_v3  ;;  %v272_v19 = vmax.f32 %v264_v12, 0.0  ;;  %v1926_v23 = vld [vmem:[#allocation9 + $0x20] sm:$0xff]   ;;  %v1931_v39 = vld [vmem:[#allocation9 + $0x48] sm:$0xff]   ;;  %s2989_s29 = scalar_lea.hbm %s3037_s4, %s1724_s28 }
  0x6f   : > { %v2353_v20 = vmax.f32 %v265_v13, 0.0  ;;  %v268_v33 = vld [vmem:[%s2317_s10 + $0x20] sm:$0xff]  ;;  %v1927_v44 = vld [vmem:[#allocation9 + $0x28] sm:$0xff]   ;;  %vm248_vm2 = vcmp.lt.s32.totalorder %v2327_v3, 7  ;;  %v2395_v55 = vmax.f32 %v267_v32, 0.0  ;;  %v1928_v57 = vld [vmem:[#allocation9 + $0x30] sm:$0xff]  }
  0x70   : > { %1764 = vmatpush3.bf16.msra.mxu0 %v1923_v2  ;;  %v2342_v15 = vrot.slane %v249_v9, %v2330_v5  ;;  %v2345_v16 = vrot.slane %v250_v10, %v2330_v5  ;;  %v2348_v17 = vrot.slane %v251_v11, %v2330_v5  ;;  %v2351_v18 = vrot.slane %v249_v9, %v2333_v6  ;;  %v1930_v34 = vld [vmem:[#allocation9 + $0x40] sm:$0xff]   ;;  %s2032_s25 = scalar_lea.vmem %s2984_s20, 1024  ;;  %p3051_p0 = scmp.ne.s32.totalorder %s3046_s13, 0 }
  0x71   : > { %1765 = vmatprep.subr.bf16.mxu0 %v1924_v4  ;;  %v2358_v22 = vrot.slane %v250_v10, %v2333_v6  ;;  %v2363_v26 = vrot.slane %v251_v11, %v2333_v6  ;;  %v2366_v27 = vrot.slane %v249_v9, %v2336_v8  ;;  %1785 = vmatprep.subr.bf16.mxu1 %v1930_v34  ;;  %v2397_v56 = vmax.f32 %v268_v33, 0.0  ;;  %p2033_p11 = scmp.ne.s32.totalorder %s2984_s20, %s2032_s25  ;;  %s2111_s8 = smov [#allocation10]  }
  0x72   : > { %v335_v24 = vmul.f32 0.0, %v2342_v15  ;;  %v387_v25 = vmul.f32 0.0, %v2351_v18  ;;  %v336_v28 = vmul.f32 %v2342_v15, %v272_v19  ;;  %v347_v29 = vmul.f32 %v2345_v16, %v272_v19  ;;  %1786 = vmatpush3.bf16.msra.mxu1 %v1930_v34  ;;  %s2036_s26 = sshll.u32 %s2111_s8, 4  ;;  %s2037_s26 = int_to_ptr.vmem [resolvable:$false] %s2036_s26 }
  0x73   : > { %v348_v30 = vmul.f32 %v2345_v16, %v2353_v20  ;;  %v367_v31 = vmul.f32 %v2348_v17, %v2353_v20  ;;  %v368_v35 = vmul.f32 %v2348_v17, %v2355_v21  ;;  %v388_v36 = vmul.f32 %v2351_v18, %v272_v19  ;;  %1787 = vmatprep.subr.bf16.mxu1 %v1931_v39  ;;  %p2034_p1 = pnand %p2033_p11, %p3051_p0  ;;  %p2039_p7 = scmp.lt.s32.totalorder %s2984_s20, %s2037_s26 }
  0x74   : > { %1766 = vmatpush3.bf16.msra.mxu0 %v1924_v4  ;;  %v399_v37 = vmul.f32 %v2358_v22, %v272_v19  ;;  %v400_v38 = vmul.f32 %v2358_v22, %v2353_v20  ;;  %v355_v40 = vadd.f32 %v347_v29, %v335_v24  ;;  %v419_v42 = vmul.f32 %v2363_v26, %v2353_v20 }
  0x75   : > { %1767 = vmatprep.subr.bf16.mxu0 %v1925_v7  ;;  %v356_v41 = vadd.f32 %v348_v30, %v336_v28  ;;  %v420_v43 = vmul.f32 %v2363_v26, %v2355_v21  ;;  %v439_v47 = vmul.f32 0.0, %v2366_v27  ;;  %v440_v48 = vmul.f32 %v2366_v27, %v272_v19  ;;  %p2035_p3 = pneg %p2034_p1 }
  0x76   : > { %v407_v45 = vadd.f32 %v399_v37, %v387_v25  ;;  %v408_v46 = vadd.f32 %v400_v38, %v388_v36  ;;  %v375_v49 = vadd.f32 %v367_v31, %v355_v40  ;;  %v2390_v51 = vrot.slane %v250_v10, %v2336_v8  ;;  %1788 = vmatpush3.bf16.msra.mxu1 %v1931_v39  ;;  %v1929_v31 = vld [vmem:[#allocation9 + $0x38] sm:$0xff]  }
  0x77   : > { %v376_v50 = vadd.f32 %v368_v35, %v356_v41  ;;  %v2393_v52 = vrot.slane %v251_v11, %v2336_v8  ;;  %v337_v0 = vmul.f32 %v2342_v15, %v2353_v20  ;;  %v338_v1 = vmul.f32 %v2342_v15, %v2355_v21 }
  0x78   : > { %1768 = vmatpush3.bf16.msra.mxu0 %v1925_v7  ;;  %v427_v53 = vadd.f32 %v419_v42, %v407_v45  ;;  %v428_v54 = vadd.f32 %v420_v43, %v408_v46  ;;  %v451_v58 = vmul.f32 %v2390_v51, %v272_v19  ;;  %v452_v59 = vmul.f32 %v2390_v51, %v2353_v20 }
  0x79   : > { %1769 = vmatprep.subr.bf16.mxu0 %v1926_v23  ;;  %v471_v60 = vmul.f32 %v2393_v52, %v2353_v20  ;;  %v472_v61 = vmul.f32 %v2393_v52, %v2355_v21  ;;  %v495_v62 = vrot.slane %v375_v49, 7  ;;  %v496_v63 = vrot.slane %v376_v50, 7 }
  0x7a   : > { %v459_v2 = vadd.f32 %v451_v58, %v439_v47  ;;  %v460_v4 = vadd.f32 %v452_v59, %v440_v48  ;;  %v349_v7 = vmul.f32 %v2345_v16, %v2355_v21  ;;  %v350_v9 = vmul.f32 %v2345_v16, %v2395_v55  ;;  %v269_v48 = vld [vmem:[%s2317_s10 + $0x28] sm:$0xff]  ;;  %v270_v58 = vld [vmem:[%s2317_s10 + $0x30] sm:$0xff] }
  0x7b   : > { %v512_v10 = vsel %vm511_vm0, 0.0, %v495_v62  ;;  %v513_v11 = vsel %vm511_vm0, 0.0, %v496_v63  ;;  %v369_v12 = vmul.f32 %v2348_v17, %v2395_v55  ;;  %v370_v13 = vmul.f32 %v2348_v17, %v2397_v56 }
  0x7c   : > { %1770 = vmatpush3.bf16.msra.mxu0 %v1926_v23  ;;  %v479_v14 = vadd.f32 %v471_v60, %v459_v2  ;;  %v480_v19 = vadd.f32 %v472_v61, %v460_v4  ;;  %v563_v23 = vadd.f32 %v512_v10, %v427_v53  ;;  %v564_v24 = vadd.f32 %v513_v11, %v428_v54 }
  0x7d   : > { %1771 = vmatprep.subr.bf16.mxu0 %v1927_v44  ;;  %v357_v25 = vadd.f32 %v349_v7, %v337_v0  ;;  %v358_v28 = vadd.f32 %v350_v9, %v338_v1  ;;  %v389_v29 = vmul.f32 %v2351_v18, %v2353_v20  ;;  %v390_v30 = vmul.f32 %v2351_v18, %v2355_v21 }
  0x7e   : > { %v528_v32 = vrot.slane %v479_v14, 1  ;;  %v529_v33 = vrot.slane %v480_v19, 1  ;;  %v401_v34 = vmul.f32 %v2358_v22, %v2355_v21  ;;  %v402_v35 = vmul.f32 %v2358_v22, %v2395_v55 }
  0x7f   : > { %v377_v36 = vadd.f32 %v369_v12, %v357_v25  ;;  %v378_v37 = vadd.f32 %v370_v13, %v358_v28  ;;  %v421_v38 = vmul.f32 %v2363_v26, %v2395_v55  ;;  %v422_v39 = vmul.f32 %v2363_v26, %v2397_v56 }
  0x80   : > { %1772 = vmatpush3.bf16.msra.mxu0 %v1927_v44  ;;  %v545_v40 = vsel %vm544_vm1, %v528_v32, 0.0  ;;  %v546_v41 = vsel %vm544_vm1, %v529_v33, 0.0  ;;  %v409_v42 = vadd.f32 %v401_v34, %v389_v29  ;;  %v410_v43 = vadd.f32 %v402_v35, %v390_v30 }
  0x81   : > { %1773 = vmatprep.subr.bf16.mxu0 %v1928_v57  ;;  %v555_v44 = vsel %vm248_vm2, %v545_v40, 0.0  ;;  %v556_v45 = vsel %vm248_vm2, %v546_v41, 0.0  ;;  %v441_v46 = vmul.f32 %v2366_v27, %v2353_v20  ;;  %v442_v47 = vmul.f32 %v2366_v27, %v2355_v21 }
  0x82   : > { %v571_v49 = vadd.f32 %v563_v23, %v555_v44  ;;  %v572_v50 = vadd.f32 %v564_v24, %v556_v45  ;;  %v429_v53 = vadd.f32 %v421_v38, %v409_v42  ;;  %v430_v54 = vadd.f32 %v422_v39, %v410_v43 }
  0x83   : > { %v454_v59 = vmul.f32 %v2390_v51, %v2395_v55  ;;  %v473_v60 = vmul.f32 %v2393_v52, %v2395_v55  ;;  %v474_v20 = vmul.f32 %v2393_v52, %v2397_v56  ;;  %v497_v62 = vrot.slane %v377_v36, 7 }
  0x84   : > { %1774 = vmatpush3.bf16.msra.mxu0 %v1928_v57  ;;  %v453_v57 = vmul.f32 %v2390_v51, %v2355_v21  ;;  %v579_v61 = vpack.c.bf16 %v572_v50, %v571_v49  ;;  %v498_v63 = vrot.slane %v378_v37, 7  ;;  %v2452_v0 = vmax.f32 %v269_v48, 0.0 }
  0x85   : > { %1775 = vmatprep.subr.bf16.mxu0 %v1929_v31  ;;  %v462_v2 = vadd.f32 %v454_v59, %v442_v47  ;;  %v2454_v4 = vmax.f32 %v270_v58, 0.0  ;;  %v339_v21 = vmul.f32 %v2342_v15, %v2395_v55  ;;  %v514_v7 = vsel %vm511_vm0, 0.0, %v497_v62  ;;  %v271_v58 = vld [vmem:[%s2317_s10 + $0x38] sm:$0xff] }
  0x86   : > { %v461_v1 = vadd.f32 %v453_v57, %v441_v46  ;;  %1777 = vmatprep.mubr.bf16.mxu0 %v579_v61  ;;  %v515_v9 = vsel %vm511_vm0, 0.0, %v498_v63  ;;  %v340_v10 = vmul.f32 %v2342_v15, %v2397_v56  ;;  %v351_v11 = vmul.f32 %v2345_v16, %v2397_v56 }
  0x87   : > { %v482_v13 = vadd.f32 %v474_v20, %v462_v2  ;;  %v565_v14 = vadd.f32 %v514_v7, %v429_v53  ;;  %v566_v19 = vadd.f32 %v515_v9, %v430_v54  ;;  %v352_v23 = vmul.f32 %v2345_v16, %v2452_v0 }
  0x88   : > { %1776 = vmatpush3.bf16.msra.mxu0 %v1929_v31  ;;  %v481_v12 = vadd.f32 %v473_v60, %v461_v1  ;;  %v359_v24 = vadd.f32 %v351_v11, %v339_v21  ;;  %v371_v25 = vmul.f32 %v2348_v17, %v2452_v0  ;;  %v372_v28 = vmul.f32 %v2348_v17, %v2454_v4 }
  0x89   : > { %v531_v30 = vrot.slane %v482_v13, 1  ;;  %v391_v31 = vmul.f32 %v2351_v18, %v2395_v55  ;;  %v392_v32 = vmul.f32 %v2351_v18, %v2397_v56  ;;  %v360_v33 = vadd.f32 %v352_v23, %v340_v10 }
  0x8a   : > { %v530_v29 = vrot.slane %v481_v12, 1  ;;  %v379_v34 = vadd.f32 %v371_v25, %v359_v24  ;;  %v403_v35 = vmul.f32 %v2358_v22, %v2397_v56  ;;  %v404_v36 = vmul.f32 %v2358_v22, %v2452_v0 }
  0x8b   : > { %v548_v38 = vsel %vm544_vm1, %v531_v30, 0.0  ;;  %v423_v39 = vmul.f32 %v2363_v26, %v2452_v0  ;;  %v424_v40 = vmul.f32 %v2363_v26, %v2454_v4  ;;  %v380_v43 = vadd.f32 %v372_v28, %v360_v33 }
  0x8c   : > { %v547_v37 = vsel %vm544_vm1, %v530_v29, 0.0  ;;  %v558_v42 = vsel %vm248_vm2, %v548_v38, 0.0  ;;  %v411_v44 = vadd.f32 %v403_v35, %v391_v31  ;;  %v412_v47 = vadd.f32 %v404_v36, %v392_v32 }
  0x8d   : > { %v557_v41 = vsel %vm248_vm2, %v547_v37, 0.0  ;;  %v574_v46 = vadd.f32 %v566_v19, %v558_v42  ;;  %v443_v48 = vmul.f32 %v2366_v27, %v2395_v55  ;;  %v444_v50 = vmul.f32 %v2366_v27, %v2397_v56 }
  0x8e   : > { %v573_v45 = vadd.f32 %v565_v14, %v557_v41  ;;  %v431_v49 = vadd.f32 %v423_v39, %v411_v44  ;;  %v455_v53 = vmul.f32 %v2390_v51, %v2397_v56  ;;  %v456_v54 = vmul.f32 %v2390_v51, %v2452_v0 }
  0x8f   : > { %v432_v59 = vadd.f32 %v424_v40, %v412_v47  ;;  %v475_v60 = vmul.f32 %v2393_v52, %v2452_v0  ;;  %v476_v20 = vmul.f32 %v2393_v52, %v2454_v4  ;;  %v499_v62 = vrot.slane %v379_v34, 7 }
  0x90   : > { %v580_v57 = vpack.c.bf16 %v574_v46, %v573_v45  ;;  %v463_v55 = vadd.f32 %v455_v53, %v443_v48  ;;  %v464_v61 = vadd.f32 %v456_v54, %v444_v50  ;;  %v500_v63 = vrot.slane %v380_v43, 7 }
  0x91   : > { %v279_v1 = vmax.f32 %v271_v58, 0.0  ;;  %v341_v56 = vmul.f32 %v2342_v15, %v2452_v0  ;;  %v342_v2 = vmul.f32 %v2342_v15, %v2454_v4  ;;  %v353_v21 = vmul.f32 %v2345_v16, %v2454_v4 }
  0x92   : > { %1778 = vmatmul.mubr.bf16.vlgmr.msra.gmra.mrb[0].mxu0 %v580_v57  ;;  %v483_v7 = vadd.f32 %v475_v60, %v463_v55  ;;  %v484_v9 = vadd.f32 %v476_v20, %v464_v61  ;;  %v516_v10 = vsel %vm511_vm0, 0.0, %v499_v62  ;;  %v517_v11 = vsel %vm511_vm0, 0.0, %v500_v63 }
  0x93   : > { %v567_v12 = vadd.f32 %v516_v10, %v431_v49  ;;  %v568_v13 = vadd.f32 %v517_v11, %v432_v59  ;;  %v354_v14 = vmul.f32 %v2345_v16, %v279_v1  ;;  %v361_v19 = vadd.f32 %v353_v21, %v341_v56  ;;  %v1932_v56 = vld [vmem:[#allocation9 + $0x50] sm:$0xff]   ;;  %v1934_v21 = vld [vmem:[#allocation9 + $0x60] sm:$0xff]   ;;  %v1937_v10 = vld [vmem:[#allocation9 + $0x78] sm:$0xff]  }
  0x94   : > { %v532_v23 = vrot.slane %v483_v7, 1  ;;  %v533_v24 = vrot.slane %v484_v9, 1  ;;  %v373_v25 = vmul.f32 %v2348_v17, %v279_v1  ;;  %v374_v15 = vmul.f32 0.0, %v2348_v17  ;;  %1789 = vmatprep.subr.bf16.mxu1 %v1932_v56  ;;  %v1935_v7 = vld [vmem:[#allocation9 + $0x68] sm:$0xff]   ;;  %v1936_v9 = vld [vmem:[#allocation9 + $0x70] sm:$0xff]   ;;  %v2544_v11 = vld [vmem:[#allocation9 + $0x80] sm:$0xff]  }
  0x95   : > { %v362_v28 = vadd.f32 %v354_v14, %v342_v2  ;;  %v393_v29 = vmul.f32 %v2351_v18, %v2452_v0  ;;  %v394_v30 = vmul.f32 %v2351_v18, %v2454_v4  ;;  %v405_v31 = vmul.f32 %v2358_v22, %v2454_v4  ;;  %v1933_v2 = vld [vmem:[#allocation9 + $0x58] sm:$0xff]   ;;  %1790 = vmatpush3.bf16.msra.mxu1 %v1932_v56 }
  0x96   : > { %v549_v32 = vsel %vm544_vm1, %v532_v23, 0.0  ;;  %v550_v16 = vsel %vm544_vm1, %v533_v24, 0.0  ;;  %v381_v33 = vadd.f32 %v373_v25, %v361_v19  ;;  %v406_v34 = vmul.f32 %v2358_v22, %v279_v1  ;;  %1791 = vmatprep.subr.bf16.mxu1 %v1933_v2  ;;  %1809 = vmatprep.subr.bf16.mxu0 %v2544_v11  ;;  %v2556_v14 = vld [vmem:[%s3036_s3] ss:$0 sm:$0xff]  ;;  %v254_v19 = vld [vmem:[#allocation7 + $0x14] sm:$0x7] }
  0x97   : > { %v559_v17 = vsel %vm248_vm2, %v549_v32, 0.0  ;;  %v560_v35 = vsel %vm248_vm2, %v550_v16, 0.0  ;;  %v382_v36 = vadd.f32 %v374_v15, %v362_v28  ;;  %v413_v37 = vadd.f32 %v405_v31, %v393_v29  ;;  %1810 = vmatpush3.bf16.msra.mxu0 %v2544_v11  ;;  %v253_v23 = vld [vmem:[#allocation7 + $0x10] sm:$0x7] }
  0x98   : > { %v575_v38 = vadd.f32 %v567_v12, %v559_v17  ;;  %v576_v18 = vadd.f32 %v568_v13, %v560_v35  ;;  %v414_v39 = vadd.f32 %v406_v34, %v394_v30  ;;  %v425_v40 = vmul.f32 %v2363_v26, %v279_v1  ;;  %v2546_v12 = vld [vmem:[#allocation9 + $0x88] sm:$0xff]  }
  0x99   : > { %v426_v41 = vmul.f32 0.0, %v2363_v26  ;;  %v445_v42 = vmul.f32 %v2366_v27, %v2452_v0  ;;  %v446_v22 = vmul.f32 %v2366_v27, %v2454_v4  ;;  %v457_v43 = vmul.f32 %v2390_v51, %v2454_v4  ;;  %1792 = vmatpush3.bf16.msra.mxu1 %v1933_v2  ;;  %1811 = vmatprep.subr.bf16.mxu0 %v2546_v12  ;;  %v252_v13 = vld [vmem:[#allocation7 + $0xc] sm:$0x7] }
  0x9a   : > { %v581_v44 = vpack.c.bf16 %v576_v18, %v575_v38  ;;  %v458_v45 = vmul.f32 %v2390_v51, %v279_v1  ;;  %v477_v46 = vmul.f32 %v2393_v52, %v279_v1  ;;  %v433_v47 = vadd.f32 %v425_v40, %v413_v37  ;;  %1793 = vmatprep.subr.bf16.mxu1 %v1934_v21 }
  0x9b   : > { %v465_v48 = vadd.f32 %v457_v43, %v445_v42  ;;  %v478_v49 = vmul.f32 0.0, %v2393_v52  ;;  %v501_v50 = vrot.slane %v381_v33, 7  ;;  %v434_v26 = vadd.f32 %v426_v41, %v414_v39  ;;  %1812 = vmatpush3.bf16.msra.mxu0 %v2546_v12 }
  0x9c   : > { %1781 = vmatprep.mubr.bf16.mxu0 %v581_v44  ;;  %v466_v53 = vadd.f32 %v458_v45, %v446_v22  ;;  %v502_v0 = vrot.slane %v382_v36, 7  ;;  %v2559_v24 = vrot.slane %v252_v13, %v2330_v5  ;;  %v2562_v15 = vrot.slane %v252_v13, %v2333_v6 }
  0x9d   : > { %v485_v54 = vadd.f32 %v477_v46, %v465_v48  ;;  %v518_v27 = vsel %vm511_vm0, 0.0, %v501_v50  ;;  %1794 = vmatpush3.bf16.msra.mxu1 %v1934_v21  ;;  %v2565_v28 = vrot.slane %v252_v13, %v2336_v8  ;;  %v2569_v31 = vrot.slane %v254_v19, %v2330_v5 }
  0x9e   : > { %v486_v58 = vadd.f32 %v478_v49, %v466_v53  ;;  %v519_v4 = vsel %vm511_vm0, 0.0, %v502_v0  ;;  %v569_v59 = vadd.f32 %v518_v27, %v433_v47  ;;  %1795 = vmatprep.subr.bf16.mxu1 %v1935_v7  ;;  %v2572_v32 = vrot.slane %v254_v19, %v2333_v6 }
  0x9f   : > { %v534_v57 = vrot.slane %v485_v54, 1  ;;  %v570_v60 = vadd.f32 %v519_v4, %v434_v26  ;;  %v2575_v16 = vrot.slane %v254_v19, %v2336_v8  ;;  %v2579_v17 = vrot.slane %v253_v23, %v2330_v5 }
  0xa0   : > { %v535_v51 = vrot.slane %v486_v58, 1  ;;  %v2582_v35 = vrot.slane %v253_v23, %v2333_v6  ;;  %v764_v18 = vmul.f32 0.0, %v2559_v24  ;;  %v2589_v39 = vrot.slane %v253_v23, %v2336_v8 }
  0xa1   : > { %v551_v20 = vsel %vm544_vm1, %v534_v57, 0.0  ;;  %1796 = vmatpush3.bf16.msra.mxu1 %v1935_v7  ;;  %v816_v42 = vmul.f32 0.0, %v2562_v15  ;;  %v868_v22 = vmul.f32 0.0, %v2565_v28 }
  0xa2   : > { %v552_v55 = vsel %vm544_vm1, %v535_v51, 0.0  ;;  %v561_v52 = vsel %vm248_vm2, %v551_v20, 0.0  ;;  %1797 = vmatprep.subr.bf16.mxu1 %v1936_v9 }
  0xa3   : > { %v562_v61 = vsel %vm248_vm2, %v552_v55, 0.0  ;;  %v577_v62 = vadd.f32 %v569_v59, %v561_v52 }
  0xa4   : > { %v578_v63 = vadd.f32 %v570_v60, %v562_v61 }
  0xa5   : > { %1798 = vmatpush3.bf16.msra.mxu1 %v1936_v9 }
  0xa6   : > { %v582_v1 = vpack.c.bf16 %v578_v63, %v577_v62  ;;  %1799 = vmatprep.subr.bf16.mxu1 %v1937_v10 }
  0xa8   : > { %1782 = vmatmul.mubr.bf16.gmra.mrb[4].mxu0 %v582_v1 }
  0xa9   : > { %1800 = vmatpush3.bf16.msra.mxu1 %v1937_v10 }
  0xaa   : > { %1833 = vmatprep.subr.bf16.mxu1 %v2544_v11 }
 0x165   : > { %v1779_v25 = vpop.f32.mrb[0].mxu0 }
 0x166   : > { %v678_v29 = vadd.f32 %v1779_v25, %v2556_v14  ;;  %v669_v30 = vpop.f32.mrb[1].mxu0 }
 0x167   : > { %v670_v33 = vadd.f32 %v2556_v14, %v669_v30  ;;  %v1780_v34 = vpop.f32.mrb[2].mxu0 }
 0x168   : > { %v2584_v36 = vmax.f32 %v678_v29, 0.0  ;;  %v681_v37 = vadd.f32 %v1780_v34, %v2556_v14  ;;  %v672_v38 = vpop.f32.mrb[3].mxu0 }
 0x169   : > { %v700_v40 = vmax.f32 %v670_v33, 0.0  ;;  %v673_v41 = vadd.f32 %v2556_v14, %v672_v38 }
 0x16a   : > { %v2594_v43 = vmax.f32 %v681_v37, 0.0  ;;  %v797_v44 = vmul.f32 %v2569_v31, %v2584_v36  ;;  %v849_v45 = vmul.f32 %v2572_v32, %v2584_v36  ;;  %v901_v46 = vmul.f32 %v2575_v16, %v2584_v36 }
 0x16b   : > { %v701_v47 = vmax.f32 %v673_v41, 0.0  ;;  %v765_v48 = vmul.f32 %v2559_v24, %v700_v40  ;;  %v776_v49 = vmul.f32 %v2579_v17, %v700_v40  ;;  %v817_v50 = vmul.f32 %v2562_v15, %v700_v40 }
 0x16c   : > { %v828_v26 = vmul.f32 %v2582_v35, %v700_v40  ;;  %v869_v53 = vmul.f32 %v2565_v28, %v700_v40  ;;  %v880_v0 = vmul.f32 %v2589_v39, %v700_v40  ;;  %v767_v54 = vmul.f32 %v2559_v24, %v2584_v36 }
 0x16d   : > { %v777_v27 = vmul.f32 %v2579_v17, %v701_v47  ;;  %v784_v58 = vadd.f32 %v776_v49, %v764_v18  ;;  %v796_v4 = vmul.f32 %v2569_v31, %v701_v47  ;;  %v829_v57 = vmul.f32 %v2582_v35, %v701_v47 }
 0x16e   : > { %v836_v59 = vadd.f32 %v828_v26, %v816_v42  ;;  %v848_v51 = vmul.f32 %v2572_v32, %v701_v47  ;;  %v881_v60 = vmul.f32 %v2589_v39, %v701_v47  ;;  %v888_v20 = vadd.f32 %v880_v0, %v868_v22 }
 0x16f   : > { %v785_v55 = vadd.f32 %v777_v27, %v765_v48  ;;  %v804_v52 = vadd.f32 %v796_v4, %v784_v58  ;;  %v837_v61 = vadd.f32 %v829_v57, %v817_v50  ;;  %v900_v62 = vmul.f32 %v2575_v16, %v701_v47 }
 0x170   : > { %v856_v63 = vadd.f32 %v848_v51, %v836_v59  ;;  %v889_v1 = vadd.f32 %v881_v60, %v869_v53  ;;  %v766_v56 = vmul.f32 %v2559_v24, %v701_v47  ;;  %v778_v2 = vmul.f32 %v2579_v17, %v2584_v36 }
 0x171   : > { %v805_v21 = vadd.f32 %v797_v44, %v785_v55  ;;  %v857_v7 = vadd.f32 %v849_v45, %v837_v61  ;;  %v908_v9 = vadd.f32 %v900_v62, %v888_v20  ;;  %v924_v10 = vrot.slane %v804_v52, 7 }
 0x172   : > { %v909_v13 = vadd.f32 %v901_v46, %v889_v1  ;;  %v779_v19 = vmul.f32 %v2579_v17, %v2594_v43  ;;  %v786_v23 = vadd.f32 %v778_v2, %v766_v56  ;;  %v798_v25 = vmul.f32 %v2569_v31, %v2594_v43 }
 0x173   : > { %v925_v29 = vrot.slane %v805_v21, 7  ;;  %v940_v30 = vsel %vm511_vm0, 0.0, %v924_v10  ;;  %v956_v33 = vrot.slane %v908_v9, 1  ;;  %v818_v34 = vmul.f32 %v2562_v15, %v701_v47 }
 0x174   : > { %v957_v37 = vrot.slane %v909_v13, 1  ;;  %v988_v38 = vadd.f32 %v940_v30, %v856_v63  ;;  %v787_v18 = vadd.f32 %v779_v19, %v767_v54  ;;  %v806_v40 = vadd.f32 %v798_v25, %v786_v23 }
 0x175   : > { %v941_v41 = vsel %vm511_vm0, 0.0, %v925_v29  ;;  %v972_v42 = vsel %vm544_vm1, %v956_v33, 0.0  ;;  %v819_v22 = vmul.f32 %v2562_v15, %v2584_v36  ;;  %v830_v44 = vmul.f32 %v2582_v35, %v2584_v36 }
 0x176   : > { %v973_v45 = vsel %vm544_vm1, %v957_v37, 0.0  ;;  %v980_v46 = vsel %vm248_vm2, %v972_v42, 0.0  ;;  %v989_v48 = vadd.f32 %v941_v41, %v857_v7  ;;  %v831_v49 = vmul.f32 %v2582_v35, %v2594_v43 }
 0x177   : > { %v981_v50 = vsel %vm248_vm2, %v973_v45, 0.0  ;;  %v996_v26 = vadd.f32 %v988_v38, %v980_v46  ;;  %v838_v53 = vadd.f32 %v830_v44, %v818_v34  ;;  %v850_v0 = vmul.f32 %v2572_v32, %v2594_v43 }
 0x178   : > { %v997_v54 = vadd.f32 %v989_v48, %v981_v50  ;;  %v839_v27 = vadd.f32 %v831_v49, %v819_v22  ;;  %v870_v58 = vmul.f32 %v2565_v28, %v701_v47  ;;  %v871_v57 = vmul.f32 %v2565_v28, %v2584_v36 }
 0x179   : > { %v858_v4 = vadd.f32 %v850_v0, %v838_v53  ;;  %v882_v59 = vmul.f32 %v2589_v39, %v2584_v36  ;;  %v883_v51 = vmul.f32 %v2589_v39, %v2594_v43  ;;  %v926_v20 = vrot.slane %v806_v40, 7 }
 0x17a   : > { %v1004_v60 = vpack.c.bf16 %v997_v54, %v996_v26  ;;  %v902_v61 = vmul.f32 %v2575_v16, %v2594_v43  ;;  %v2653_v7 = vmul.f32 0.0, %v2569_v31  ;;  %v2656_v9 = vmul.f32 0.0, %v2572_v32 }
 0x17b   : > { %v890_v55 = vadd.f32 %v882_v59, %v870_v58  ;;  %v891_v52 = vadd.f32 %v883_v51, %v871_v57  ;;  %v1783_v62 = vpop.f32.mrb[4].mxu0  ;;  %v942_v47 = vsel %vm511_vm0, 0.0, %v926_v20  ;;  %v768_v25 = vmul.f32 %v2559_v24, %v2594_v43 }
 0x17c   : > { %1801 = vmatprep.mubr.bf16.mxu1 %v1004_v60  ;;  %v694_v63 = vadd.f32 %v1783_v62, %v2556_v14  ;;  %v685_v1 = vpop.f32.mrb[5].mxu0  ;;  %v990_v2 = vadd.f32 %v942_v47, %v858_v4  ;;  %v820_v33 = vmul.f32 %v2562_v15, %v2594_v43  ;;  %v872_v34 = vmul.f32 %v2565_v28, %v2594_v43 }
 0x17d   : > { %v910_v56 = vadd.f32 %v902_v61, %v890_v55  ;;  %v686_v36 = vadd.f32 %v2556_v14, %v685_v1  ;;  %v1784_v21 = vpop.f32.mrb[6].mxu0 }
 0x17e   : > { %v2658_v10 = vmax.f32 %v694_v63, 0.0  ;;  %v697_v13 = vadd.f32 %v1784_v21, %v2556_v14  ;;  %v688_v19 = vpop.f32.mrb[7].mxu0 }
 0x17f   : > { %v958_v23 = vrot.slane %v910_v56, 1  ;;  %v704_v29 = vmax.f32 %v686_v36, 0.0  ;;  %v689_v30 = vadd.f32 %v2556_v14, %v688_v19 }
 0x180   : > { %v2668_v37 = vmax.f32 %v697_v13, 0.0  ;;  %v801_v40 = vmul.f32 %v2569_v31, %v2658_v10  ;;  %v853_v41 = vmul.f32 %v2572_v32, %v2658_v10 }
 0x181   : > { %v974_v38 = vsel %vm544_vm1, %v958_v23, 0.0  ;;  %v2675_v42 = vmax.f32 %v689_v30, 0.0  ;;  %v799_v14 = vmul.f32 %v2569_v31, %v704_v29  ;;  %v851_v22 = vmul.f32 %v2572_v32, %v704_v29 }
 0x182   : > { %v903_v44 = vmul.f32 %v2575_v16, %v704_v29  ;;  %v982_v43 = vsel %vm248_vm2, %v974_v38, 0.0  ;;  %v769_v45 = vmul.f32 %v2559_v24, %v704_v29  ;;  %v780_v46 = vmul.f32 %v2579_v17, %v704_v29 }
 0x183   : > { %v821_v48 = vmul.f32 %v2562_v15, %v704_v29  ;;  %v807_v49 = vadd.f32 %v799_v14, %v787_v18  ;;  %v859_v50 = vadd.f32 %v851_v22, %v839_v27  ;;  %v998_v53 = vadd.f32 %v990_v2, %v982_v43 }
 0x184   : > { %v911_v26 = vadd.f32 %v903_v44, %v891_v52  ;;  %v781_v0 = vmul.f32 %v2579_v17, %v2675_v42  ;;  %v788_v54 = vadd.f32 %v780_v46, %v768_v25  ;;  %v800_v58 = vmul.f32 %v2569_v31, %v2675_v42 }
 0x185   : > { %v832_v4 = vmul.f32 %v2582_v35, %v704_v29  ;;  %v927_v57 = vrot.slane %v807_v49, 7  ;;  %v833_v51 = vmul.f32 %v2582_v35, %v2675_v42  ;;  %v852_v18 = vmul.f32 %v2572_v32, %v2675_v42 }
 0x186   : > { %v959_v59 = vrot.slane %v911_v26, 1  ;;  %v789_v27 = vadd.f32 %v781_v0, %v769_v45  ;;  %v808_v60 = vadd.f32 %v800_v58, %v788_v54  ;;  %v873_v55 = vmul.f32 %v2565_v28, %v704_v29 }
 0x187   : > { %v840_v20 = vadd.f32 %v832_v4, %v820_v33  ;;  %v943_v52 = vsel %vm511_vm0, 0.0, %v927_v57  ;;  %v841_v62 = vadd.f32 %v833_v51, %v821_v48  ;;  %v884_v47 = vmul.f32 %v2589_v39, %v704_v29 }
 0x188   : > { %v975_v61 = vsel %vm544_vm1, %v959_v59, 0.0  ;;  %v991_v1 = vadd.f32 %v943_v52, %v859_v50  ;;  %v809_v56 = vadd.f32 %v801_v40, %v789_v27  ;;  %v885_v21 = vmul.f32 %v2589_v39, %v2675_v42 }
 0x189   : > { %v983_v63 = vsel %vm248_vm2, %v975_v61, 0.0  ;;  %v860_v2 = vadd.f32 %v852_v18, %v840_v20  ;;  %v861_v36 = vadd.f32 %v853_v41, %v841_v62  ;;  %v892_v13 = vadd.f32 %v884_v47, %v872_v34 }
 0x18a   : > { %v904_v19 = vmul.f32 %v2575_v16, %v2675_v42  ;;  %v999_v23 = vadd.f32 %v991_v1, %v983_v63  ;;  %v905_v25 = vmul.f32 %v2575_v16, %v2658_v10  ;;  %v928_v30 = vrot.slane %v808_v60, 7 }
 0x18b   : > { %v929_v29 = vrot.slane %v809_v56, 7  ;;  %v893_v33 = vadd.f32 %v885_v21, %v873_v55  ;;  %v770_v40 = vmul.f32 %v2559_v24, %v2675_v42  ;;  %v771_v41 = vmul.f32 %v2559_v24, %v2658_v10 }
 0x18c   : > { %v912_v38 = vadd.f32 %v904_v19, %v892_v13  ;;  %v1005_v14 = vpack.c.bf16 %v999_v23, %v998_v53  ;;  %v944_v34 = vsel %vm511_vm0, 0.0, %v928_v30  ;;  %v782_v44 = vmul.f32 %v2579_v17, %v2658_v10 }
 0x18d   : > { %v945_v22 = vsel %vm511_vm0, 0.0, %v929_v29  ;;  %v913_v43 = vadd.f32 %v905_v25, %v893_v33  ;;  %v992_v46 = vadd.f32 %v944_v34, %v860_v2  ;;  %v783_v49 = vmul.f32 %v2579_v17, %v2668_v37  ;;  %v1940_v33 = vld [vmem:[#allocation9 + $0x90] sm:$0xff]   ;;  %v1945_v34 = vld [vmem:[#allocation9 + $0xb8] sm:$0xff]  }
 0x18e   : > { %v960_v45 = vrot.slane %v912_v38, 1  ;;  %v993_v48 = vadd.f32 %v945_v22, %v861_v36  ;;  %1802 = vmatmul.mubr.bf16.vlgmr.msra.gmra.mrb[0].mxu1 %v1005_v14  ;;  %v790_v50 = vadd.f32 %v782_v44, %v770_v40  ;;  %v802_v24 = vmul.f32 %v2569_v31, %v2668_v37  ;;  %v1941_v38 = vld [vmem:[#allocation9 + $0x98] sm:$0xff]   ;;  %1813 = vmatprep.subr.bf16.mxu0 %v1940_v33  ;;  %v1942_v40 = vld [vmem:[#allocation9 + $0xa0] sm:$0xff]   ;;  %v1944_v14 = vld [vmem:[#allocation9 + $0xb0] sm:$0xff]  }
 0x18f   : > { %v822_v26 = vmul.f32 %v2562_v15, %v2675_v42  ;;  %v961_v53 = vrot.slane %v913_v43, 1  ;;  %v823_v54 = vmul.f32 %v2562_v15, %v2658_v10  ;;  %v834_v58 = vmul.f32 %v2582_v35, %v2658_v10  ;;  %1841 = vmatpush3.bf16.msra.mxu1 %v2544_v11  ;;  %1814 = vmatpush3.bf16.msra.mxu0 %v1940_v33  ;;  %v255_v22 = vld [vmem:[#allocation7 + $0x18] sm:$0x7]  ;;  %v256_v44 = vld [vmem:[#allocation7 + $0x1c] sm:$0x7] }
 0x190   : > { %v976_v0 = vsel %vm544_vm1, %v960_v45, 0.0  ;;  %v791_v4 = vadd.f32 %v783_v49, %v771_v41  ;;  %v810_v57 = vadd.f32 %v802_v24, %v790_v50  ;;  %v835_v31 = vmul.f32 %v2582_v35, %v2668_v37  ;;  %1834 = vmatprep.subr.bf16.mxu1 %v2546_v12  ;;  %1815 = vmatprep.subr.bf16.mxu0 %v1941_v38  ;;  %v1943_v41 = vld [vmem:[#allocation9 + $0xa8] sm:$0xff]   ;;  %v257_v43 = vld [vmem:[#allocation7 + $0x20] sm:$0x7] }
 0x191   : > { %v984_v17 = vsel %vm248_vm2, %v976_v0, 0.0  ;;  %v977_v59 = vsel %vm544_vm1, %v961_v53, 0.0  ;;  %v842_v18 = vadd.f32 %v834_v58, %v822_v26  ;;  %v854_v15 = vmul.f32 %v2572_v32, %v2668_v37  ;;  %v2761_v45 = vld [vmem:[%s3036_s3 + $0x1] ss:$0 sm:$0xff] }
 0x192   : > { %v1000_v51 = vadd.f32 %v992_v46, %v984_v17  ;;  %v985_v11 = vsel %vm248_vm2, %v977_v59, 0.0  ;;  %v811_v27 = vadd.f32 %v2653_v7, %v791_v4  ;;  %v843_v60 = vadd.f32 %v835_v31, %v823_v54 }
 0x193   : > { %v874_v20 = vmul.f32 %v2565_v28, %v2675_v42  ;;  %v1001_v55 = vadd.f32 %v993_v48, %v985_v11  ;;  %v862_v35 = vadd.f32 %v854_v15, %v842_v18  ;;  %v886_v52 = vmul.f32 %v2589_v39, %v2658_v10  ;;  %1842 = vmatpush3.bf16.msra.mxu1 %v2546_v12 }
 0x194   : > { %v875_v61 = vmul.f32 %v2565_v28, %v2658_v10  ;;  %v887_v32 = vmul.f32 %v2589_v39, %v2668_v37  ;;  %v907_v62 = vmul.f32 0.0, %v2575_v16  ;;  %v930_v7 = vrot.slane %v810_v57, 7  ;;  %1835 = vmatprep.subr.bf16.mxu1 %v1940_v33  ;;  %1816 = vmatpush3.bf16.msra.mxu0 %v1941_v38 }
 0x195   : > { %v1006_v47 = vpack.c.bf16 %v1001_v55, %v1000_v51  ;;  %v894_v63 = vadd.f32 %v886_v52, %v874_v20  ;;  %v906_v42 = vmul.f32 %v2575_v16, %v2668_v37  ;;  %v931_v1 = vrot.slane %v811_v27, 7  ;;  %1817 = vmatprep.subr.bf16.mxu0 %v1942_v40 }
 0x196   : > { %v863_v56 = vadd.f32 %v2656_v9, %v843_v60  ;;  %v895_v2 = vadd.f32 %v887_v32, %v875_v61  ;;  %v946_v12 = vsel %vm511_vm0, 0.0, %v930_v7  ;;  %v2764_v46 = vrot.slane %v255_v22, %v2330_v5 }
 0x197   : > { %1805 = vmatprep.mubr.bf16.mxu1 %v1006_v47  ;;  %v914_v36 = vadd.f32 %v906_v42, %v894_v63  ;;  %v947_v28 = vsel %vm511_vm0, 0.0, %v931_v1  ;;  %v994_v10 = vadd.f32 %v946_v12, %v862_v35  ;;  %1843 = vmatpush3.bf16.msra.mxu1 %v1940_v33  ;;  %v2767_v48 = vrot.slane %v255_v22, %v2333_v6 }
 0x198   : > { %v915_v39 = vadd.f32 %v907_v62, %v895_v2  ;;  %v995_v21 = vadd.f32 %v947_v28, %v863_v56  ;;  %1836 = vmatprep.subr.bf16.mxu1 %v1941_v38  ;;  %1818 = vmatpush3.bf16.msra.mxu0 %v1942_v40  ;;  %v2770_v49 = vrot.slane %v255_v22, %v2336_v8 }
 0x199   : > { %v962_v13 = vrot.slane %v914_v36, 1  ;;  %1819 = vmatprep.subr.bf16.mxu0 %v1943_v41  ;;  %v2773_v24 = vrot.slane %v256_v44, %v2330_v5  ;;  %v2776_v26 = vrot.slane %v257_v43, %v2330_v5  ;;  %v2780_v54 = vrot.slane %v256_v44, %v2333_v6 }
 0x19a   : > { %v963_v19 = vrot.slane %v915_v39, 1  ;;  %v2783_v58 = vrot.slane %v257_v43, %v2333_v6  ;;  %v2786_v17 = vrot.slane %v257_v43, %v2336_v8  ;;  %v2790_v31 = vrot.slane %v256_v44, %v2336_v8 }
 0x19b   : > { %v978_v23 = vsel %vm544_vm1, %v962_v13, 0.0  ;;  %1844 = vmatpush3.bf16.msra.mxu1 %v1941_v38  ;;  %v1187_v5 = vmul.f32 0.0, %v2764_v46  ;;  %v1239_v59 = vmul.f32 0.0, %v2767_v48  ;;  %v1291_v6 = vmul.f32 0.0, %v2770_v49 }
 0x19c   : > { %v979_v25 = vsel %vm544_vm1, %v963_v19, 0.0  ;;  %v986_v16 = vsel %vm248_vm2, %v978_v23, 0.0  ;;  %1837 = vmatprep.subr.bf16.mxu1 %v1942_v40  ;;  %1820 = vmatpush3.bf16.msra.mxu0 %v1943_v41  ;;  %v2799_v11 = vmul.f32 0.0, %v2776_v26  ;;  %v2803_v8 = vmul.f32 0.0, %v2783_v58 }
 0x19d   : > { %v987_v9 = vsel %vm248_vm2, %v979_v25, 0.0  ;;  %v1002_v37 = vadd.f32 %v994_v10, %v986_v16  ;;  %1821 = vmatprep.subr.bf16.mxu0 %v1944_v14  ;;  %v2806_v20 = vmul.f32 0.0, %v2786_v17 }
 0x19e   : > { %v1003_v30 = vadd.f32 %v995_v21, %v987_v9 }
 0x19f   : > { %1845 = vmatpush3.bf16.msra.mxu1 %v1942_v40 }
 0x1a0   : > { %v1007_v29 = vpack.c.bf16 %v1003_v30, %v1002_v37  ;;  %1838 = vmatprep.subr.bf16.mxu1 %v1943_v41  ;;  %1822 = vmatpush3.bf16.msra.mxu0 %v1944_v14 }
 0x1a1   : > { %1823 = vmatprep.subr.bf16.mxu0 %v1945_v34 }
 0x1a2   : > { %1806 = vmatmul.mubr.bf16.gmra.mrb[4].mxu1 %v1007_v29 }
 0x1a3   : > { %1846 = vmatpush3.bf16.msra.mxu1 %v1943_v41 }
 0x1a4   : > { %1839 = vmatprep.subr.bf16.mxu1 %v1944_v14  ;;  %1824 = vmatpush3.bf16.msra.mxu0 %v1945_v34 }
 0x1a7   : > { %1847 = vmatpush3.bf16.msra.mxu1 %v1944_v14 }
 0x1a8   : > { %1840 = vmatprep.subr.bf16.mxu1 %v1945_v34 }
 0x1ab   : > { %1848 = vmatpush3.bf16.msra.mxu1 %v1945_v34 }
 0x261   : > { %v1803_v50 = vpop.f32.mrb[0].mxu1 }
 0x262   : > { %v1103_v53 = vadd.f32 %v1803_v50, %v2761_v45  ;;  %v1094_v0 = vpop.f32.mrb[1].mxu1 }
 0x263   : > { %v1095_v4 = vadd.f32 %v2761_v45, %v1094_v0  ;;  %v1804_v57 = vpop.f32.mrb[2].mxu1 }
 0x264   : > { %v2794_v51 = vmax.f32 %v1103_v53, 0.0  ;;  %v1106_v18 = vadd.f32 %v1804_v57, %v2761_v45  ;;  %v1097_v15 = vpop.f32.mrb[3].mxu1 }
 0x265   : > { %v1125_v27 = vmax.f32 %v1095_v4, 0.0  ;;  %v1098_v60 = vadd.f32 %v2761_v45, %v1097_v15 }
 0x266   : > { %v2808_v55 = vmax.f32 %v1106_v18, 0.0  ;;  %v1220_v35 = vmul.f32 %v2776_v26, %v2794_v51  ;;  %v1272_v52 = vmul.f32 %v2783_v58, %v2794_v51  ;;  %v1324_v61 = vmul.f32 %v2786_v17, %v2794_v51 }
 0x267   : > { %v1126_v32 = vmax.f32 %v1098_v60, 0.0  ;;  %v1188_v62 = vmul.f32 %v2764_v46, %v1125_v27  ;;  %v1199_v7 = vmul.f32 %v2773_v24, %v1125_v27  ;;  %v1240_v47 = vmul.f32 %v2767_v48, %v1125_v27 }
 0x268   : > { %v1251_v63 = vmul.f32 %v2780_v54, %v1125_v27  ;;  %v1292_v42 = vmul.f32 %v2770_v49, %v1125_v27  ;;  %v1303_v1 = vmul.f32 %v2790_v31, %v1125_v27  ;;  %v1190_v56 = vmul.f32 %v2764_v46, %v2794_v51 }
 0x269   : > { %v1200_v2 = vmul.f32 %v2773_v24, %v1126_v32  ;;  %v1207_v12 = vadd.f32 %v1199_v7, %v1187_v5  ;;  %v1219_v36 = vmul.f32 %v2776_v26, %v1126_v32  ;;  %v1252_v28 = vmul.f32 %v2780_v54, %v1126_v32 }
 0x26a   : > { %v1259_v10 = vadd.f32 %v1251_v63, %v1239_v59  ;;  %v1271_v39 = vmul.f32 %v2783_v58, %v1126_v32  ;;  %v1304_v21 = vmul.f32 %v2790_v31, %v1126_v32  ;;  %v1311_v13 = vadd.f32 %v1303_v1, %v1291_v6 }
 0x26b   : > { %v1208_v19 = vadd.f32 %v1200_v2, %v1188_v62  ;;  %v1227_v23 = vadd.f32 %v1219_v36, %v1207_v12  ;;  %v1260_v25 = vadd.f32 %v1252_v28, %v1240_v47  ;;  %v1323_v16 = vmul.f32 %v2786_v17, %v1126_v32 }
 0x26c   : > { %v1279_v9 = vadd.f32 %v1271_v39, %v1259_v10  ;;  %v1312_v37 = vadd.f32 %v1304_v21, %v1292_v42  ;;  %v1189_v30 = vmul.f32 %v2764_v46, %v1126_v32  ;;  %v1201_v29 = vmul.f32 %v2773_v24, %v2794_v51 }
 0x26d   : > { %v1228_v33 = vadd.f32 %v1220_v35, %v1208_v19  ;;  %v1280_v38 = vadd.f32 %v1272_v52, %v1260_v25  ;;  %v1331_v40 = vadd.f32 %v1323_v16, %v1311_v13  ;;  %v1347_v41 = vrot.slane %v1227_v23, 7 }
 0x26e   : > { %v1332_v14 = vadd.f32 %v1324_v61, %v1312_v37  ;;  %v1202_v34 = vmul.f32 %v2773_v24, %v2808_v55  ;;  %v1209_v22 = vadd.f32 %v1201_v29, %v1189_v30  ;;  %v1221_v44 = vmul.f32 %v2776_v26, %v2808_v55 }
 0x26f   : > { %v1348_v43 = vrot.slane %v1228_v33, 7  ;;  %v1363_v50 = vsel %vm511_vm0, 0.0, %v1347_v41  ;;  %v1379_v53 = vrot.slane %v1331_v40, 1  ;;  %v1241_v0 = vmul.f32 %v2767_v48, %v1126_v32 }
 0x270   : > { %v1380_v4 = vrot.slane %v1332_v14, 1  ;;  %v1411_v57 = vadd.f32 %v1363_v50, %v1279_v9  ;;  %v1210_v5 = vadd.f32 %v1202_v34, %v1190_v56  ;;  %v1229_v59 = vadd.f32 %v1221_v44, %v1209_v22 }
 0x271   : > { %v1364_v18 = vsel %vm511_vm0, 0.0, %v1348_v43  ;;  %v1395_v15 = vsel %vm544_vm1, %v1379_v53, 0.0  ;;  %v1242_v6 = vmul.f32 %v2767_v48, %v2794_v51  ;;  %v1253_v27 = vmul.f32 %v2780_v54, %v2794_v51 }
 0x272   : > { %v1396_v60 = vsel %vm544_vm1, %v1380_v4, 0.0  ;;  %v1403_v35 = vsel %vm248_vm2, %v1395_v15, 0.0  ;;  %v1412_v52 = vadd.f32 %v1364_v18, %v1280_v38  ;;  %v1254_v61 = vmul.f32 %v2780_v54, %v2808_v55 }
 0x273   : > { %v1404_v62 = vsel %vm248_vm2, %v1396_v60, 0.0  ;;  %v1419_v7 = vadd.f32 %v1411_v57, %v1403_v35  ;;  %v1261_v47 = vadd.f32 %v1253_v27, %v1241_v0  ;;  %v1273_v63 = vmul.f32 %v2783_v58, %v2808_v55 }
 0x274   : > { %v1420_v42 = vadd.f32 %v1412_v52, %v1404_v62  ;;  %v1262_v1 = vadd.f32 %v1254_v61, %v1242_v6  ;;  %v1293_v56 = vmul.f32 %v2770_v49, %v1126_v32  ;;  %v1294_v2 = vmul.f32 %v2770_v49, %v2794_v51 }
 0x275   : > { %v1807_v12 = vpop.f32.mrb[4].mxu1  ;;  %v1281_v36 = vadd.f32 %v1273_v63, %v1261_v47  ;;  %v1305_v28 = vmul.f32 %v2790_v31, %v2794_v51  ;;  %v1306_v10 = vmul.f32 %v2790_v31, %v2808_v55  ;;  %v1325_v39 = vmul.f32 %v2786_v17, %v2808_v55 }
 0x276   : > { %v1119_v21 = vadd.f32 %v1807_v12, %v2761_v45  ;;  %v1110_v13 = vpop.f32.mrb[5].mxu1  ;;  %v1427_v19 = vpack.c.bf16 %v1420_v42, %v1419_v7  ;;  %v1349_v23 = vrot.slane %v1229_v59, 7  ;;  %v1191_v32 = vmul.f32 %v2764_v46, %v2808_v55 }
 0x277   : > { %v1111_v25 = vadd.f32 %v2761_v45, %v1110_v13  ;;  %v1808_v16 = vpop.f32.mrb[6].mxu1  ;;  %v1313_v9 = vadd.f32 %v1305_v28, %v1293_v56  ;;  %v1314_v37 = vadd.f32 %v1306_v10, %v1294_v2  ;;  %v1243_v51 = vmul.f32 %v2767_v48, %v2808_v55 }
 0x278   : > { %v2869_v30 = vmax.f32 %v1119_v21, 0.0  ;;  %v1122_v29 = vadd.f32 %v1808_v16, %v2761_v45  ;;  %v1113_v33 = vpop.f32.mrb[7].mxu1  ;;  %1825 = vmatprep.mubr.bf16.mxu0 %v1427_v19  ;;  %v1365_v38 = vsel %vm511_vm0, 0.0, %v1349_v23  ;;  %v1295_v40 = vmul.f32 %v2770_v49, %v2808_v55 }
 0x279   : > { %v1129_v41 = vmax.f32 %v1111_v25, 0.0  ;;  %v1114_v14 = vadd.f32 %v2761_v45, %v1113_v33  ;;  %v1333_v34 = vadd.f32 %v1325_v39, %v1313_v9  ;;  %v1413_v22 = vadd.f32 %v1365_v38, %v1281_v36 }
 0x27a   : > { %v1132_v44 = vmax.f32 %v1122_v29, 0.0  ;;  %v1194_v43 = vmul.f32 %v2764_v46, %v2869_v30  ;;  %v1224_v50 = vmul.f32 %v2776_v26, %v2869_v30  ;;  %v1276_v53 = vmul.f32 %v2783_v58, %v2869_v30 }
 0x27b   : > { %v2882_v0 = vmax.f32 %v1114_v14, 0.0  ;;  %v1222_v4 = vmul.f32 %v2776_v26, %v1129_v41  ;;  %v1274_v55 = vmul.f32 %v2783_v58, %v1129_v41  ;;  %v1326_v45 = vmul.f32 %v2786_v17, %v1129_v41 }
 0x27c   : > { %v1206_v57 = vmul.f32 %v2773_v24, %v1132_v44  ;;  %v2889_v59 = vmul.f32 %v2776_v26, %v1132_v44  ;;  %v2892_v18 = vmul.f32 %v2780_v54, %v1132_v44  ;;  %v2895_v15 = vmul.f32 %v2783_v58, %v1132_v44 }
 0x27d   : > { %v2898_v6 = vmul.f32 %v2790_v31, %v1132_v44  ;;  %v2901_v27 = vmul.f32 %v2786_v17, %v1132_v44  ;;  %v1230_v60 = vadd.f32 %v1222_v4, %v1210_v5  ;;  %v1282_v35 = vadd.f32 %v1274_v55, %v1262_v1 }
 0x27e   : > { %v1214_v52 = vadd.f32 %v1206_v57, %v1194_v43  ;;  %v1334_v61 = vadd.f32 %v1326_v45, %v1314_v37  ;;  %v1381_v62 = vrot.slane %v1333_v34, 1  ;;  %v1192_v7 = vmul.f32 %v2764_v46, %v1129_v41 }
 0x27f   : > { %v1350_v47 = vrot.slane %v1230_v60, 7  ;;  %v1203_v63 = vmul.f32 %v2773_v24, %v1129_v41  ;;  %v1204_v42 = vmul.f32 %v2773_v24, %v2882_v0  ;;  %v1223_v56 = vmul.f32 %v2776_v26, %v2882_v0 }
 0x280   : > { %v1382_v2 = vrot.slane %v1334_v61, 1  ;;  %v1397_v12 = vsel %vm544_vm1, %v1381_v62, 0.0  ;;  %v1244_v5 = vmul.f32 %v2767_v48, %v1129_v41  ;;  %v1255_v1 = vmul.f32 %v2780_v54, %v1129_v41 }
 0x281   : > { %v1366_v36 = vsel %vm511_vm0, 0.0, %v1350_v47  ;;  %v1405_v28 = vsel %vm248_vm2, %v1397_v12, 0.0  ;;  %v1211_v10 = vadd.f32 %v1203_v63, %v1191_v32  ;;  %v1212_v39 = vadd.f32 %v1204_v42, %v1192_v7 }
 0x282   : > { %v1398_v21 = vsel %vm544_vm1, %v1382_v2, 0.0  ;;  %v1414_v13 = vadd.f32 %v1366_v36, %v1282_v35  ;;  %v1421_v19 = vadd.f32 %v1413_v22, %v1405_v28  ;;  %v1256_v26 = vmul.f32 %v2780_v54, %v2882_v0 }
 0x283   : > { %v1406_v23 = vsel %vm248_vm2, %v1398_v21, 0.0  ;;  %v1231_v25 = vadd.f32 %v1223_v56, %v1211_v10  ;;  %v1232_v16 = vadd.f32 %v1224_v50, %v1212_v39  ;;  %v1263_v9 = vadd.f32 %v1255_v1, %v1243_v51 }
 0x284   : > { %v1422_v37 = vadd.f32 %v1414_v13, %v1406_v23  ;;  %v1264_v29 = vadd.f32 %v1256_v26, %v1244_v5  ;;  %v1275_v33 = vmul.f32 %v2783_v58, %v2882_v0  ;;  %v1296_v32 = vmul.f32 %v2770_v49, %v1129_v41 }
 0x285   : > { %v1307_v38 = vmul.f32 %v2790_v31, %v1129_v41  ;;  %v1308_v14 = vmul.f32 %v2790_v31, %v2882_v0  ;;  %v1327_v34 = vmul.f32 %v2786_v17, %v2882_v0  ;;  %v1328_v22 = vmul.f32 %v2786_v17, %v2869_v30 }
 0x286   : > { %v1428_v44 = vpack.c.bf16 %v1422_v37, %v1421_v19  ;;  %v1283_v51 = vadd.f32 %v1275_v33, %v1263_v9  ;;  %v1284_v43 = vadd.f32 %v1276_v53, %v1264_v29  ;;  %v1351_v50 = vrot.slane %v1231_v25, 7  ;;  %v1709_v29 = vld [vmem:[%s3036_s3 + $0x2] ss:$0 sm:$0xff] }
 0x287   : > { %v1315_v4 = vadd.f32 %v1307_v38, %v1295_v40  ;;  %v1316_v55 = vadd.f32 %v1308_v14, %v1296_v32  ;;  %v1352_v58 = vrot.slane %v1232_v16, 7  ;;  %v1193_v45 = vmul.f32 %v2764_v46, %v2882_v0  ;;  %v1550_v32 = vld [vmem:[%s2317_s10 + $0x10] sm:$0xff] }
 0x288   : > { %1826 = vmatmul.mubr.bf16.vlgmr.msra.gmra.mrb[8].mxu0 %v1428_v44  ;;  %v1367_v41 = vsel %vm511_vm0, 0.0, %v1351_v50  ;;  %v1205_v57 = vmul.f32 %v2773_v24, %v2869_v30  ;;  %v1234_v60 = vadd.f32 %v2799_v11, %v1214_v52  ;;  %v1245_v17 = vmul.f32 %v2767_v48, %v2882_v0 }
 0x289   : > { %v1335_v35 = vadd.f32 %v1327_v34, %v1315_v4  ;;  %v1336_v53 = vadd.f32 %v1328_v22, %v1316_v55  ;;  %v1368_v40 = vsel %vm511_vm0, 0.0, %v1352_v58  ;;  %v1415_v61 = vadd.f32 %v1367_v41, %v1283_v51  ;;  %v1548_v34 = vld [vmem:[%s2317_s10] sm:$0xff]  ;;  %v1551_v51 = vld [vmem:[%s2317_s10 + $0x18] sm:$0xff]  ;;  %v1549_v4 = vld [vmem:[%s2317_s10 + $0x8] sm:$0xff] }
 0x28a   : > { %v1416_v62 = vadd.f32 %v1368_v40, %v1284_v43  ;;  %v1213_v7 = vadd.f32 %v1205_v57, %v1193_v45  ;;  %v1246_v46 = vmul.f32 %v2767_v48, %v2869_v30  ;;  %v1257_v47 = vmul.f32 %v2780_v54, %v2869_v30 }
 0x28b   : > { %v1383_v63 = vrot.slane %v1335_v35, 1  ;;  %v1384_v24 = vrot.slane %v1336_v53, 1  ;;  %v1297_v11 = vmul.f32 %v2770_v49, %v2882_v0  ;;  %v1298_v52 = vmul.f32 %v2770_v49, %v2869_v30  ;;  %v1552_v53 = vld [vmem:[%s2317_s10 + $0x20] sm:$0xff] }
 0x28c   : > { %v1233_v42 = vadd.f32 %v2889_v59, %v1213_v7  ;;  %v1265_v56 = vadd.f32 %v1257_v47, %v1245_v17  ;;  %v1266_v2 = vadd.f32 %v2892_v18, %v1246_v46  ;;  %v1309_v12 = vmul.f32 %v2790_v31, %v2869_v30 }
 0x28d   : > { %v1399_v48 = vsel %vm544_vm1, %v1383_v63, 0.0  ;;  %v1400_v54 = vsel %vm544_vm1, %v1384_v24, 0.0  ;;  %v1318_v5 = vadd.f32 %v2898_v6, %v1298_v52  ;;  %v1354_v1 = vrot.slane %v1234_v60, 7  ;;  %v1554_v60 = vld [vmem:[%s2317_s10 + $0x30] sm:$0xff]  ;;  %v1553_v63 = vld [vmem:[%s2317_s10 + $0x28] sm:$0xff] }
 0x28e   : > { %v1407_v0 = vsel %vm248_vm2, %v1399_v48, 0.0  ;;  %v1408_v49 = vsel %vm248_vm2, %v1400_v54, 0.0  ;;  %v1285_v59 = vadd.f32 %v2895_v15, %v1265_v56  ;;  %v1286_v18 = vadd.f32 %v2803_v8, %v1266_v2 }
 0x28f   : > { %v1423_v36 = vadd.f32 %v1415_v61, %v1407_v0  ;;  %v1424_v28 = vadd.f32 %v1416_v62, %v1408_v49  ;;  %v1317_v31 = vadd.f32 %v1309_v12, %v1297_v11  ;;  %v1338_v30 = vadd.f32 %v2806_v20, %v1318_v5  ;;  %v1555_v62 = vld [vmem:[%s2317_s10 + $0x38] sm:$0xff]  ;;  %s2038_s10 = scalar_lea.vmem %s2037_s26, 2048 }
 0x290   : > { %v1353_v10 = vrot.slane %v1233_v42, 7  ;;  %v1370_v39 = vsel %vm511_vm0, 0.0, %v1354_v1  ;;  %p2040_p9 = scmp.lt.s32.totalorder %s2038_s10, %s2032_s25 }
 0x291   : > { %v1429_v6 = vpack.c.bf16 %v1424_v28, %v1423_v36  ;;  %v1337_v21 = vadd.f32 %v2901_v27, %v1317_v31  ;;  %v1386_v13 = vrot.slane %v1338_v30, 1  ;;  %v1418_v19 = vadd.f32 %v1370_v39, %v1286_v18 }
 0x292   : > { %v1369_v26 = vsel %vm511_vm0, 0.0, %v1353_v10  ;;  %p2041_p12 = por %p2040_p9, %p2039_p7 }
 0x293   : > { %1829 = vmatprep.mubr.bf16.mxu1 %v1429_v6  ;;  %v1385_v15 = vrot.slane %v1337_v21, 1  ;;  %v1402_v8 = vsel %vm544_vm1, %v1386_v13, 0.0  ;;  %v1417_v23 = vadd.f32 %v1369_v26, %v1285_v59 }
 0x294   : > { %v1410_v20 = vsel %vm248_vm2, %v1402_v8, 0.0  ;;  %p2042_p2 = pnand %p2041_p12, %p2035_p3 }
 0x295   : > { %v1401_v25 = vsel %vm544_vm1, %v1385_v15, 0.0  ;;  %v1426_v16 = vadd.f32 %v1418_v19, %v1410_v20 }
 0x296   : > { %v1409_v27 = vsel %vm248_vm2, %v1401_v25, 0.0 }
 0x297   : > { %v1425_v9 = vadd.f32 %v1417_v23, %v1409_v27 }
 0x299   : > { %v1430_v37 = vpack.c.bf16 %v1426_v16, %v1425_v9 }
 0x29b   : > { %1830 = vmatmul.mubr.bf16.vlgmr.msra.gmra.mrb[8].mxu1 %v1430_v37 }
 0x35b   : > { %v1827_v33 = vpop.f32.mrb[8].mxu0 }
 0x35c   : > { %v1526_v38 = vadd.f32 %v1827_v33, %v1709_v29  ;;  %v1517_v14 = vpop.f32.mrb[9].mxu0 }
 0x35d   : > { %v1518_v22 = vadd.f32 %v1709_v29, %v1517_v14  ;;  %v1828_v44 = vpop.f32.mrb[10].mxu0 }
 0x35e   : > { %v1558_v3 = vadd.f32 %v1550_v32, %v1526_v38  ;;  %v1529_v43 = vadd.f32 %v1828_v44, %v1709_v29  ;;  %v1520_v50 = vpop.f32.mrb[11].mxu0 }
 0x35f   : > { %v1556_v55 = vadd.f32 %v1548_v34, %v1518_v22  ;;  %v1521_v58 = vadd.f32 %v1709_v29, %v1520_v50 }
 0x360   : > { %1566 = vst [vmem:[%s244_s24 + $0x10] sm:$0xff] %v1558_v3  ;;  %v1559_v45 = vadd.f32 %v1551_v51, %v1529_v43 }
 0x361   : > { %1564 = vst [vmem:[%s244_s24] sm:$0xff] %v1556_v55  ;;  %v1557_v41 = vadd.f32 %v1549_v4, %v1521_v58 }
 0x362   : > { %1567 = vst [vmem:[%s244_s24 + $0x18] sm:$0xff] %v1559_v45 }
 0x363   : > { %1565 = vst [vmem:[%s244_s24 + $0x8] sm:$0xff] %v1557_v41 }
 0x36e   : > { %v1831_v57 = vpop.f32.mrb[8].mxu1 }
 0x36f   : > { %v1542_v17 = vadd.f32 %v1831_v57, %v1709_v29  ;;  %v1533_v35 = vpop.f32.mrb[9].mxu1 }
 0x370   : > { %v1534_v40 = vadd.f32 %v1709_v29, %v1533_v35  ;;  %v1832_v61 = vpop.f32.mrb[10].mxu1 }
 0x371   : > { %v1562_v7 = vadd.f32 %v1554_v60, %v1542_v17  ;;  %v1545_v46 = vadd.f32 %v1832_v61, %v1709_v29  ;;  %v1536_v47 = vpop.f32.mrb[11].mxu1 }
 0x372   : > { %v1560_v24 = vadd.f32 %v1552_v53, %v1534_v40  ;;  %v1537_v11 = vadd.f32 %v1709_v29, %v1536_v47 }
 0x373   : > { %1570 = vst [vmem:[%s244_s24 + $0x30] sm:$0xff] %v1562_v7  ;;  %v1563_v52 = vadd.f32 %v1555_v62, %v1545_v46 }
 0x374   : > { %1568 = vst [vmem:[%s244_s24 + $0x20] sm:$0xff] %v1560_v24  ;;  %v1561_v42 = vadd.f32 %v1553_v63, %v1537_v11 }
 0x375   : > { %1571 = vst [vmem:[%s244_s24 + $0x38] sm:$0xff] %v1563_v52 }
 0x376   : > { %1569 = vst [vmem:[%s244_s24 + $0x28] sm:$0xff] %v1561_v42 }
 0x377   : > { %2045 = shalt.err (!%p2042_p2)
}
 0x378   : > { %s2046_s21 = scalar_lea.hbm %s2989_s29, 1024  ;;  %s2050_s30 = scalar_lea.hbm %s3037_s4, 2048 }
 0x379   : > { %p2047_p13 = scmp.ne.s32.totalorder %s2989_s29, %s2046_s21  ;;  %p2051_p4 = scmp.lt.u32.totalorder %s2989_s29, %s3037_s4 }
 0x37a   : > { %p2052_p5 = scmp.lt.u32.totalorder %s2050_s30, %s2046_s21  ;;  %p2054_p11 = scmp.lt.u32.totalorder %s2046_s21, %s2989_s29 }
 0x37b   : > { %p2048_p6 = pnand %p2047_p13, %p3051_p0 }
 0x37c   : > { %p2053_p8 = por %p2052_p5, %p2051_p4 }
 0x37d   : > { %p2049_p10 = pneg %p2048_p6 }
 0x37e   : > { %p2055_p1 = por %p2054_p11, %p2053_p8 }
 0x380   : > { %p2056_p3 = pnand %p2055_p1, %p2049_p10 }
 0x382   : > { %2059 = shalt.err (!%p2056_p3)
}
 0x383   : > { %s2112_s24 = smov 128   ;;  %s2113_s28 = smov 8  }
 0x384   : > { %1859 = dma.vmem_to_hbm [thread:$0]  (%p3051_p0), %s2984_s20, 1024, %s2989_s29, %s1573_s19, %s2112_s24, %s2112_s24, %s2113_s28  }
 0x385 PF: > { %s1601_s11 = sand.u32 1, %s2090_s15   ;;  %p3052_p7 = scmp.ne.s32.totalorder %s3042_s22, 0 }
 0x386   : > { %p3053_p9 = scmp.ge.s32.totalorder %s2102_s18, 2  ;;  %s1602_s12 = scalar_lea.sflag [#allocation6], %s1601_s11 }
 0x388   : > { %p1873_p12 = pnand %p3053_p9, %p3052_p7 }
 0x38a   : > { %2085 = dma.done.wait (!%p1873_p12), %s1602_s12, 1024  }
 0x38b   : > { %2087 = vsyncadd (!%p1873_p12), %s1602_s12, 4294966272  ;;  %p18_p2 = scmp.ge.s32.totalorder %s2249_s9, 4   ;;  %s3054_s15 = smov %s2094_s16 }
 0x38c   : > { %s3055_s16 = smov %s2098_s17  ;;  %s3056_s17 = smov %s2265_s14 }
 0x38d   : > { %s3057_s18 = smov %s2249_s9  ;;  %20 = sbr.rel (!%p18_p2) target bundleno = 6 (0x6), region = 97 }
 0x394   :  { %1607 = vsyncpa [#allocation5], 1 }
 0x395   :  { %1609 = vsyncpa [#allocation5 + $0x1], 1 }
 0x396   :  { %1610 = vsyncpa [#allocation8], 1 }
 0x397   :  { %1611 = vsyncpa [#allocation6], 1 }
 0x398   :  { %1613 = vsyncpa [#allocation6 + $0x1], 1 }

</bundles_post_ra>
